<compile_context>
chip_gen: v7x
topology: tpu7x:2x2x1
jax: 0.10.0
libtpu: 0.0.40
codegen_flags: <defaults>
</compile_context>

<pallas_src>
import functools

import jax
import jax.numpy as jnp
from jax.experimental import pallas as pl
from jax.experimental.pallas import tpu as pltpu


def _round_up(x, m):
    return (x + m - 1) // m * m


# --------------------------------------------------------------------------
# Pallas kernels
# --------------------------------------------------------------------------
def _channel_stats_kernel(x_ref, o_ref):
    """Tiled per-channel sum / sum-of-squares with a resident (2, C) accumulator."""
    @pl.when(pl.program_id(0) == 0)
    def _():
        o_ref[...] = jnp.zeros_like(o_ref)

    x = x_ref[...].astype(jnp.float32)                       # (TM, C)
    o_ref[0:1, :] += jnp.sum(x, axis=0, keepdims=True)
    o_ref[1:2, :] += jnp.sum(x * x, axis=0, keepdims=True)


def _dual_conv_kernel(xph_ref, mask_ref, bn_ref, wd_ref, w1_ref,
                      res_ref, c1_ref, st_ref, *,
                      k, s, Hq, Ho, Wo, slope, mxu_dtype):
    """Fused, per-image:
         residual = down_conv(BN_d(x))            (stride s, k x k)
         c1       = conv1(LeakyReLU(BN_1(x)))     (stride s, k x k)
         st       = per-image [sum, sumsq] of c1  (for bn2)
       x arrives as a zero-padded, stride-phase-folded NHWC tile; `mask` is 1
       on real pixels and 0 on padding so the BN shift never leaks into the
       conv's zero padding."""
    Cin = xph_ref.shape[-1]
    Cout = res_ref.shape[-1]

    scale_d = bn_ref[0:1, :]
    shift_d = bn_ref[1:2, :]
    scale_1 = bn_ref[2:3, :]
    shift_1 = bn_ref[3:4, :]

    acc_r = jnp.zeros((Ho * Wo, Cout), jnp.float32)
    acc_c = jnp.zeros((Ho * Wo, Cout), jnp.float32)

    for ki in range(k):
        for kj in range(k):
            ph = (ki % s) * s + (kj % s)
            r0 = ph * Hq + ki // s
            c0 = kj // s
            t = ki * k + kj
            win = xph_ref[0, r0:r0 + Ho, c0:c0 + Wo, :].reshape(Ho * Wo, Cin)
            mwin = mask_ref[r0:r0 + Ho, c0:c0 + Wo, :].reshape(Ho * Wo, 1)

            # down branch: BatchNorm (no activation), zero at padded taps
            a_d = ((win * scale_d + shift_d) * mwin).astype(mxu_dtype)
            acc_r += jnp.dot(a_d, wd_ref[t], preferred_element_type=jnp.float32)

            # main branch: BatchNorm + LeakyReLU(0.2), zero at padded taps
            a_1 = win * scale_1 + shift_1
            a_1 = (jnp.where(a_1 >= 0, a_1, slope * a_1) * mwin).astype(mxu_dtype)
            acc_c += jnp.dot(a_1, w1_ref[t], preferred_element_type=jnp.float32)

    res_ref[0] = acc_r.reshape(Ho, Wo, Cout).astype(res_ref.dtype)
    c1_ref[0] = acc_c.reshape(Ho, Wo, Cout).astype(c1_ref.dtype)
    st_ref[0, 0:1, :] = jnp.sum(acc_c, axis=0, keepdims=True)
    st_ref[0, 1:2, :] = jnp.sum(acc_c * acc_c, axis=0, keepdims=True)


def _conv2_res_kernel(cph_ref, mask_ref, bn_ref, w2_ref, res_ref, o_ref, *,
                      Ho, Wo, slope, mxu_dtype):
    """Fused, per-image:  out = conv2(LeakyReLU(BN_2(c1))) + residual."""
    Cout = res_ref.shape[-1]
    scale = bn_ref[0:1, :]
    shift = bn_ref[1:2, :]

    acc = res_ref[0].reshape(Ho * Wo, Cout).astype(jnp.float32)
    for ki in range(3):
        for kj in range(3):
            win = cph_ref[0, ki:ki + Ho, kj:kj + Wo, :].reshape(Ho * Wo, Cout)
            mwin = mask_ref[ki:ki + Ho, kj:kj + Wo, :].reshape(Ho * Wo, 1)
            a = win * scale + shift
            a = (jnp.where(a >= 0, a, slope * a) * mwin).astype(mxu_dtype)
            acc += jnp.dot(a, w2_ref[ki * 3 + kj],
                           preferred_element_type=jnp.float32)

    o_ref[0] = acc.reshape(Ho, Wo, Cout).astype(o_ref.dtype)


# --------------------------------------------------------------------------
# pallas_call wrappers
# --------------------------------------------------------------------------
def channel_stats(x2d, *, max_rows=2048):
    """x2d: (M, C) -> (2, C) [sum; sum of squares], tiled over M."""
    M, C = x2d.shape
    TM = min(_round_up(-(-M // 2), 8), max_rows)
    Mp = _round_up(M, TM)
    if Mp != M:
        x2d = jnp.pad(x2d, ((0, Mp - M), (0, 0)))            # zeros don't change sums
    return pl.pallas_call(
        _channel_stats_kernel,
        out_shape=jax.ShapeDtypeStruct((2, C), jnp.float32),
        grid=(Mp // TM,),
        in_specs=[pl.BlockSpec((TM, C), lambda i: (i, 0))],
        out_specs=pl.BlockSpec((2, C), lambda i: (0, 0)),
        compiler_params=pltpu.CompilerParams(dimension_semantics=("arbitrary",)),
    )(x2d)


def dual_conv(x_ph, mask, bn_pack, wd, w1, *, k, s, Ho, Wo, slope, mxu_dtype):
    N, PHq, Wq, Cin = x_ph.shape
    Hq = PHq // (s * s)
    Cout = wd.shape[-1]
    kernel = functools.partial(_dual_conv_kernel, k=k, s=s, Hq=Hq, Ho=Ho, Wo=Wo,
                               slope=slope, mxu_dtype=mxu_dtype)
    return pl.pallas_call(
        kernel,
        out_shape=(
            jax.ShapeDtypeStruct((N, Ho, Wo, Cout), jnp.float32),   # residual
            jax.ShapeDtypeStruct((N, Ho, Wo, Cout), jnp.float32),   # c1
            jax.ShapeDtypeStruct((N, 2, Cout), jnp.float32),        # bn2 partial stats
        ),
        grid=(N,),
        in_specs=[
            pl.BlockSpec((1, PHq, Wq, Cin), lambda n: (n, 0, 0, 0)),
            pl.BlockSpec((PHq, Wq, 1), lambda n: (0, 0, 0)),
            pl.BlockSpec((4, Cin), lambda n: (0, 0)),
            pl.BlockSpec((k * k, Cin, Cout), lambda n: (0, 0, 0)),
            pl.BlockSpec((k * k, Cin, Cout), lambda n: (0, 0, 0)),
        ],
        out_specs=(
            pl.BlockSpec((1, Ho, Wo, Cout), lambda n: (n, 0, 0, 0)),
            pl.BlockSpec((1, Ho, Wo, Cout), lambda n: (n, 0, 0, 0)),
            pl.BlockSpec((1, 2, Cout), lambda n: (n, 0, 0)),
        ),
        compiler_params=pltpu.CompilerParams(dimension_semantics=("parallel",)),
    )(x_ph, mask, bn_pack, wd, w1)


def conv2_residual(c1_ph, mask2, bn2_pack, w2, residual, *, Ho, Wo, slope, mxu_dtype):
    N, Hq2, Wq2, Cout = c1_ph.shape
    kernel = functools.partial(_conv2_res_kernel, Ho=Ho, Wo=Wo,
                               slope=slope, mxu_dtype=mxu_dtype)
    return pl.pallas_call(
        kernel,
        out_shape=jax.ShapeDtypeStruct((N, Ho, Wo, Cout), jnp.float32),
        grid=(N,),
        in_specs=[
            pl.BlockSpec((1, Hq2, Wq2, Cout), lambda n: (n, 0, 0, 0)),
            pl.BlockSpec((Hq2, Wq2, 1), lambda n: (0, 0, 0)),
            pl.BlockSpec((2, Cout), lambda n: (0, 0)),
            pl.BlockSpec((9, Cout, Cout), lambda n: (0, 0, 0)),
            pl.BlockSpec((1, Ho, Wo, Cout), lambda n: (n, 0, 0, 0)),
        ],
        out_specs=pl.BlockSpec((1, Ho, Wo, Cout), lambda n: (n, 0, 0, 0)),
        compiler_params=pltpu.CompilerParams(dimension_semantics=("parallel",)),
    )(c1_ph, mask2, bn2_pack, w2, residual)


# --------------------------------------------------------------------------
# Plain-JAX glue (layout plumbing only — no data expansion)
# --------------------------------------------------------------------------
def _phase_decompose(x_nhwc, k, s, p, Ho, Wo):
    """Zero-pad spatially and regroup into the s*s stride-phases, folded as
    (N, s*s*Hq, Wq, C).  Tap (ki, kj) of the stride-s k x k conv reads rows
    [ph*Hq + ki//s : ... + Ho] x cols [kj//s : kj//s + Wo] with unit stride,
    where ph = (ki % s)*s + (kj % s).  Pure relayout (~input-sized)."""
    N, H, W, C = x_nhwc.shape
    Hq = (k - 1) // s + Ho
    Wq = (k - 1) // s + Wo
    Hp, Wp = s * Hq, s * Wq
    assert Hp >= H + 2 * p and Wp >= W + 2 * p, "unsupported conv geometry"
    x = jnp.pad(x_nhwc, ((0, 0), (p, Hp - H - p), (p, Wp - W - p), (0, 0)))
    x = x.reshape(N, Hq, s, Wq, s, C)
    x = jnp.transpose(x, (0, 2, 4, 1, 3, 5))                  # (N, s, s, Hq, Wq, C)
    return x.reshape(N, s * s * Hq, Wq, C), Hq


def _bn_scale_shift(total, total_sq, count, gamma, beta, eps):
    """Training-mode BatchNorm (biased variance) folded to per-channel scale/shift."""
    mean = total / count
    var = jnp.maximum(total_sq / count - mean * mean, 0.0)
    scale = gamma * jax.lax.rsqrt(var + eps)
    shift = beta - mean * scale
    return scale, shift


def prepare_params(params, mxu_dtype=jnp.bfloat16):
    """Hoisted parameter preprocessing: OIHW -> (taps, Cin, Cout), bf16 for MXU."""
    def taps(w_oihw):
        Cout, Cin, KH, KW = w_oihw.shape
        return jnp.transpose(w_oihw, (2, 3, 1, 0)).reshape(KH * KW, Cin, Cout)

    return dict(
        wd=taps(params["down_w"]).astype(mxu_dtype),
        w1=taps(params["conv1_w"]).astype(mxu_dtype),
        w2=taps(params["conv2_w"]).astype(mxu_dtype),
        gamma_d=params["down_bn_gamma"], beta_d=params["down_bn_beta"],
        gamma_1=params["bn1_gamma"], beta_1=params["bn1_beta"],
        gamma_2=params["bn2_gamma"], beta_2=params["bn2_beta"],
    )


# --------------------------------------------------------------------------
# Full forward (= ResidualBlockWithDownSampling.forward)
# --------------------------------------------------------------------------
def residual_block_forward(x_nchw, prep, *, kernel_size, stride, padding,
                           eps=1e-5, slope=0.2, mxu_dtype=jnp.bfloat16):
    N, Cin, H, W = x_nchw.shape
    Cout = prep["w1"].shape[-1]
    Ho = (H + 2 * padding - kernel_size) // stride + 1
    Wo = (W + 2 * padding - kernel_size) // stride + 1

    x = jnp.transpose(x_nchw, (0, 2, 3, 1))                   # NHWC, channels on lanes

    # Pass 1 (Pallas): per-channel sum / sumsq of x — shared by down-BN and bn1.
    st_x = channel_stats(x.reshape(N * H * W, Cin))
    m_x = float(N * H * W)
    scale_d, shift_d = _bn_scale_shift(st_x[0], st_x[1], m_x,
                                       prep["gamma_d"], prep["beta_d"], eps)
    scale_1, shift_1 = _bn_scale_shift(st_x[0], st_x[1], m_x,
                                       prep["gamma_1"], prep["beta_1"], eps)
    bn_pack = jnp.stack([scale_d, shift_d, scale_1, shift_1], axis=0)   # (4, Cin)

    # Pass 2 (Pallas, fused): residual, c1 and bn2 partial stats from ONE DMA of x.
    x_ph, _ = _phase_decompose(x, kernel_size, stride, padding, Ho, Wo)
    mask, _ = _phase_decompose(jnp.ones((1, H, W, 1), jnp.float32),
                               kernel_size, stride, padding, Ho, Wo)
    residual, c1, st_part = dual_conv(
        x_ph, mask[0], bn_pack, prep["wd"], prep["w1"],
        k=kernel_size, s=stride, Ho=Ho, Wo=Wo, slope=slope, mxu_dtype=mxu_dtype)

    st2 = jnp.sum(st_part, axis=0)                                      # (2, Cout)
    scale_2, shift_2 = _bn_scale_shift(st2[0], st2[1], float(N * Ho * Wo),
                                       prep["gamma_2"], prep["beta_2"], eps)
    bn2_pack = jnp.stack([scale_2, shift_2], axis=0)                    # (2, Cout)

    # Pass 3 (Pallas, fused): out = conv2(LeakyReLU(bn2(c1))) + residual.
    c1_ph, _ = _phase_decompose(c1, 3, 1, 1, Ho, Wo)
    mask2, _ = _phase_decompose(jnp.ones((1, Ho, Wo, 1), jnp.float32), 3, 1, 1, Ho, Wo)
    out = conv2_residual(c1_ph, mask2[0], bn2_pack, prep["w2"], residual,
                         Ho=Ho, Wo=Wo, slope=slope, mxu_dtype=mxu_dtype)

    return jnp.transpose(out, (0, 3, 1, 2))                   # back to NCHW


# --------------------------------------------------------------------------
# Pure-JAX reference (lax.conv) for a correctness check
# --------------------------------------------------------------------------
def _reference_forward(x_nchw, params, *, kernel_size, stride, padding):
    x = jnp.transpose(x_nchw, (0, 2, 3, 1))

    def bn(h, g, b):
        mean = jnp.mean(h, axis=(0, 1, 2), keepdims=True)
        var = jnp.mean((h - mean) ** 2, axis=(0, 1, 2), keepdims=True)
        return (h - mean) * jax.lax.rsqrt(var + 1e-5) * g + b

    def lrelu(h):
        return jnp.where(h >= 0, h, 0.2 * h)

    def conv(h, w_oihw, s, p):
        return jax.lax.conv_general_dilated(
            h, jnp.transpose(w_oihw, (2, 3, 1, 0)),
            window_strides=(s, s), padding=[(p, p), (p, p)],
            dimension_numbers=("NHWC", "HWIO", "NHWC"))

    residual = conv(bn(x, params["down_bn_gamma"], params["down_bn_beta"]),
                    params["down_w"], stride, padding)
    out = lrelu(bn(x, params["bn1_gamma"], params["bn1_beta"]))
    out = conv(out, params["conv1_w"], stride, padding)
    out = lrelu(bn(out, params["bn2_gamma"], params["bn2_beta"]))
    out = conv(out, params["conv2_w"], 1, 1)
    return jnp.transpose(residual + out, (0, 3, 1, 2))


# --------------------------------------------------------------------------
if __name__ == "__main__":
    key = jax.random.PRNGKey(0)
    in_channels, out_channels = 4, 8
    kernel_size, stride, padding = 3, 2, 1
    N, H, W = 2, 16, 16

    keys = jax.random.split(key, 8)
    params = {
        "down_w": 0.1 * jax.random.normal(
            keys[0], (out_channels, in_channels, kernel_size, kernel_size), jnp.float32),
        "conv1_w": 0.1 * jax.random.normal(
            keys[1], (out_channels, in_channels, kernel_size, kernel_size), jnp.float32),
        "conv2_w": 0.1 * jax.random.normal(
            keys[2], (out_channels, out_channels, 3, 3), jnp.float32),
        "down_bn_gamma": 1.0 + 0.1 * jax.random.normal(keys[3], (in_channels,), jnp.float32),
        "down_bn_beta": 0.1 * jax.random.normal(keys[4], (in_channels,), jnp.float32),
        "bn1_gamma": 1.0 + 0.1 * jax.random.normal(keys[5], (in_channels,), jnp.float32),
        "bn1_beta": 0.1 * jax.random.normal(keys[6], (in_channels,), jnp.float32),
        "bn2_gamma": jnp.ones((out_channels,), jnp.float32),   # PyTorch default init
        "bn2_beta": jnp.zeros((out_channels,), jnp.float32),
    }
    x = jax.random.normal(keys[7], (N, in_channels, H, W), jnp.float32)

    prep = prepare_params(params)
    fwd = jax.jit(functools.partial(residual_block_forward,
                                    kernel_size=kernel_size, stride=stride,
                                    padding=padding))
    out = jax.block_until_ready(fwd(x, prep))

    ref = _reference_forward(x, params, kernel_size=kernel_size,
                             stride=stride, padding=padding)
    assert out.shape == ref.shape == (N, out_channels, H // stride, W // stride)
    max_err = float(jnp.max(jnp.abs(out - ref)))
    # bf16 MXU inputs with f32 accumulation -> allow ~1e-2-scale rounding on
    # O(1)-magnitude outputs vs the f32 lax.conv reference.
    assert max_err < 5e-2, f"mismatch vs reference: {max_err}"

    print("KERNEL_OK")
</pallas_src>

<mosaic_0001>
module attributes {stable_mosaic.version = 11 : i64} {
  func.func @_channel_stats_kernel(%arg0: i32, %arg1: memref<256x4xf32, #tpu.memory_space<vmem>>, %arg2: memref<2x4xf32, #tpu.memory_space<vmem>>) attributes {dimension_semantics = [#tpu.dimension_semantics<arbitrary>], iteration_bounds = array<i64: 2>, scalar_prefetch = 0 : i64, scratch_operands = 0 : i64, tpu.core_type = #tpu.core_type<tc>, window_params = [{transform_indices = @transform_0, window_bounds = array<i64: 256, 4>}, {pipeline_mode = #tpu.pipeline_mode<synchronous>, transform_indices = @transform_1, window_bounds = array<i64: 2, 4>}]} {
    %c0_i32 = arith.constant 0 : i32
    %0 = arith.cmpi eq, %arg0, %c0_i32 : i32
    %1 = arith.extui %0 : i1 to i32
    %c0_i32_0 = arith.constant 0 : i32
    %2 = arith.cmpi ne, %1, %c0_i32_0 : i32
    scf.if %2 {
      %cst_10 = arith.constant 0.000000e+00 : f32
      %15 = vector.broadcast %cst_10 : f32 to vector<2x4xf32>
      %c0_11 = arith.constant 0 : index
      %c0_12 = arith.constant 0 : index
      %16 = vector.load %arg2[%c0_11, %c0_12] : memref<2x4xf32, #tpu.memory_space<vmem>>, vector<2x4xf32>
      tpu.vector_store %arg2[%c0_11, %c0_12], %15 {strides = array<i32>} : memref<2x4xf32, #tpu.memory_space<vmem>>, vector<2x4xf32>,
    } else {
    }
    %c0 = arith.constant 0 : index
    %c0_1 = arith.constant 0 : index
    %3 = vector.load %arg1[%c0, %c0_1] : memref<256x4xf32, #tpu.memory_space<vmem>>, vector<256x4xf32>
    %c0_2 = arith.constant 0 : index
    %c0_3 = arith.constant 0 : index
    %4 = vector.load %arg2[%c0_2, %c0_3] : memref<2x4xf32, #tpu.memory_space<vmem>>, vector<1x4xf32>
    %cst = arith.constant dense<0.000000e+00> : vector<4xf32>
    %5 = vector.multi_reduction <add>, %3, %cst [0] : vector<256x4xf32> to vector<4xf32>
    %6 = vector.shape_cast %5 : vector<4xf32> to vector<1x4xf32>
    %7 = arith.addf %4, %6 : vector<1x4xf32>
    %c0_4 = arith.constant 0 : index
    %c0_5 = arith.constant 0 : index
    %8 = vector.load %arg2[%c0_4, %c0_5] : memref<2x4xf32, #tpu.memory_space<vmem>>, vector<1x4xf32>
    tpu.vector_store %arg2[%c0_4, %c0_5], %7 {strides = array<i32>} : memref<2x4xf32, #tpu.memory_space<vmem>>, vector<1x4xf32>,
    %c1 = arith.constant 1 : index
    %c0_6 = arith.constant 0 : index
    %9 = vector.load %arg2[%c1, %c0_6] : memref<2x4xf32, #tpu.memory_space<vmem>>, vector<1x4xf32>
    %10 = arith.mulf %3, %3 : vector<256x4xf32>
    %cst_7 = arith.constant dense<0.000000e+00> : vector<4xf32>
    %11 = vector.multi_reduction <add>, %10, %cst_7 [0] : vector<256x4xf32> to vector<4xf32>
    %12 = vector.shape_cast %11 : vector<4xf32> to vector<1x4xf32>
    %13 = arith.addf %9, %12 : vector<1x4xf32>
    %c1_8 = arith.constant 1 : index
    %c0_9 = arith.constant 0 : index
    %14 = vector.load %arg2[%c1_8, %c0_9] : memref<2x4xf32, #tpu.memory_space<vmem>>, vector<1x4xf32>
    tpu.vector_store %arg2[%c1_8, %c0_9], %13 {strides = array<i32>} : memref<2x4xf32, #tpu.memory_space<vmem>>, vector<1x4xf32>,
    return
  }
  func.func @transform_0(%arg0: i32) -> (i32, i32) {
    %c0_i32 = arith.constant 0 : i32
    %c0_i32_0 = arith.constant 0 : i32
    return %arg0, %c0_i32 : i32, i32
  }
  func.func @transform_1(%arg0: i32) -> (i32, i32) {
    %c0_i32 = arith.constant 0 : i32
    %c0_i32_0 = arith.constant 0 : i32
    %c0_i32_1 = arith.constant 0 : i32
    return %c0_i32, %c0_i32_0 : i32, i32
  }
}

module attributes {stable_mosaic.version = 11 : i64} {
  func.func @_dual_conv_kernel(%arg0: i32, %arg1: memref<1x36x9x4xf32, #tpu.memory_space<vmem>>, %arg2: memref<36x9x1xf32, #tpu.memory_space<vmem>>, %arg3: memref<4x4xf32, #tpu.memory_space<vmem>>, %arg4: memref<9x4x8xbf16, #tpu.memory_space<vmem>>, %arg5: memref<9x4x8xbf16, #tpu.memory_space<vmem>>, %arg6: memref<1x8x8x8xf32, #tpu.memory_space<vmem>>, %arg7: memref<1x8x8x8xf32, #tpu.memory_space<vmem>>, %arg8: memref<1x2x8xf32, #tpu.memory_space<vmem>>) attributes {dimension_semantics = [#tpu.dimension_semantics<parallel>], iteration_bounds = array<i64: 2>, scalar_prefetch = 0 : i64, scratch_operands = 0 : i64, tpu.core_type = #tpu.core_type<tc>, window_params = [{transform_indices = @transform_0, window_bounds = array<i64: 1, 36, 9, 4>}, {pipeline_mode = #tpu.pipeline_mode<synchronous>, transform_indices = @transform_1, window_bounds = array<i64: 36, 9, 1>}, {pipeline_mode = #tpu.pipeline_mode<synchronous>, transform_indices = @transform_2, window_bounds = array<i64: 4, 4>}, {pipeline_mode = #tpu.pipeline_mode<synchronous>, transform_indices = @transform_3, window_bounds = array<i64: 9, 4, 8>}, {pipeline_mode = #tpu.pipeline_mode<synchronous>, transform_indices = @transform_4, window_bounds = array<i64: 9, 4, 8>}, {transform_indices = @transform_5, window_bounds = array<i64: 1, 8, 8, 8>}, {transform_indices = @transform_6, window_bounds = array<i64: 1, 8, 8, 8>}, {transform_indices = @transform_7, window_bounds = array<i64: 1, 2, 8>}]} {
    %c0 = arith.constant 0 : index
    %c0_0 = arith.constant 0 : index
    %0 = vector.load %arg3[%c0, %c0_0] : memref<4x4xf32, #tpu.memory_space<vmem>>, vector<1x4xf32>
    %c1 = arith.constant 1 : index
    %c0_1 = arith.constant 0 : index
    %1 = vector.load %arg3[%c1, %c0_1] : memref<4x4xf32, #tpu.memory_space<vmem>>, vector<1x4xf32>
    %c2 = arith.constant 2 : index
    %c0_2 = arith.constant 0 : index
    %2 = vector.load %arg3[%c2, %c0_2] : memref<4x4xf32, #tpu.memory_space<vmem>>, vector<1x4xf32>
    %c3 = arith.constant 3 : index
    %c0_3 = arith.constant 0 : index
    %3 = vector.load %arg3[%c3, %c0_3] : memref<4x4xf32, #tpu.memory_space<vmem>>, vector<1x4xf32>
    %cst = arith.constant 0.000000e+00 : f32
    %4 = vector.broadcast %cst : f32 to vector<64x8xf32>
    %cst_4 = arith.constant 0.000000e+00 : f32
    %5 = vector.broadcast %cst_4 : f32 to vector<64x8xf32>
    %c0_5 = arith.constant 0 : index
    %c0_6 = arith.constant 0 : index
    %c0_7 = arith.constant 0 : index
    %c0_8 = arith.constant 0 : index
    %6 = vector.load %arg1[%c0_5, %c0_6, %c0_7, %c0_8] : memref<1x36x9x4xf32, #tpu.memory_space<vmem>>, vector<1x8x8x4xf32>
    %7 = vector.shape_cast %6 : vector<1x8x8x4xf32> to vector<8x8x4xf32>
    %8 = vector.shape_cast %7 : vector<8x8x4xf32> to vector<64x4xf32>
    %c0_9 = arith.constant 0 : index
    %c0_10 = arith.constant 0 : index
    %c0_11 = arith.constant 0 : index
    %9 = vector.load %arg2[%c0_9, %c0_10, %c0_11] : memref<36x9x1xf32, #tpu.memory_space<vmem>>, vector<8x8x1xf32>
    %10 = vector.shape_cast %9 : vector<8x8x1xf32> to vector<64x1xf32>
    %11 = vector.broadcast %0 : vector<1x4xf32> to vector<64x4xf32>
    %12 = arith.mulf %8, %11 : vector<64x4xf32>
    %13 = vector.broadcast %1 : vector<1x4xf32> to vector<64x4xf32>
    %14 = arith.addf %12, %13 : vector<64x4xf32>
    %15 = vector.broadcast %10 : vector<64x1xf32> to vector<64x4xf32>
    %16 = arith.mulf %14, %15 : vector<64x4xf32>
    %17 = arith.truncf %16 : vector<64x4xf32> to vector<64x4xbf16>
    %c0_12 = arith.constant 0 : index
    %c0_13 = arith.constant 0 : index
    %c0_14 = arith.constant 0 : index
    %18 = vector.load %arg4[%c0_12, %c0_13, %c0_14] : memref<9x4x8xbf16, #tpu.memory_space<vmem>>, vector<1x4x8xbf16>
    %19 = vector.shape_cast %18 : vector<1x4x8xbf16> to vector<4x8xbf16>
    %cst_15 = arith.constant dense<0.000000e+00> : vector<64x8xf32>
    %20 = tpu.matmul %17, %19, %cst_15 {dimension_numbers = #tpu.dot_dimension_numbers<[1], [0], [0], [1], [0, 0, 1, 1], [], []>} : vector<64x4xbf16>, vector<4x8xbf16>, vector<64x8xf32> -> vector<64x8xf32>
    %21 = arith.addf %4, %20 : vector<64x8xf32>
    %22 = vector.broadcast %2 : vector<1x4xf32> to vector<64x4xf32>
    %23 = arith.mulf %8, %22 : vector<64x4xf32>
    %24 = vector.broadcast %3 : vector<1x4xf32> to vector<64x4xf32>
    %25 = arith.addf %23, %24 : vector<64x4xf32>
    %cst_16 = arith.constant 0.000000e+00 : f32
    %26 = vector.broadcast %cst_16 : f32 to vector<64x4xf32>
    %27 = arith.cmpf oge, %25, %26 : vector<64x4xf32>
    %cst_17 = arith.constant 2.000000e-01 : f32
    %28 = vector.broadcast %cst_17 : f32 to vector<64x4xf32>
    %29 = arith.mulf %28, %25 : vector<64x4xf32>
    %30 = arith.select %27, %25, %29 : vector<64x4xi1>, vector<64x4xf32>
    %31 = vector.broadcast %10 : vector<64x1xf32> to vector<64x4xf32>
    %32 = arith.mulf %30, %31 : vector<64x4xf32>
    %33 = arith.truncf %32 : vector<64x4xf32> to vector<64x4xbf16>
    %c0_18 = arith.constant 0 : index
    %c0_19 = arith.constant 0 : index
    %c0_20 = arith.constant 0 : index
    %34 = vector.load %arg5[%c0_18, %c0_19, %c0_20] : memref<9x4x8xbf16, #tpu.memory_space<vmem>>, vector<1x4x8xbf16>
    %35 = vector.shape_cast %34 : vector<1x4x8xbf16> to vector<4x8xbf16>
    %cst_21 = arith.constant dense<0.000000e+00> : vector<64x8xf32>
    %36 = tpu.matmul %33, %35, %cst_21 {dimension_numbers = #tpu.dot_dimension_numbers<[1], [0], [0], [1], [0, 0, 1, 1], [], []>} : vector<64x4xbf16>, vector<4x8xbf16>, vector<64x8xf32> -> vector<64x8xf32>
    %37 = arith.addf %5, %36 : vector<64x8xf32>
    %c0_22 = arith.constant 0 : index
    %c9 = arith.constant 9 : index
    %c0_23 = arith.constant 0 : index
    %c0_24 = arith.constant 0 : index
    %38 = vector.load %arg1[%c0_22, %c9, %c0_23, %c0_24] : memref<1x36x9x4xf32, #tpu.memory_space<vmem>>, vector<1x8x8x4xf32>
    %39 = vector.shape_cast %38 : vector<1x8x8x4xf32> to vector<8x8x4xf32>
    %40 = vector.shape_cast %39 : vector<8x8x4xf32> to vector<64x4xf32>
    %c9_25 = arith.constant 9 : index
    %c0_26 = arith.constant 0 : index
    %c0_27 = arith.constant 0 : index
    %41 = vector.load %arg2[%c9_25, %c0_26, %c0_27] : memref<36x9x1xf32, #tpu.memory_space<vmem>>, vector<8x8x1xf32>
    %42 = vector.shape_cast %41 : vector<8x8x1xf32> to vector<64x1xf32>
    %43 = vector.broadcast %0 : vector<1x4xf32> to vector<64x4xf32>
    %44 = arith.mulf %40, %43 : vector<64x4xf32>
    %45 = vector.broadcast %1 : vector<1x4xf32> to vector<64x4xf32>
    %46 = arith.addf %44, %45 : vector<64x4xf32>
    %47 = vector.broadcast %42 : vector<64x1xf32> to vector<64x4xf32>
    %48 = arith.mulf %46, %47 : vector<64x4xf32>
    %49 = arith.truncf %48 : vector<64x4xf32> to vector<64x4xbf16>
    %c1_28 = arith.constant 1 : index
    %c0_29 = arith.constant 0 : index
    %c0_30 = arith.constant 0 : index
    %50 = vector.load %arg4[%c1_28, %c0_29, %c0_30] : memref<9x4x8xbf16, #tpu.memory_space<vmem>>, vector<1x4x8xbf16>
    %51 = vector.shape_cast %50 : vector<1x4x8xbf16> to vector<4x8xbf16>
    %cst_31 = arith.constant dense<0.000000e+00> : vector<64x8xf32>
    %52 = tpu.matmul %49, %51, %cst_31 {dimension_numbers = #tpu.dot_dimension_numbers<[1], [0], [0], [1], [0, 0, 1, 1], [], []>} : vector<64x4xbf16>, vector<4x8xbf16>, vector<64x8xf32> -> vector<64x8xf32>
    %53 = arith.addf %21, %52 : vector<64x8xf32>
    %54 = vector.broadcast %2 : vector<1x4xf32> to vector<64x4xf32>
    %55 = arith.mulf %40, %54 : vector<64x4xf32>
    %56 = vector.broadcast %3 : vector<1x4xf32> to vector<64x4xf32>
    %57 = arith.addf %55, %56 : vector<64x4xf32>
    %cst_32 = arith.constant 0.000000e+00 : f32
    %58 = vector.broadcast %cst_32 : f32 to vector<64x4xf32>
    %59 = arith.cmpf oge, %57, %58 : vector<64x4xf32>
    %cst_33 = arith.constant 2.000000e-01 : f32
    %60 = vector.broadcast %cst_33 : f32 to vector<64x4xf32>
    %61 = arith.mulf %60, %57 : vector<64x4xf32>
    %62 = arith.select %59, %57, %61 : vector<64x4xi1>, vector<64x4xf32>
    %63 = vector.broadcast %42 : vector<64x1xf32> to vector<64x4xf32>
    %64 = arith.mulf %62, %63 : vector<64x4xf32>
    %65 = arith.truncf %64 : vector<64x4xf32> to vector<64x4xbf16>
    %c1_34 = arith.constant 1 : index
    %c0_35 = arith.constant 0 : index
    %c0_36 = arith.constant 0 : index
    %66 = vector.load %arg5[%c1_34, %c0_35, %c0_36] : memref<9x4x8xbf16, #tpu.memory_space<vmem>>, vector<1x4x8xbf16>
    %67 = vector.shape_cast %66 : vector<1x4x8xbf16> to vector<4x8xbf16>
    %cst_37 = arith.constant dense<0.000000e+00> : vector<64x8xf32>
    %68 = tpu.matmul %65, %67, %cst_37 {dimension_numbers = #tpu.dot_dimension_numbers<[1], [0], [0], [1], [0, 0, 1, 1], [], []>} : vector<64x4xbf16>, vector<4x8xbf16>, vector<64x8xf32> -> vector<64x8xf32>
    %69 = arith.addf %37, %68 : vector<64x8xf32>
    %c0_38 = arith.constant 0 : index
    %c0_39 = arith.constant 0 : index
    %c1_40 = arith.constant 1 : index
    %c0_41 = arith.constant 0 : index
    %70 = vector.load %arg1[%c0_38, %c0_39, %c1_40, %c0_41] : memref<1x36x9x4xf32, #tpu.memory_space<vmem>>, vector<1x8x8x4xf32>
    %71 = vector.shape_cast %70 : vector<1x8x8x4xf32> to vector<8x8x4xf32>
    %72 = vector.shape_cast %71 : vector<8x8x4xf32> to vector<64x4xf32>
    %c0_42 = arith.constant 0 : index
    %c1_43 = arith.constant 1 : index
    %c0_44 = arith.constant 0 : index
    %73 = vector.load %arg2[%c0_42, %c1_43, %c0_44] : memref<36x9x1xf32, #tpu.memory_space<vmem>>, vector<8x8x1xf32>
    %74 = vector.shape_cast %73 : vector<8x8x1xf32> to vector<64x1xf32>
    %75 = vector.broadcast %0 : vector<1x4xf32> to vector<64x4xf32>
    %76 = arith.mulf %72, %75 : vector<64x4xf32>
    %77 = vector.broadcast %1 : vector<1x4xf32> to vector<64x4xf32>
    %78 = arith.addf %76, %77 : vector<64x4xf32>
    %79 = vector.broadcast %74 : vector<64x1xf32> to vector<64x4xf32>
    %80 = arith.mulf %78, %79 : vector<64x4xf32>
    %81 = arith.truncf %80 : vector<64x4xf32> to vector<64x4xbf16>
    %c2_45 = arith.constant 2 : index
    %c0_46 = arith.constant 0 : index
    %c0_47 = arith.constant 0 : index
    %82 = vector.load %arg4[%c2_45, %c0_46, %c0_47] : memref<9x4x8xbf16, #tpu.memory_space<vmem>>, vector<1x4x8xbf16>
    %83 = vector.shape_cast %82 : vector<1x4x8xbf16> to vector<4x8xbf16>
    %cst_48 = arith.constant dense<0.000000e+00> : vector<64x8xf32>
    %84 = tpu.matmul %81, %83, %cst_48 {dimension_numbers = #tpu.dot_dimension_numbers<[1], [0], [0], [1], [0, 0, 1, 1], [], []>} : vector<64x4xbf16>, vector<4x8xbf16>, vector<64x8xf32> -> vector<64x8xf32>
    %85 = arith.addf %53, %84 : vector<64x8xf32>
    %86 = vector.broadcast %2 : vector<1x4xf32> to vector<64x4xf32>
    %87 = arith.mulf %72, %86 : vector<64x4xf32>
    %88 = vector.broadcast %3 : vector<1x4xf32> to vector<64x4xf32>
    %89 = arith.addf %87, %88 : vector<64x4xf32>
    %cst_49 = arith.constant 0.000000e+00 : f32
    %90 = vector.broadcast %cst_49 : f32 to vector<64x4xf32>
    %91 = arith.cmpf oge, %89, %90 : vector<64x4xf32>
    %cst_50 = arith.constant 2.000000e-01 : f32
    %92 = vector.broadcast %cst_50 : f32 to vector<64x4xf32>
    %93 = arith.mulf %92, %89 : vector<64x4xf32>
    %94 = arith.select %91, %89, %93 : vector<64x4xi1>, vector<64x4xf32>
    %95 = vector.broadcast %74 : vector<64x1xf32> to vector<64x4xf32>
    %96 = arith.mulf %94, %95 : vector<64x4xf32>
    %97 = arith.truncf %96 : vector<64x4xf32> to vector<64x4xbf16>
    %c2_51 = arith.constant 2 : index
    %c0_52 = arith.constant 0 : index
    %c0_53 = arith.constant 0 : index
    %98 = vector.load %arg5[%c2_51, %c0_52, %c0_53] : memref<9x4x8xbf16, #tpu.memory_space<vmem>>, vector<1x4x8xbf16>
    %99 = vector.shape_cast %98 : vector<1x4x8xbf16> to vector<4x8xbf16>
    %cst_54 = arith.constant dense<0.000000e+00> : vector<64x8xf32>
    %100 = tpu.matmul %97, %99, %cst_54 {dimension_numbers = #tpu.dot_dimension_numbers<[1], [0], [0], [1], [0, 0, 1, 1], [], []>} : vector<64x4xbf16>, vector<4x8xbf16>, vector<64x8xf32> -> vector<64x8xf32>
    %101 = arith.addf %69, %100 : vector<64x8xf32>
    %c0_55 = arith.constant 0 : index
    %c18 = arith.constant 18 : index
    %c0_56 = arith.constant 0 : index
    %c0_57 = arith.constant 0 : index
    %102 = vector.load %arg1[%c0_55, %c18, %c0_56, %c0_57] : memref<1x36x9x4xf32, #tpu.memory_space<vmem>>, vector<1x8x8x4xf32>
    %103 = vector.shape_cast %102 : vector<1x8x8x4xf32> to vector<8x8x4xf32>
    %104 = vector.shape_cast %103 : vector<8x8x4xf32> to vector<64x4xf32>
    %c18_58 = arith.constant 18 : index
    %c0_59 = arith.constant 0 : index
    %c0_60 = arith.constant 0 : index
    %105 = vector.load %arg2[%c18_58, %c0_59, %c0_60] : memref<36x9x1xf32, #tpu.memory_space<vmem>>, vector<8x8x1xf32>
    %106 = vector.shape_cast %105 : vector<8x8x1xf32> to vector<64x1xf32>
    %107 = vector.broadcast %0 : vector<1x4xf32> to vector<64x4xf32>
    %108 = arith.mulf %104, %107 : vector<64x4xf32>
    %109 = vector.broadcast %1 : vector<1x4xf32> to vector<64x4xf32>
    %110 = arith.addf %108, %109 : vector<64x4xf32>
    %111 = vector.broadcast %106 : vector<64x1xf32> to vector<64x4xf32>
    %112 = arith.mulf %110, %111 : vector<64x4xf32>
    %113 = arith.truncf %112 : vector<64x4xf32> to vector<64x4xbf16>
    %c3_61 = arith.constant 3 : index
    %c0_62 = arith.constant 0 : index
    %c0_63 = arith.constant 0 : index
    %114 = vector.load %arg4[%c3_61, %c0_62, %c0_63] : memref<9x4x8xbf16, #tpu.memory_space<vmem>>, vector<1x4x8xbf16>
    %115 = vector.shape_cast %114 : vector<1x4x8xbf16> to vector<4x8xbf16>
    %cst_64 = arith.constant dense<0.000000e+00> : vector<64x8xf32>
    %116 = tpu.matmul %113, %115, %cst_64 {dimension_numbers = #tpu.dot_dimension_numbers<[1], [0], [0], [1], [0, 0, 1, 1], [], []>} : vector<64x4xbf16>, vector<4x8xbf16>, vector<64x8xf32> -> vector<64x8xf32>
    %117 = arith.addf %85, %116 : vector<64x8xf32>
    %118 = vector.broadcast %2 : vector<1x4xf32> to vector<64x4xf32>
    %119 = arith.mulf %104, %118 : vector<64x4xf32>
    %120 = vector.broadcast %3 : vector<1x4xf32> to vector<64x4xf32>
    %121 = arith.addf %119, %120 : vector<64x4xf32>
    %cst_65 = arith.constant 0.000000e+00 : f32
    %122 = vector.broadcast %cst_65 : f32 to vector<64x4xf32>
    %123 = arith.cmpf oge, %121, %122 : vector<64x4xf32>
    %cst_66 = arith.constant 2.000000e-01 : f32
    %124 = vector.broadcast %cst_66 : f32 to vector<64x4xf32>
    %125 = arith.mulf %124, %121 : vector<64x4xf32>
    %126 = arith.select %123, %121, %125 : vector<64x4xi1>, vector<64x4xf32>
    %127 = vector.broadcast %106 : vector<64x1xf32> to vector<64x4xf32>
    %128 = arith.mulf %126, %127 : vector<64x4xf32>
    %129 = arith.truncf %128 : vector<64x4xf32> to vector<64x4xbf16>
    %c3_67 = arith.constant 3 : index
    %c0_68 = arith.constant 0 : index
    %c0_69 = arith.constant 0 : index
    %130 = vector.load %arg5[%c3_67, %c0_68, %c0_69] : memref<9x4x8xbf16, #tpu.memory_space<vmem>>, vector<1x4x8xbf16>
    %131 = vector.shape_cast %130 : vector<1x4x8xbf16> to vector<4x8xbf16>
    %cst_70 = arith.constant dense<0.000000e+00> : vector<64x8xf32>
    %132 = tpu.matmul %129, %131, %cst_70 {dimension_numbers = #tpu.dot_dimension_numbers<[1], [0], [0], [1], [0, 0, 1, 1], [], []>} : vector<64x4xbf16>, vector<4x8xbf16>, vector<64x8xf32> -> vector<64x8xf32>
    %133 = arith.addf %101, %132 : vector<64x8xf32>
    %c0_71 = arith.constant 0 : index
    %c27 = arith.constant 27 : index
    %c0_72 = arith.constant 0 : index
    %c0_73 = arith.constant 0 : index
    %134 = vector.load %arg1[%c0_71, %c27, %c0_72, %c0_73] : memref<1x36x9x4xf32, #tpu.memory_space<vmem>>, vector<1x8x8x4xf32>
    %135 = vector.shape_cast %134 : vector<1x8x8x4xf32> to vector<8x8x4xf32>
    %136 = vector.shape_cast %135 : vector<8x8x4xf32> to vector<64x4xf32>
    %c27_74 = arith.constant 27 : index
    %c0_75 = arith.constant 0 : index
    %c0_76 = arith.constant 0 : index
    %137 = vector.load %arg2[%c27_74, %c0_75, %c0_76] : memref<36x9x1xf32, #tpu.memory_space<vmem>>, vector<8x8x1xf32>
    %138 = vector.shape_cast %137 : vector<8x8x1xf32> to vector<64x1xf32>
    %139 = vector.broadcast %0 : vector<1x4xf32> to vector<64x4xf32>
    %140 = arith.mulf %136, %139 : vector<64x4xf32>
    %141 = vector.broadcast %1 : vector<1x4xf32> to vector<64x4xf32>
    %142 = arith.addf %140, %141 : vector<64x4xf32>
    %143 = vector.broadcast %138 : vector<64x1xf32> to vector<64x4xf32>
    %144 = arith.mulf %142, %143 : vector<64x4xf32>
    %145 = arith.truncf %144 : vector<64x4xf32> to vector<64x4xbf16>
    %c4 = arith.constant 4 : index
    %c0_77 = arith.constant 0 : index
    %c0_78 = arith.constant 0 : index
    %146 = vector.load %arg4[%c4, %c0_77, %c0_78] : memref<9x4x8xbf16, #tpu.memory_space<vmem>>, vector<1x4x8xbf16>
    %147 = vector.shape_cast %146 : vector<1x4x8xbf16> to vector<4x8xbf16>
    %cst_79 = arith.constant dense<0.000000e+00> : vector<64x8xf32>
    %148 = tpu.matmul %145, %147, %cst_79 {dimension_numbers = #tpu.dot_dimension_numbers<[1], [0], [0], [1], [0, 0, 1, 1], [], []>} : vector<64x4xbf16>, vector<4x8xbf16>, vector<64x8xf32> -> vector<64x8xf32>
    %149 = arith.addf %117, %148 : vector<64x8xf32>
    %150 = vector.broadcast %2 : vector<1x4xf32> to vector<64x4xf32>
    %151 = arith.mulf %136, %150 : vector<64x4xf32>
    %152 = vector.broadcast %3 : vector<1x4xf32> to vector<64x4xf32>
    %153 = arith.addf %151, %152 : vector<64x4xf32>
    %cst_80 = arith.constant 0.000000e+00 : f32
    %154 = vector.broadcast %cst_80 : f32 to vector<64x4xf32>
    %155 = arith.cmpf oge, %153, %154 : vector<64x4xf32>
    %cst_81 = arith.constant 2.000000e-01 : f32
    %156 = vector.broadcast %cst_81 : f32 to vector<64x4xf32>
    %157 = arith.mulf %156, %153 : vector<64x4xf32>
    %158 = arith.select %155, %153, %157 : vector<64x4xi1>, vector<64x4xf32>
    %159 = vector.broadcast %138 : vector<64x1xf32> to vector<64x4xf32>
    %160 = arith.mulf %158, %159 : vector<64x4xf32>
    %161 = arith.truncf %160 : vector<64x4xf32> to vector<64x4xbf16>
    %c4_82 = arith.constant 4 : index
    %c0_83 = arith.constant 0 : index
    %c0_84 = arith.constant 0 : index
    %162 = vector.load %arg5[%c4_82, %c0_83, %c0_84] : memref<9x4x8xbf16, #tpu.memory_space<vmem>>, vector<1x4x8xbf16>
    %163 = vector.shape_cast %162 : vector<1x4x8xbf16> to vector<4x8xbf16>
    %cst_85 = arith.constant dense<0.000000e+00> : vector<64x8xf32>
    %164 = tpu.matmul %161, %163, %cst_85 {dimension_numbers = #tpu.dot_dimension_numbers<[1], [0], [0], [1], [0, 0, 1, 1], [], []>} : vector<64x4xbf16>, vector<4x8xbf16>, vector<64x8xf32> -> vector<64x8xf32>
    %165 = arith.addf %133, %164 : vector<64x8xf32>
    %c0_86 = arith.constant 0 : index
    %c18_87 = arith.constant 18 : index
    %c1_88 = arith.constant 1 : index
    %c0_89 = arith.constant 0 : index
    %166 = vector.load %arg1[%c0_86, %c18_87, %c1_88, %c0_89] : memref<1x36x9x4xf32, #tpu.memory_space<vmem>>, vector<1x8x8x4xf32>
    %167 = vector.shape_cast %166 : vector<1x8x8x4xf32> to vector<8x8x4xf32>
    %168 = vector.shape_cast %167 : vector<8x8x4xf32> to vector<64x4xf32>
    %c18_90 = arith.constant 18 : index
    %c1_91 = arith.constant 1 : index
    %c0_92 = arith.constant 0 : index
    %169 = vector.load %arg2[%c18_90, %c1_91, %c0_92] : memref<36x9x1xf32, #tpu.memory_space<vmem>>, vector<8x8x1xf32>
    %170 = vector.shape_cast %169 : vector<8x8x1xf32> to vector<64x1xf32>
    %171 = vector.broadcast %0 : vector<1x4xf32> to vector<64x4xf32>
    %172 = arith.mulf %168, %171 : vector<64x4xf32>
    %173 = vector.broadcast %1 : vector<1x4xf32> to vector<64x4xf32>
    %174 = arith.addf %172, %173 : vector<64x4xf32>
    %175 = vector.broadcast %170 : vector<64x1xf32> to vector<64x4xf32>
    %176 = arith.mulf %174, %175 : vector<64x4xf32>
    %177 = arith.truncf %176 : vector<64x4xf32> to vector<64x4xbf16>
    %c5 = arith.constant 5 : index
    %c0_93 = arith.constant 0 : index
    %c0_94 = arith.constant 0 : index
    %178 = vector.load %arg4[%c5, %c0_93, %c0_94] : memref<9x4x8xbf16, #tpu.memory_space<vmem>>, vector<1x4x8xbf16>
    %179 = vector.shape_cast %178 : vector<1x4x8xbf16> to vector<4x8xbf16>
    %cst_95 = arith.constant dense<0.000000e+00> : vector<64x8xf32>
    %180 = tpu.matmul %177, %179, %cst_95 {dimension_numbers = #tpu.dot_dimension_numbers<[1], [0], [0], [1], [0, 0, 1, 1], [], []>} : vector<64x4xbf16>, vector<4x8xbf16>, vector<64x8xf32> -> vector<64x8xf32>
    %181 = arith.addf %149, %180 : vector<64x8xf32>
    %182 = vector.broadcast %2 : vector<1x4xf32> to vector<64x4xf32>
    %183 = arith.mulf %168, %182 : vector<64x4xf32>
    %184 = vector.broadcast %3 : vector<1x4xf32> to vector<64x4xf32>
    %185 = arith.addf %183, %184 : vector<64x4xf32>
    %cst_96 = arith.constant 0.000000e+00 : f32
    %186 = vector.broadcast %cst_96 : f32 to vector<64x4xf32>
    %187 = arith.cmpf oge, %185, %186 : vector<64x4xf32>
    %cst_97 = arith.constant 2.000000e-01 : f32
    %188 = vector.broadcast %cst_97 : f32 to vector<64x4xf32>
    %189 = arith.mulf %188, %185 : vector<64x4xf32>
    %190 = arith.select %187, %185, %189 : vector<64x4xi1>, vector<64x4xf32>
    %191 = vector.broadcast %170 : vector<64x1xf32> to vector<64x4xf32>
    %192 = arith.mulf %190, %191 : vector<64x4xf32>
    %193 = arith.truncf %192 : vector<64x4xf32> to vector<64x4xbf16>
    %c5_98 = arith.constant 5 : index
    %c0_99 = arith.constant 0 : index
    %c0_100 = arith.constant 0 : index
    %194 = vector.load %arg5[%c5_98, %c0_99, %c0_100] : memref<9x4x8xbf16, #tpu.memory_space<vmem>>, vector<1x4x8xbf16>
    %195 = vector.shape_cast %194 : vector<1x4x8xbf16> to vector<4x8xbf16>
    %cst_101 = arith.constant dense<0.000000e+00> : vector<64x8xf32>
    %196 = tpu.matmul %193, %195, %cst_101 {dimension_numbers = #tpu.dot_dimension_numbers<[1], [0], [0], [1], [0, 0, 1, 1], [], []>} : vector<64x4xbf16>, vector<4x8xbf16>, vector<64x8xf32> -> vector<64x8xf32>
    %197 = arith.addf %165, %196 : vector<64x8xf32>
    %c0_102 = arith.constant 0 : index
    %c1_103 = arith.constant 1 : index
    %c0_104 = arith.constant 0 : index
    %c0_105 = arith.constant 0 : index
    %198 = vector.load %arg1[%c0_102, %c1_103, %c0_104, %c0_105] : memref<1x36x9x4xf32, #tpu.memory_space<vmem>>, vector<1x8x8x4xf32>
    %199 = vector.shape_cast %198 : vector<1x8x8x4xf32> to vector<8x8x4xf32>
    %200 = vector.shape_cast %199 : vector<8x8x4xf32> to vector<64x4xf32>
    %c1_106 = arith.constant 1 : index
    %c0_107 = arith.constant 0 : index
    %c0_108 = arith.constant 0 : index
    %201 = vector.load %arg2[%c1_106, %c0_107, %c0_108] : memref<36x9x1xf32, #tpu.memory_space<vmem>>, vector<8x8x1xf32>
    %202 = vector.shape_cast %201 : vector<8x8x1xf32> to vector<64x1xf32>
    %203 = vector.broadcast %0 : vector<1x4xf32> to vector<64x4xf32>
    %204 = arith.mulf %200, %203 : vector<64x4xf32>
    %205 = vector.broadcast %1 : vector<1x4xf32> to vector<64x4xf32>
    %206 = arith.addf %204, %205 : vector<64x4xf32>
    %207 = vector.broadcast %202 : vector<64x1xf32> to vector<64x4xf32>
    %208 = arith.mulf %206, %207 : vector<64x4xf32>
    %209 = arith.truncf %208 : vector<64x4xf32> to vector<64x4xbf16>
    %c6 = arith.constant 6 : index
    %c0_109 = arith.constant 0 : index
    %c0_110 = arith.constant 0 : index
    %210 = vector.load %arg4[%c6, %c0_109, %c0_110] : memref<9x4x8xbf16, #tpu.memory_space<vmem>>, vector<1x4x8xbf16>
    %211 = vector.shape_cast %210 : vector<1x4x8xbf16> to vector<4x8xbf16>
    %cst_111 = arith.constant dense<0.000000e+00> : vector<64x8xf32>
    %212 = tpu.matmul %209, %211, %cst_111 {dimension_numbers = #tpu.dot_dimension_numbers<[1], [0], [0], [1], [0, 0, 1, 1], [], []>} : vector<64x4xbf16>, vector<4x8xbf16>, vector<64x8xf32> -> vector<64x8xf32>
    %213 = arith.addf %181, %212 : vector<64x8xf32>
    %214 = vector.broadcast %2 : vector<1x4xf32> to vector<64x4xf32>
    %215 = arith.mulf %200, %214 : vector<64x4xf32>
    %216 = vector.broadcast %3 : vector<1x4xf32> to vector<64x4xf32>
    %217 = arith.addf %215, %216 : vector<64x4xf32>
    %cst_112 = arith.constant 0.000000e+00 : f32
    %218 = vector.broadcast %cst_112 : f32 to vector<64x4xf32>
    %219 = arith.cmpf oge, %217, %218 : vector<64x4xf32>
    %cst_113 = arith.constant 2.000000e-01 : f32
    %220 = vector.broadcast %cst_113 : f32 to vector<64x4xf32>
    %221 = arith.mulf %220, %217 : vector<64x4xf32>
    %222 = arith.select %219, %217, %221 : vector<64x4xi1>, vector<64x4xf32>
    %223 = vector.broadcast %202 : vector<64x1xf32> to vector<64x4xf32>
    %224 = arith.mulf %222, %223 : vector<64x4xf32>
    %225 = arith.truncf %224 : vector<64x4xf32> to vector<64x4xbf16>
    %c6_114 = arith.constant 6 : index
    %c0_115 = arith.constant 0 : index
    %c0_116 = arith.constant 0 : index
    %226 = vector.load %arg5[%c6_114, %c0_115, %c0_116] : memref<9x4x8xbf16, #tpu.memory_space<vmem>>, vector<1x4x8xbf16>
    %227 = vector.shape_cast %226 : vector<1x4x8xbf16> to vector<4x8xbf16>
    %cst_117 = arith.constant dense<0.000000e+00> : vector<64x8xf32>
    %228 = tpu.matmul %225, %227, %cst_117 {dimension_numbers = #tpu.dot_dimension_numbers<[1], [0], [0], [1], [0, 0, 1, 1], [], []>} : vector<64x4xbf16>, vector<4x8xbf16>, vector<64x8xf32> -> vector<64x8xf32>
    %229 = arith.addf %197, %228 : vector<64x8xf32>
    %c0_118 = arith.constant 0 : index
    %c10 = arith.constant 10 : index
    %c0_119 = arith.constant 0 : index
    %c0_120 = arith.constant 0 : index
    %230 = vector.load %arg1[%c0_118, %c10, %c0_119, %c0_120] : memref<1x36x9x4xf32, #tpu.memory_space<vmem>>, vector<1x8x8x4xf32>
    %231 = vector.shape_cast %230 : vector<1x8x8x4xf32> to vector<8x8x4xf32>
    %232 = vector.shape_cast %231 : vector<8x8x4xf32> to vector<64x4xf32>
    %c10_121 = arith.constant 10 : index
    %c0_122 = arith.constant 0 : index
    %c0_123 = arith.constant 0 : index
    %233 = vector.load %arg2[%c10_121, %c0_122, %c0_123] : memref<36x9x1xf32, #tpu.memory_space<vmem>>, vector<8x8x1xf32>
    %234 = vector.shape_cast %233 : vector<8x8x1xf32> to vector<64x1xf32>
    %235 = vector.broadcast %0 : vector<1x4xf32> to vector<64x4xf32>
    %236 = arith.mulf %232, %235 : vector<64x4xf32>
    %237 = vector.broadcast %1 : vector<1x4xf32> to vector<64x4xf32>
    %238 = arith.addf %236, %237 : vector<64x4xf32>
    %239 = vector.broadcast %234 : vector<64x1xf32> to vector<64x4xf32>
    %240 = arith.mulf %238, %239 : vector<64x4xf32>
    %241 = arith.truncf %240 : vector<64x4xf32> to vector<64x4xbf16>
    %c7 = arith.constant 7 : index
    %c0_124 = arith.constant 0 : index
    %c0_125 = arith.constant 0 : index
    %242 = vector.load %arg4[%c7, %c0_124, %c0_125] : memref<9x4x8xbf16, #tpu.memory_space<vmem>>, vector<1x4x8xbf16>
    %243 = vector.shape_cast %242 : vector<1x4x8xbf16> to vector<4x8xbf16>
    %cst_126 = arith.constant dense<0.000000e+00> : vector<64x8xf32>
    %244 = tpu.matmul %241, %243, %cst_126 {dimension_numbers = #tpu.dot_dimension_numbers<[1], [0], [0], [1], [0, 0, 1, 1], [], []>} : vector<64x4xbf16>, vector<4x8xbf16>, vector<64x8xf32> -> vector<64x8xf32>
    %245 = arith.addf %213, %244 : vector<64x8xf32>
    %246 = vector.broadcast %2 : vector<1x4xf32> to vector<64x4xf32>
    %247 = arith.mulf %232, %246 : vector<64x4xf32>
    %248 = vector.broadcast %3 : vector<1x4xf32> to vector<64x4xf32>
    %249 = arith.addf %247, %248 : vector<64x4xf32>
    %cst_127 = arith.constant 0.000000e+00 : f32
    %250 = vector.broadcast %cst_127 : f32 to vector<64x4xf32>
    %251 = arith.cmpf oge, %249, %250 : vector<64x4xf32>
    %cst_128 = arith.constant 2.000000e-01 : f32
    %252 = vector.broadcast %cst_128 : f32 to vector<64x4xf32>
    %253 = arith.mulf %252, %249 : vector<64x4xf32>
    %254 = arith.select %251, %249, %253 : vector<64x4xi1>, vector<64x4xf32>
    %255 = vector.broadcast %234 : vector<64x1xf32> to vector<64x4xf32>
    %256 = arith.mulf %254, %255 : vector<64x4xf32>
    %257 = arith.truncf %256 : vector<64x4xf32> to vector<64x4xbf16>
    %c7_129 = arith.constant 7 : index
    %c0_130 = arith.constant 0 : index
    %c0_131 = arith.constant 0 : index
    %258 = vector.load %arg5[%c7_129, %c0_130, %c0_131] : memref<9x4x8xbf16, #tpu.memory_space<vmem>>, vector<1x4x8xbf16>
    %259 = vector.shape_cast %258 : vector<1x4x8xbf16> to vector<4x8xbf16>
    %cst_132 = arith.constant dense<0.000000e+00> : vector<64x8xf32>
    %260 = tpu.matmul %257, %259, %cst_132 {dimension_numbers = #tpu.dot_dimension_numbers<[1], [0], [0], [1], [0, 0, 1, 1], [], []>} : vector<64x4xbf16>, vector<4x8xbf16>, vector<64x8xf32> -> vector<64x8xf32>
    %261 = arith.addf %229, %260 : vector<64x8xf32>
    %c0_133 = arith.constant 0 : index
    %c1_134 = arith.constant 1 : index
    %c1_135 = arith.constant 1 : index
    %c0_136 = arith.constant 0 : index
    %262 = vector.load %arg1[%c0_133, %c1_134, %c1_135, %c0_136] : memref<1x36x9x4xf32, #tpu.memory_space<vmem>>, vector<1x8x8x4xf32>
    %263 = vector.shape_cast %262 : vector<1x8x8x4xf32> to vector<8x8x4xf32>
    %264 = vector.shape_cast %263 : vector<8x8x4xf32> to vector<64x4xf32>
    %c1_137 = arith.constant 1 : index
    %c1_138 = arith.constant 1 : index
    %c0_139 = arith.constant 0 : index
    %265 = vector.load %arg2[%c1_137, %c1_138, %c0_139] : memref<36x9x1xf32, #tpu.memory_space<vmem>>, vector<8x8x1xf32>
    %266 = vector.shape_cast %265 : vector<8x8x1xf32> to vector<64x1xf32>
    %267 = vector.broadcast %0 : vector<1x4xf32> to vector<64x4xf32>
    %268 = arith.mulf %264, %267 : vector<64x4xf32>
    %269 = vector.broadcast %1 : vector<1x4xf32> to vector<64x4xf32>
    %270 = arith.addf %268, %269 : vector<64x4xf32>
    %271 = vector.broadcast %266 : vector<64x1xf32> to vector<64x4xf32>
    %272 = arith.mulf %270, %271 : vector<64x4xf32>
    %273 = arith.truncf %272 : vector<64x4xf32> to vector<64x4xbf16>
    %c8 = arith.constant 8 : index
    %c0_140 = arith.constant 0 : index
    %c0_141 = arith.constant 0 : index
    %274 = vector.load %arg4[%c8, %c0_140, %c0_141] : memref<9x4x8xbf16, #tpu.memory_space<vmem>>, vector<1x4x8xbf16>
    %275 = vector.shape_cast %274 : vector<1x4x8xbf16> to vector<4x8xbf16>
    %cst_142 = arith.constant dense<0.000000e+00> : vector<64x8xf32>
    %276 = tpu.matmul %273, %275, %cst_142 {dimension_numbers = #tpu.dot_dimension_numbers<[1], [0], [0], [1], [0, 0, 1, 1], [], []>} : vector<64x4xbf16>, vector<4x8xbf16>, vector<64x8xf32> -> vector<64x8xf32>
    %277 = arith.addf %245, %276 : vector<64x8xf32>
    %278 = vector.broadcast %2 : vector<1x4xf32> to vector<64x4xf32>
    %279 = arith.mulf %264, %278 : vector<64x4xf32>
    %280 = vector.broadcast %3 : vector<1x4xf32> to vector<64x4xf32>
    %281 = arith.addf %279, %280 : vector<64x4xf32>
    %cst_143 = arith.constant 0.000000e+00 : f32
    %282 = vector.broadcast %cst_143 : f32 to vector<64x4xf32>
    %283 = arith.cmpf oge, %281, %282 : vector<64x4xf32>
    %cst_144 = arith.constant 2.000000e-01 : f32
    %284 = vector.broadcast %cst_144 : f32 to vector<64x4xf32>
    %285 = arith.mulf %284, %281 : vector<64x4xf32>
    %286 = arith.select %283, %281, %285 : vector<64x4xi1>, vector<64x4xf32>
    %287 = vector.broadcast %266 : vector<64x1xf32> to vector<64x4xf32>
    %288 = arith.mulf %286, %287 : vector<64x4xf32>
    %289 = arith.truncf %288 : vector<64x4xf32> to vector<64x4xbf16>
    %c8_145 = arith.constant 8 : index
    %c0_146 = arith.constant 0 : index
    %c0_147 = arith.constant 0 : index
    %290 = vector.load %arg5[%c8_145, %c0_146, %c0_147] : memref<9x4x8xbf16, #tpu.memory_space<vmem>>, vector<1x4x8xbf16>
    %291 = vector.shape_cast %290 : vector<1x4x8xbf16> to vector<4x8xbf16>
    %cst_148 = arith.constant dense<0.000000e+00> : vector<64x8xf32>
    %292 = tpu.matmul %289, %291, %cst_148 {dimension_numbers = #tpu.dot_dimension_numbers<[1], [0], [0], [1], [0, 0, 1, 1], [], []>} : vector<64x4xbf16>, vector<4x8xbf16>, vector<64x8xf32> -> vector<64x8xf32>
    %293 = arith.addf %261, %292 : vector<64x8xf32>
    %294 = vector.shape_cast %277 : vector<64x8xf32> to vector<8x8x8xf32>
    %c0_149 = arith.constant 0 : index
    %c0_150 = arith.constant 0 : index
    %c0_151 = arith.constant 0 : index
    %c0_152 = arith.constant 0 : index
    %295 = vector.load %arg6[%c0_149, %c0_150, %c0_151, %c0_152] : memref<1x8x8x8xf32, #tpu.memory_space<vmem>>, vector<1x8x8x8xf32>
    %296 = vector.shape_cast %295 : vector<1x8x8x8xf32> to vector<8x8x8xf32>
    %297 = vector.shape_cast %294 : vector<8x8x8xf32> to vector<1x8x8x8xf32>
    tpu.vector_store %arg6[%c0_149, %c0_150, %c0_151, %c0_152], %297 {strides = array<i32>} : memref<1x8x8x8xf32, #tpu.memory_space<vmem>>, vector<1x8x8x8xf32>,
    %298 = vector.shape_cast %293 : vector<64x8xf32> to vector<8x8x8xf32>
    %c0_153 = arith.constant 0 : index
    %c0_154 = arith.constant 0 : index
    %c0_155 = arith.constant 0 : index
    %c0_156 = arith.constant 0 : index
    %299 = vector.load %arg7[%c0_153, %c0_154, %c0_155, %c0_156] : memref<1x8x8x8xf32, #tpu.memory_space<vmem>>, vector<1x8x8x8xf32>
    %300 = vector.shape_cast %299 : vector<1x8x8x8xf32> to vector<8x8x8xf32>
    %301 = vector.shape_cast %298 : vector<8x8x8xf32> to vector<1x8x8x8xf32>
    tpu.vector_store %arg7[%c0_153, %c0_154, %c0_155, %c0_156], %301 {strides = array<i32>} : memref<1x8x8x8xf32, #tpu.memory_space<vmem>>, vector<1x8x8x8xf32>,
    %cst_157 = arith.constant dense<0.000000e+00> : vector<8xf32>
    %302 = vector.multi_reduction <add>, %293, %cst_157 [0] : vector<64x8xf32> to vector<8xf32>
    %303 = vector.shape_cast %302 : vector<8xf32> to vector<1x8xf32>
    %c0_158 = arith.constant 0 : index
    %c0_159 = arith.constant 0 : index
    %c0_160 = arith.constant 0 : index
    %304 = vector.load %arg8[%c0_158, %c0_159, %c0_160] : memref<1x2x8xf32, #tpu.memory_space<vmem>>, vector<1x1x8xf32>
    %305 = vector.shape_cast %304 : vector<1x1x8xf32> to vector<1x8xf32>
    %306 = vector.shape_cast %303 : vector<1x8xf32> to vector<1x1x8xf32>
    tpu.vector_store %arg8[%c0_158, %c0_159, %c0_160], %306 {strides = array<i32>} : memref<1x2x8xf32, #tpu.memory_space<vmem>>, vector<1x1x8xf32>,
    %307 = arith.mulf %293, %293 : vector<64x8xf32>
    %cst_161 = arith.constant dense<0.000000e+00> : vector<8xf32>
    %308 = vector.multi_reduction <add>, %307, %cst_161 [0] : vector<64x8xf32> to vector<8xf32>
    %309 = vector.shape_cast %308 : vector<8xf32> to vector<1x8xf32>
    %c0_162 = arith.constant 0 : index
    %c1_163 = arith.constant 1 : index
    %c0_164 = arith.constant 0 : index
    %310 = vector.load %arg8[%c0_162, %c1_163, %c0_164] : memref<1x2x8xf32, #tpu.memory_space<vmem>>, vector<1x1x8xf32>
    %311 = vector.shape_cast %310 : vector<1x1x8xf32> to vector<1x8xf32>
    %312 = vector.shape_cast %309 : vector<1x8xf32> to vector<1x1x8xf32>
    tpu.vector_store %arg8[%c0_162, %c1_163, %c0_164], %312 {strides = array<i32>} : memref<1x2x8xf32, #tpu.memory_space<vmem>>, vector<1x1x8xf32>,
    return
  }
  func.func @transform_0(%arg0: i32) -> (i32, i32, i32, i32) {
    %c0_i32 = arith.constant 0 : i32
    %c0_i32_0 = arith.constant 0 : i32
    %c0_i32_1 = arith.constant 0 : i32
    %c0_i32_2 = arith.constant 0 : i32
    return %arg0, %c0_i32, %c0_i32_0, %c0_i32_1 : i32, i32, i32, i32
  }
  func.func @transform_1(%arg0: i32) -> (i32, i32, i32) {
    %c0_i32 = arith.constant 0 : i32
    %c0_i32_0 = arith.constant 0 : i32
    %c0_i32_1 = arith.constant 0 : i32
    %c0_i32_2 = arith.constant 0 : i32
    return %c0_i32, %c0_i32_0, %c0_i32_1 : i32, i32, i32
  }
  func.func @transform_2(%arg0: i32) -> (i32, i32) {
    %c0_i32 = arith.constant 0 : i32
    %c0_i32_0 = arith.constant 0 : i32
    %c0_i32_1 = arith.constant 0 : i32
    return %c0_i32, %c0_i32_0 : i32, i32
  }
  func.func @transform_3(%arg0: i32) -> (i32, i32, i32) {
    %c0_i32 = arith.constant 0 : i32
    %c0_i32_0 = arith.constant 0 : i32
    %c0_i32_1 = arith.constant 0 : i32
    %c0_i32_2 = arith.constant 0 : i32
    return %c0_i32, %c0_i32_0, %c0_i32_1 : i32, i32, i32
  }
  func.func @transform_4(%arg0: i32) -> (i32, i32, i32) {
    %c0_i32 = arith.constant 0 : i32
    %c0_i32_0 = arith.constant 0 : i32
    %c0_i32_1 = arith.constant 0 : i32
    %c0_i32_2 = arith.constant 0 : i32
    return %c0_i32, %c0_i32_0, %c0_i32_1 : i32, i32, i32
  }
  func.func @transform_5(%arg0: i32) -> (i32, i32, i32, i32) {
    %c0_i32 = arith.constant 0 : i32
    %c0_i32_0 = arith.constant 0 : i32
    %c0_i32_1 = arith.constant 0 : i32
    %c0_i32_2 = arith.constant 0 : i32
    return %arg0, %c0_i32, %c0_i32_0, %c0_i32_1 : i32, i32, i32, i32
  }
  func.func @transform_6(%arg0: i32) -> (i32, i32, i32, i32) {
    %c0_i32 = arith.constant 0 : i32
    %c0_i32_0 = arith.constant 0 : i32
    %c0_i32_1 = arith.constant 0 : i32
    %c0_i32_2 = arith.constant 0 : i32
    return %arg0, %c0_i32, %c0_i32_0, %c0_i32_1 : i32, i32, i32, i32
  }
  func.func @transform_7(%arg0: i32) -> (i32, i32, i32) {
    %c0_i32 = arith.constant 0 : i32
    %c0_i32_0 = arith.constant 0 : i32
    %c0_i32_1 = arith.constant 0 : i32
    return %arg0, %c0_i32, %c0_i32_0 : i32, i32, i32
  }
}

module attributes {stable_mosaic.version = 11 : i64} {
  func.func @_conv2_res_kernel(%arg0: i32, %arg1: memref<1x10x10x8xf32, #tpu.memory_space<vmem>>, %arg2: memref<10x10x1xf32, #tpu.memory_space<vmem>>, %arg3: memref<2x8xf32, #tpu.memory_space<vmem>>, %arg4: memref<9x8x8xbf16, #tpu.memory_space<vmem>>, %arg5: memref<1x8x8x8xf32, #tpu.memory_space<vmem>>, %arg6: memref<1x8x8x8xf32, #tpu.memory_space<vmem>>) attributes {dimension_semantics = [#tpu.dimension_semantics<parallel>], iteration_bounds = array<i64: 2>, scalar_prefetch = 0 : i64, scratch_operands = 0 : i64, tpu.core_type = #tpu.core_type<tc>, window_params = [{transform_indices = @transform_0, window_bounds = array<i64: 1, 10, 10, 8>}, {pipeline_mode = #tpu.pipeline_mode<synchronous>, transform_indices = @transform_1, window_bounds = array<i64: 10, 10, 1>}, {pipeline_mode = #tpu.pipeline_mode<synchronous>, transform_indices = @transform_2, window_bounds = array<i64: 2, 8>}, {pipeline_mode = #tpu.pipeline_mode<synchronous>, transform_indices = @transform_3, window_bounds = array<i64: 9, 8, 8>}, {transform_indices = @transform_4, window_bounds = array<i64: 1, 8, 8, 8>}, {transform_indices = @transform_5, window_bounds = array<i64: 1, 8, 8, 8>}]} {
    %c0 = arith.constant 0 : index
    %c0_0 = arith.constant 0 : index
    %0 = vector.load %arg3[%c0, %c0_0] : memref<2x8xf32, #tpu.memory_space<vmem>>, vector<1x8xf32>
    %c1 = arith.constant 1 : index
    %c0_1 = arith.constant 0 : index
    %1 = vector.load %arg3[%c1, %c0_1] : memref<2x8xf32, #tpu.memory_space<vmem>>, vector<1x8xf32>
    %c0_2 = arith.constant 0 : index
    %c0_3 = arith.constant 0 : index
    %c0_4 = arith.constant 0 : index
    %c0_5 = arith.constant 0 : index
    %2 = vector.load %arg5[%c0_2, %c0_3, %c0_4, %c0_5] : memref<1x8x8x8xf32, #tpu.memory_space<vmem>>, vector<1x8x8x8xf32>
    %3 = vector.shape_cast %2 : vector<1x8x8x8xf32> to vector<8x8x8xf32>
    %4 = vector.shape_cast %3 : vector<8x8x8xf32> to vector<64x8xf32>
    %c0_6 = arith.constant 0 : index
    %c0_7 = arith.constant 0 : index
    %c0_8 = arith.constant 0 : index
    %c0_9 = arith.constant 0 : index
    %5 = vector.load %arg1[%c0_6, %c0_7, %c0_8, %c0_9] : memref<1x10x10x8xf32, #tpu.memory_space<vmem>>, vector<1x8x8x8xf32>
    %6 = vector.shape_cast %5 : vector<1x8x8x8xf32> to vector<8x8x8xf32>
    %7 = vector.shape_cast %6 : vector<8x8x8xf32> to vector<64x8xf32>
    %c0_10 = arith.constant 0 : index
    %c0_11 = arith.constant 0 : index
    %c0_12 = arith.constant 0 : index
    %8 = vector.load %arg2[%c0_10, %c0_11, %c0_12] : memref<10x10x1xf32, #tpu.memory_space<vmem>>, vector<8x8x1xf32>
    %9 = vector.shape_cast %8 : vector<8x8x1xf32> to vector<64x1xf32>
    %10 = vector.broadcast %0 : vector<1x8xf32> to vector<64x8xf32>
    %11 = arith.mulf %7, %10 : vector<64x8xf32>
    %12 = vector.broadcast %1 : vector<1x8xf32> to vector<64x8xf32>
    %13 = arith.addf %11, %12 : vector<64x8xf32>
    %cst = arith.constant 0.000000e+00 : f32
    %14 = vector.broadcast %cst : f32 to vector<64x8xf32>
    %15 = arith.cmpf oge, %13, %14 : vector<64x8xf32>
    %cst_13 = arith.constant 2.000000e-01 : f32
    %16 = vector.broadcast %cst_13 : f32 to vector<64x8xf32>
    %17 = arith.mulf %16, %13 : vector<64x8xf32>
    %18 = arith.select %15, %13, %17 : vector<64x8xi1>, vector<64x8xf32>
    %19 = vector.broadcast %9 : vector<64x1xf32> to vector<64x8xf32>
    %20 = arith.mulf %18, %19 : vector<64x8xf32>
    %21 = arith.truncf %20 : vector<64x8xf32> to vector<64x8xbf16>
    %c0_14 = arith.constant 0 : index
    %c0_15 = arith.constant 0 : index
    %c0_16 = arith.constant 0 : index
    %22 = vector.load %arg4[%c0_14, %c0_15, %c0_16] : memref<9x8x8xbf16, #tpu.memory_space<vmem>>, vector<1x8x8xbf16>
    %23 = vector.shape_cast %22 : vector<1x8x8xbf16> to vector<8x8xbf16>
    %cst_17 = arith.constant dense<0.000000e+00> : vector<64x8xf32>
    %24 = tpu.matmul %21, %23, %cst_17 {dimension_numbers = #tpu.dot_dimension_numbers<[1], [0], [0], [1], [0, 0, 1, 1], [], []>} : vector<64x8xbf16>, vector<8x8xbf16>, vector<64x8xf32> -> vector<64x8xf32>
    %25 = arith.addf %4, %24 : vector<64x8xf32>
    %c0_18 = arith.constant 0 : index
    %c0_19 = arith.constant 0 : index
    %c1_20 = arith.constant 1 : index
    %c0_21 = arith.constant 0 : index
    %26 = vector.load %arg1[%c0_18, %c0_19, %c1_20, %c0_21] : memref<1x10x10x8xf32, #tpu.memory_space<vmem>>, vector<1x8x8x8xf32>
    %27 = vector.shape_cast %26 : vector<1x8x8x8xf32> to vector<8x8x8xf32>
    %28 = vector.shape_cast %27 : vector<8x8x8xf32> to vector<64x8xf32>
    %c0_22 = arith.constant 0 : index
    %c1_23 = arith.constant 1 : index
    %c0_24 = arith.constant 0 : index
    %29 = vector.load %arg2[%c0_22, %c1_23, %c0_24] : memref<10x10x1xf32, #tpu.memory_space<vmem>>, vector<8x8x1xf32>
    %30 = vector.shape_cast %29 : vector<8x8x1xf32> to vector<64x1xf32>
    %31 = vector.broadcast %0 : vector<1x8xf32> to vector<64x8xf32>
    %32 = arith.mulf %28, %31 : vector<64x8xf32>
    %33 = vector.broadcast %1 : vector<1x8xf32> to vector<64x8xf32>
    %34 = arith.addf %32, %33 : vector<64x8xf32>
    %cst_25 = arith.constant 0.000000e+00 : f32
    %35 = vector.broadcast %cst_25 : f32 to vector<64x8xf32>
    %36 = arith.cmpf oge, %34, %35 : vector<64x8xf32>
    %cst_26 = arith.constant 2.000000e-01 : f32
    %37 = vector.broadcast %cst_26 : f32 to vector<64x8xf32>
    %38 = arith.mulf %37, %34 : vector<64x8xf32>
    %39 = arith.select %36, %34, %38 : vector<64x8xi1>, vector<64x8xf32>
    %40 = vector.broadcast %30 : vector<64x1xf32> to vector<64x8xf32>
    %41 = arith.mulf %39, %40 : vector<64x8xf32>
    %42 = arith.truncf %41 : vector<64x8xf32> to vector<64x8xbf16>
    %c1_27 = arith.constant 1 : index
    %c0_28 = arith.constant 0 : index
    %c0_29 = arith.constant 0 : index
    %43 = vector.load %arg4[%c1_27, %c0_28, %c0_29] : memref<9x8x8xbf16, #tpu.memory_space<vmem>>, vector<1x8x8xbf16>
    %44 = vector.shape_cast %43 : vector<1x8x8xbf16> to vector<8x8xbf16>
    %cst_30 = arith.constant dense<0.000000e+00> : vector<64x8xf32>
    %45 = tpu.matmul %42, %44, %cst_30 {dimension_numbers = #tpu.dot_dimension_numbers<[1], [0], [0], [1], [0, 0, 1, 1], [], []>} : vector<64x8xbf16>, vector<8x8xbf16>, vector<64x8xf32> -> vector<64x8xf32>
    %46 = arith.addf %25, %45 : vector<64x8xf32>
    %c0_31 = arith.constant 0 : index
    %c0_32 = arith.constant 0 : index
    %c2 = arith.constant 2 : index
    %c0_33 = arith.constant 0 : index
    %47 = vector.load %arg1[%c0_31, %c0_32, %c2, %c0_33] : memref<1x10x10x8xf32, #tpu.memory_space<vmem>>, vector<1x8x8x8xf32>
    %48 = vector.shape_cast %47 : vector<1x8x8x8xf32> to vector<8x8x8xf32>
    %49 = vector.shape_cast %48 : vector<8x8x8xf32> to vector<64x8xf32>
    %c0_34 = arith.constant 0 : index
    %c2_35 = arith.constant 2 : index
    %c0_36 = arith.constant 0 : index
    %50 = vector.load %arg2[%c0_34, %c2_35, %c0_36] : memref<10x10x1xf32, #tpu.memory_space<vmem>>, vector<8x8x1xf32>
    %51 = vector.shape_cast %50 : vector<8x8x1xf32> to vector<64x1xf32>
    %52 = vector.broadcast %0 : vector<1x8xf32> to vector<64x8xf32>
    %53 = arith.mulf %49, %52 : vector<64x8xf32>
    %54 = vector.broadcast %1 : vector<1x8xf32> to vector<64x8xf32>
    %55 = arith.addf %53, %54 : vector<64x8xf32>
    %cst_37 = arith.constant 0.000000e+00 : f32
    %56 = vector.broadcast %cst_37 : f32 to vector<64x8xf32>
    %57 = arith.cmpf oge, %55, %56 : vector<64x8xf32>
    %cst_38 = arith.constant 2.000000e-01 : f32
    %58 = vector.broadcast %cst_38 : f32 to vector<64x8xf32>
    %59 = arith.mulf %58, %55 : vector<64x8xf32>
    %60 = arith.select %57, %55, %59 : vector<64x8xi1>, vector<64x8xf32>
    %61 = vector.broadcast %51 : vector<64x1xf32> to vector<64x8xf32>
    %62 = arith.mulf %60, %61 : vector<64x8xf32>
    %63 = arith.truncf %62 : vector<64x8xf32> to vector<64x8xbf16>
    %c2_39 = arith.constant 2 : index
    %c0_40 = arith.constant 0 : index
    %c0_41 = arith.constant 0 : index
    %64 = vector.load %arg4[%c2_39, %c0_40, %c0_41] : memref<9x8x8xbf16, #tpu.memory_space<vmem>>, vector<1x8x8xbf16>
    %65 = vector.shape_cast %64 : vector<1x8x8xbf16> to vector<8x8xbf16>
    %cst_42 = arith.constant dense<0.000000e+00> : vector<64x8xf32>
    %66 = tpu.matmul %63, %65, %cst_42 {dimension_numbers = #tpu.dot_dimension_numbers<[1], [0], [0], [1], [0, 0, 1, 1], [], []>} : vector<64x8xbf16>, vector<8x8xbf16>, vector<64x8xf32> -> vector<64x8xf32>
    %67 = arith.addf %46, %66 : vector<64x8xf32>
    %c0_43 = arith.constant 0 : index
    %c1_44 = arith.constant 1 : index
    %c0_45 = arith.constant 0 : index
    %c0_46 = arith.constant 0 : index
    %68 = vector.load %arg1[%c0_43, %c1_44, %c0_45, %c0_46] : memref<1x10x10x8xf32, #tpu.memory_space<vmem>>, vector<1x8x8x8xf32>
    %69 = vector.shape_cast %68 : vector<1x8x8x8xf32> to vector<8x8x8xf32>
    %70 = vector.shape_cast %69 : vector<8x8x8xf32> to vector<64x8xf32>
    %c1_47 = arith.constant 1 : index
    %c0_48 = arith.constant 0 : index
    %c0_49 = arith.constant 0 : index
    %71 = vector.load %arg2[%c1_47, %c0_48, %c0_49] : memref<10x10x1xf32, #tpu.memory_space<vmem>>, vector<8x8x1xf32>
    %72 = vector.shape_cast %71 : vector<8x8x1xf32> to vector<64x1xf32>
    %73 = vector.broadcast %0 : vector<1x8xf32> to vector<64x8xf32>
    %74 = arith.mulf %70, %73 : vector<64x8xf32>
    %75 = vector.broadcast %1 : vector<1x8xf32> to vector<64x8xf32>
    %76 = arith.addf %74, %75 : vector<64x8xf32>
    %cst_50 = arith.constant 0.000000e+00 : f32
    %77 = vector.broadcast %cst_50 : f32 to vector<64x8xf32>
    %78 = arith.cmpf oge, %76, %77 : vector<64x8xf32>
    %cst_51 = arith.constant 2.000000e-01 : f32
    %79 = vector.broadcast %cst_51 : f32 to vector<64x8xf32>
    %80 = arith.mulf %79, %76 : vector<64x8xf32>
    %81 = arith.select %78, %76, %80 : vector<64x8xi1>, vector<64x8xf32>
    %82 = vector.broadcast %72 : vector<64x1xf32> to vector<64x8xf32>
    %83 = arith.mulf %81, %82 : vector<64x8xf32>
    %84 = arith.truncf %83 : vector<64x8xf32> to vector<64x8xbf16>
    %c3 = arith.constant 3 : index
    %c0_52 = arith.constant 0 : index
    %c0_53 = arith.constant 0 : index
    %85 = vector.load %arg4[%c3, %c0_52, %c0_53] : memref<9x8x8xbf16, #tpu.memory_space<vmem>>, vector<1x8x8xbf16>
    %86 = vector.shape_cast %85 : vector<1x8x8xbf16> to vector<8x8xbf16>
    %cst_54 = arith.constant dense<0.000000e+00> : vector<64x8xf32>
    %87 = tpu.matmul %84, %86, %cst_54 {dimension_numbers = #tpu.dot_dimension_numbers<[1], [0], [0], [1], [0, 0, 1, 1], [], []>} : vector<64x8xbf16>, vector<8x8xbf16>, vector<64x8xf32> -> vector<64x8xf32>
    %88 = arith.addf %67, %87 : vector<64x8xf32>
    %c0_55 = arith.constant 0 : index
    %c1_56 = arith.constant 1 : index
    %c1_57 = arith.constant 1 : index
    %c0_58 = arith.constant 0 : index
    %89 = vector.load %arg1[%c0_55, %c1_56, %c1_57, %c0_58] : memref<1x10x10x8xf32, #tpu.memory_space<vmem>>, vector<1x8x8x8xf32>
    %90 = vector.shape_cast %89 : vector<1x8x8x8xf32> to vector<8x8x8xf32>
    %91 = vector.shape_cast %90 : vector<8x8x8xf32> to vector<64x8xf32>
    %c1_59 = arith.constant 1 : index
    %c1_60 = arith.constant 1 : index
    %c0_61 = arith.constant 0 : index
    %92 = vector.load %arg2[%c1_59, %c1_60, %c0_61] : memref<10x10x1xf32, #tpu.memory_space<vmem>>, vector<8x8x1xf32>
    %93 = vector.shape_cast %92 : vector<8x8x1xf32> to vector<64x1xf32>
    %94 = vector.broadcast %0 : vector<1x8xf32> to vector<64x8xf32>
    %95 = arith.mulf %91, %94 : vector<64x8xf32>
    %96 = vector.broadcast %1 : vector<1x8xf32> to vector<64x8xf32>
    %97 = arith.addf %95, %96 : vector<64x8xf32>
    %cst_62 = arith.constant 0.000000e+00 : f32
    %98 = vector.broadcast %cst_62 : f32 to vector<64x8xf32>
    %99 = arith.cmpf oge, %97, %98 : vector<64x8xf32>
    %cst_63 = arith.constant 2.000000e-01 : f32
    %100 = vector.broadcast %cst_63 : f32 to vector<64x8xf32>
    %101 = arith.mulf %100, %97 : vector<64x8xf32>
    %102 = arith.select %99, %97, %101 : vector<64x8xi1>, vector<64x8xf32>
    %103 = vector.broadcast %93 : vector<64x1xf32> to vector<64x8xf32>
    %104 = arith.mulf %102, %103 : vector<64x8xf32>
    %105 = arith.truncf %104 : vector<64x8xf32> to vector<64x8xbf16>
    %c4 = arith.constant 4 : index
    %c0_64 = arith.constant 0 : index
    %c0_65 = arith.constant 0 : index
    %106 = vector.load %arg4[%c4, %c0_64, %c0_65] : memref<9x8x8xbf16, #tpu.memory_space<vmem>>, vector<1x8x8xbf16>
    %107 = vector.shape_cast %106 : vector<1x8x8xbf16> to vector<8x8xbf16>
    %cst_66 = arith.constant dense<0.000000e+00> : vector<64x8xf32>
    %108 = tpu.matmul %105, %107, %cst_66 {dimension_numbers = #tpu.dot_dimension_numbers<[1], [0], [0], [1], [0, 0, 1, 1], [], []>} : vector<64x8xbf16>, vector<8x8xbf16>, vector<64x8xf32> -> vector<64x8xf32>
    %109 = arith.addf %88, %108 : vector<64x8xf32>
    %c0_67 = arith.constant 0 : index
    %c1_68 = arith.constant 1 : index
    %c2_69 = arith.constant 2 : index
    %c0_70 = arith.constant 0 : index
    %110 = vector.load %arg1[%c0_67, %c1_68, %c2_69, %c0_70] : memref<1x10x10x8xf32, #tpu.memory_space<vmem>>, vector<1x8x8x8xf32>
    %111 = vector.shape_cast %110 : vector<1x8x8x8xf32> to vector<8x8x8xf32>
    %112 = vector.shape_cast %111 : vector<8x8x8xf32> to vector<64x8xf32>
    %c1_71 = arith.constant 1 : index
    %c2_72 = arith.constant 2 : index
    %c0_73 = arith.constant 0 : index
    %113 = vector.load %arg2[%c1_71, %c2_72, %c0_73] : memref<10x10x1xf32, #tpu.memory_space<vmem>>, vector<8x8x1xf32>
    %114 = vector.shape_cast %113 : vector<8x8x1xf32> to vector<64x1xf32>
    %115 = vector.broadcast %0 : vector<1x8xf32> to vector<64x8xf32>
    %116 = arith.mulf %112, %115 : vector<64x8xf32>
    %117 = vector.broadcast %1 : vector<1x8xf32> to vector<64x8xf32>
    %118 = arith.addf %116, %117 : vector<64x8xf32>
    %cst_74 = arith.constant 0.000000e+00 : f32
    %119 = vector.broadcast %cst_74 : f32 to vector<64x8xf32>
    %120 = arith.cmpf oge, %118, %119 : vector<64x8xf32>
    %cst_75 = arith.constant 2.000000e-01 : f32
    %121 = vector.broadcast %cst_75 : f32 to vector<64x8xf32>
    %122 = arith.mulf %121, %118 : vector<64x8xf32>
    %123 = arith.select %120, %118, %122 : vector<64x8xi1>, vector<64x8xf32>
    %124 = vector.broadcast %114 : vector<64x1xf32> to vector<64x8xf32>
    %125 = arith.mulf %123, %124 : vector<64x8xf32>
    %126 = arith.truncf %125 : vector<64x8xf32> to vector<64x8xbf16>
    %c5 = arith.constant 5 : index
    %c0_76 = arith.constant 0 : index
    %c0_77 = arith.constant 0 : index
    %127 = vector.load %arg4[%c5, %c0_76, %c0_77] : memref<9x8x8xbf16, #tpu.memory_space<vmem>>, vector<1x8x8xbf16>
    %128 = vector.shape_cast %127 : vector<1x8x8xbf16> to vector<8x8xbf16>
    %cst_78 = arith.constant dense<0.000000e+00> : vector<64x8xf32>
    %129 = tpu.matmul %126, %128, %cst_78 {dimension_numbers = #tpu.dot_dimension_numbers<[1], [0], [0], [1], [0, 0, 1, 1], [], []>} : vector<64x8xbf16>, vector<8x8xbf16>, vector<64x8xf32> -> vector<64x8xf32>
    %130 = arith.addf %109, %129 : vector<64x8xf32>
    %c0_79 = arith.constant 0 : index
    %c2_80 = arith.constant 2 : index
    %c0_81 = arith.constant 0 : index
    %c0_82 = arith.constant 0 : index
    %131 = vector.load %arg1[%c0_79, %c2_80, %c0_81, %c0_82] : memref<1x10x10x8xf32, #tpu.memory_space<vmem>>, vector<1x8x8x8xf32>
    %132 = vector.shape_cast %131 : vector<1x8x8x8xf32> to vector<8x8x8xf32>
    %133 = vector.shape_cast %132 : vector<8x8x8xf32> to vector<64x8xf32>
    %c2_83 = arith.constant 2 : index
    %c0_84 = arith.constant 0 : index
    %c0_85 = arith.constant 0 : index
    %134 = vector.load %arg2[%c2_83, %c0_84, %c0_85] : memref<10x10x1xf32, #tpu.memory_space<vmem>>, vector<8x8x1xf32>
    %135 = vector.shape_cast %134 : vector<8x8x1xf32> to vector<64x1xf32>
    %136 = vector.broadcast %0 : vector<1x8xf32> to vector<64x8xf32>
    %137 = arith.mulf %133, %136 : vector<64x8xf32>
    %138 = vector.broadcast %1 : vector<1x8xf32> to vector<64x8xf32>
    %139 = arith.addf %137, %138 : vector<64x8xf32>
    %cst_86 = arith.constant 0.000000e+00 : f32
    %140 = vector.broadcast %cst_86 : f32 to vector<64x8xf32>
    %141 = arith.cmpf oge, %139, %140 : vector<64x8xf32>
    %cst_87 = arith.constant 2.000000e-01 : f32
    %142 = vector.broadcast %cst_87 : f32 to vector<64x8xf32>
    %143 = arith.mulf %142, %139 : vector<64x8xf32>
    %144 = arith.select %141, %139, %143 : vector<64x8xi1>, vector<64x8xf32>
    %145 = vector.broadcast %135 : vector<64x1xf32> to vector<64x8xf32>
    %146 = arith.mulf %144, %145 : vector<64x8xf32>
    %147 = arith.truncf %146 : vector<64x8xf32> to vector<64x8xbf16>
    %c6 = arith.constant 6 : index
    %c0_88 = arith.constant 0 : index
    %c0_89 = arith.constant 0 : index
    %148 = vector.load %arg4[%c6, %c0_88, %c0_89] : memref<9x8x8xbf16, #tpu.memory_space<vmem>>, vector<1x8x8xbf16>
    %149 = vector.shape_cast %148 : vector<1x8x8xbf16> to vector<8x8xbf16>
    %cst_90 = arith.constant dense<0.000000e+00> : vector<64x8xf32>
    %150 = tpu.matmul %147, %149, %cst_90 {dimension_numbers = #tpu.dot_dimension_numbers<[1], [0], [0], [1], [0, 0, 1, 1], [], []>} : vector<64x8xbf16>, vector<8x8xbf16>, vector<64x8xf32> -> vector<64x8xf32>
    %151 = arith.addf %130, %150 : vector<64x8xf32>
    %c0_91 = arith.constant 0 : index
    %c2_92 = arith.constant 2 : index
    %c1_93 = arith.constant 1 : index
    %c0_94 = arith.constant 0 : index
    %152 = vector.load %arg1[%c0_91, %c2_92, %c1_93, %c0_94] : memref<1x10x10x8xf32, #tpu.memory_space<vmem>>, vector<1x8x8x8xf32>
    %153 = vector.shape_cast %152 : vector<1x8x8x8xf32> to vector<8x8x8xf32>
    %154 = vector.shape_cast %153 : vector<8x8x8xf32> to vector<64x8xf32>
    %c2_95 = arith.constant 2 : index
    %c1_96 = arith.constant 1 : index
    %c0_97 = arith.constant 0 : index
    %155 = vector.load %arg2[%c2_95, %c1_96, %c0_97] : memref<10x10x1xf32, #tpu.memory_space<vmem>>, vector<8x8x1xf32>
    %156 = vector.shape_cast %155 : vector<8x8x1xf32> to vector<64x1xf32>
    %157 = vector.broadcast %0 : vector<1x8xf32> to vector<64x8xf32>
    %158 = arith.mulf %154, %157 : vector<64x8xf32>
    %159 = vector.broadcast %1 : vector<1x8xf32> to vector<64x8xf32>
    %160 = arith.addf %158, %159 : vector<64x8xf32>
    %cst_98 = arith.constant 0.000000e+00 : f32
    %161 = vector.broadcast %cst_98 : f32 to vector<64x8xf32>
    %162 = arith.cmpf oge, %160, %161 : vector<64x8xf32>
    %cst_99 = arith.constant 2.000000e-01 : f32
    %163 = vector.broadcast %cst_99 : f32 to vector<64x8xf32>
    %164 = arith.mulf %163, %160 : vector<64x8xf32>
    %165 = arith.select %162, %160, %164 : vector<64x8xi1>, vector<64x8xf32>
    %166 = vector.broadcast %156 : vector<64x1xf32> to vector<64x8xf32>
    %167 = arith.mulf %165, %166 : vector<64x8xf32>
    %168 = arith.truncf %167 : vector<64x8xf32> to vector<64x8xbf16>
    %c7 = arith.constant 7 : index
    %c0_100 = arith.constant 0 : index
    %c0_101 = arith.constant 0 : index
    %169 = vector.load %arg4[%c7, %c0_100, %c0_101] : memref<9x8x8xbf16, #tpu.memory_space<vmem>>, vector<1x8x8xbf16>
    %170 = vector.shape_cast %169 : vector<1x8x8xbf16> to vector<8x8xbf16>
    %cst_102 = arith.constant dense<0.000000e+00> : vector<64x8xf32>
    %171 = tpu.matmul %168, %170, %cst_102 {dimension_numbers = #tpu.dot_dimension_numbers<[1], [0], [0], [1], [0, 0, 1, 1], [], []>} : vector<64x8xbf16>, vector<8x8xbf16>, vector<64x8xf32> -> vector<64x8xf32>
    %172 = arith.addf %151, %171 : vector<64x8xf32>
    %c0_103 = arith.constant 0 : index
    %c2_104 = arith.constant 2 : index
    %c2_105 = arith.constant 2 : index
    %c0_106 = arith.constant 0 : index
    %173 = vector.load %arg1[%c0_103, %c2_104, %c2_105, %c0_106] : memref<1x10x10x8xf32, #tpu.memory_space<vmem>>, vector<1x8x8x8xf32>
    %174 = vector.shape_cast %173 : vector<1x8x8x8xf32> to vector<8x8x8xf32>
    %175 = vector.shape_cast %174 : vector<8x8x8xf32> to vector<64x8xf32>
    %c2_107 = arith.constant 2 : index
    %c2_108 = arith.constant 2 : index
    %c0_109 = arith.constant 0 : index
    %176 = vector.load %arg2[%c2_107, %c2_108, %c0_109] : memref<10x10x1xf32, #tpu.memory_space<vmem>>, vector<8x8x1xf32>
    %177 = vector.shape_cast %176 : vector<8x8x1xf32> to vector<64x1xf32>
    %178 = vector.broadcast %0 : vector<1x8xf32> to vector<64x8xf32>
    %179 = arith.mulf %175, %178 : vector<64x8xf32>
    %180 = vector.broadcast %1 : vector<1x8xf32> to vector<64x8xf32>
    %181 = arith.addf %179, %180 : vector<64x8xf32>
    %cst_110 = arith.constant 0.000000e+00 : f32
    %182 = vector.broadcast %cst_110 : f32 to vector<64x8xf32>
    %183 = arith.cmpf oge, %181, %182 : vector<64x8xf32>
    %cst_111 = arith.constant 2.000000e-01 : f32
    %184 = vector.broadcast %cst_111 : f32 to vector<64x8xf32>
    %185 = arith.mulf %184, %181 : vector<64x8xf32>
    %186 = arith.select %183, %181, %185 : vector<64x8xi1>, vector<64x8xf32>
    %187 = vector.broadcast %177 : vector<64x1xf32> to vector<64x8xf32>
    %188 = arith.mulf %186, %187 : vector<64x8xf32>
    %189 = arith.truncf %188 : vector<64x8xf32> to vector<64x8xbf16>
    %c8 = arith.constant 8 : index
    %c0_112 = arith.constant 0 : index
    %c0_113 = arith.constant 0 : index
    %190 = vector.load %arg4[%c8, %c0_112, %c0_113] : memref<9x8x8xbf16, #tpu.memory_space<vmem>>, vector<1x8x8xbf16>
    %191 = vector.shape_cast %190 : vector<1x8x8xbf16> to vector<8x8xbf16>
    %cst_114 = arith.constant dense<0.000000e+00> : vector<64x8xf32>
    %192 = tpu.matmul %189, %191, %cst_114 {dimension_numbers = #tpu.dot_dimension_numbers<[1], [0], [0], [1], [0, 0, 1, 1], [], []>} : vector<64x8xbf16>, vector<8x8xbf16>, vector<64x8xf32> -> vector<64x8xf32>
    %193 = arith.addf %172, %192 : vector<64x8xf32>
    %194 = vector.shape_cast %193 : vector<64x8xf32> to vector<8x8x8xf32>
    %c0_115 = arith.constant 0 : index
    %c0_116 = arith.constant 0 : index
    %c0_117 = arith.constant 0 : index
    %c0_118 = arith.constant 0 : index
    %195 = vector.load %arg6[%c0_115, %c0_116, %c0_117, %c0_118] : memref<1x8x8x8xf32, #tpu.memory_space<vmem>>, vector<1x8x8x8xf32>
    %196 = vector.shape_cast %195 : vector<1x8x8x8xf32> to vector<8x8x8xf32>
    %197 = vector.shape_cast %194 : vector<8x8x8xf32> to vector<1x8x8x8xf32>
    tpu.vector_store %arg6[%c0_115, %c0_116, %c0_117, %c0_118], %197 {strides = array<i32>} : memref<1x8x8x8xf32, #tpu.memory_space<vmem>>, vector<1x8x8x8xf32>,
    return
  }
  func.func @transform_0(%arg0: i32) -> (i32, i32, i32, i32) {
    %c0_i32 = arith.constant 0 : i32
    %c0_i32_0 = arith.constant 0 : i32
    %c0_i32_1 = arith.constant 0 : i32
    %c0_i32_2 = arith.constant 0 : i32
    return %arg0, %c0_i32, %c0_i32_0, %c0_i32_1 : i32, i32, i32, i32
  }
  func.func @transform_1(%arg0: i32) -> (i32, i32, i32) {
    %c0_i32 = arith.constant 0 : i32
    %c0_i32_0 = arith.constant 0 : i32
    %c0_i32_1 = arith.constant 0 : i32
    %c0_i32_2 = arith.constant 0 : i32
    return %c0_i32, %c0_i32_0, %c0_i32_1 : i32, i32, i32
  }
  func.func @transform_2(%arg0: i32) -> (i32, i32) {
    %c0_i32 = arith.constant 0 : i32
    %c0_i32_0 = arith.constant 0 : i32
    %c0_i32_1 = arith.constant 0 : i32
    return %c0_i32, %c0_i32_0 : i32, i32
  }
  func.func @transform_3(%arg0: i32) -> (i32, i32, i32) {
    %c0_i32 = arith.constant 0 : i32
    %c0_i32_0 = arith.constant 0 : i32
    %c0_i32_1 = arith.constant 0 : i32
    %c0_i32_2 = arith.constant 0 : i32
    return %c0_i32, %c0_i32_0, %c0_i32_1 : i32, i32, i32
  }
  func.func @transform_4(%arg0: i32) -> (i32, i32, i32, i32) {
    %c0_i32 = arith.constant 0 : i32
    %c0_i32_0 = arith.constant 0 : i32
    %c0_i32_1 = arith.constant 0 : i32
    %c0_i32_2 = arith.constant 0 : i32
    return %arg0, %c0_i32, %c0_i32_0, %c0_i32_1 : i32, i32, i32, i32
  }
  func.func @transform_5(%arg0: i32) -> (i32, i32, i32, i32) {
    %c0_i32 = arith.constant 0 : i32
    %c0_i32_0 = arith.constant 0 : i32
    %c0_i32_1 = arith.constant 0 : i32
    %c0_i32_2 = arith.constant 0 : i32
    return %arg0, %c0_i32, %c0_i32_0, %c0_i32_1 : i32, i32, i32, i32
  }
}

</mosaic_0001>

<bundles_post_ra>
// kernel: residual_block_forward.3
= control target key start
LH: loop header
LB: loop body
LE: loop exit
PB: predicated region body
PF: predicated region fallthrough
CT: control target
= control target key end

     0   :  { %s385_s6 = smov 0   ;;  %s514_s0 = inlined_call_operand.vmem [shape: f32[512,4], index: 0, kind: input, shape index: {}]   ;;  %s515_s1 = inlined_call_operand.vmem [shape: f32[2,4], index: 1, kind: output, shape index: {}]  }
   0x1 LB: > { %s348_s7 = sadd.s32 4294967295, %s372_s6   ;;  %p351_p0 = scmp.ge.s32.totalorder %s372_s6, 1  ;;  %s372_s6 = sphi %s385_s6, %s11_s6  }
   0x2   : > { %p83_p1 = scmp.lt.s32.totalorder %s372_s6, 3 }
   0x4   : > { %p84_p2 = pnand %p351_p0, %p83_p1 }
   0x5   : > { %s352_s8 = sshll.u32 (!%p84_p2), %s348_s7, 5  ;;  %p354_p4 = scmp.ne.s32.totalorder (!%p84_p2), %s348_s7, 0 }
   0x6   : > { %87 = sbr.rel (%p84_p2) target bundleno = 104 (0x68), region = 24  ;;  %p99_p3 = scmp.lt.s32.totalorder (!%p84_p2), %s352_s8, 63 }
   0xd   : > { %s517_s8 = smov (!%p99_p3, %s352_s8), 63  ;;  %107 = sbr.rel (%p354_p4) target bundleno = 20 (0x14), region = 28 }
   0xe   : > { %s353_s9 = sshll.u32 %s517_s8, 3  ;;  %vm108_vm0 = vcmask (!%p354_p4), 25600   ;;  %v374_v0 = vmov (!%p354_p4), 0.0  }
   0xf   : > { %s396_s12 = scalar_lea.vmem %s514_s0, %s353_s9  ;;  %109 = vst.msk [vmem:[%s515_s1] sm:$0x3] (!%p354_p4), %vm108_vm0, %v374_v0 }
  0x14 PF: > { %v110_v1 = vld [vmem:[%s396_s12] sm:$0xff]  ;;  %v111_v2 = vld [vmem:[%s396_s12 + $0x8] sm:$0xff]  ;;  %v112_v3 = vld [vmem:[%s396_s12 + $0x10] sm:$0xff]  ;;  %vm143_vm1 = vcmask 31744   ;;  %vm214_vm2 = vcmask 24576  }
  0x15   : > { %v144_v4 = vsel %vm143_vm1, %v110_v1, 0.0  ;;  %v145_v5 = vsel %vm143_vm1, %v111_v2, 0.0  ;;  %v147_v6 = vsel %vm143_vm1, %v112_v3, 0.0  ;;  %v113_v7 = vld [vmem:[%s396_s12 + $0x18] sm:$0xff]  ;;  %v114_v10 = vld [vmem:[%s396_s12 + $0x20] sm:$0xff]  ;;  %v115_v13 = vld [vmem:[%s396_s12 + $0x28] sm:$0xff]  ;;  %v217_v28 = vmul.f32 %v110_v1, %v110_v1 }
  0x16   : > { %v146_v8 = vadd.f32 %v145_v5, %v144_v4  ;;  %v149_v9 = vsel %vm143_vm1, %v113_v7, 0.0  ;;  %v151_v12 = vsel %vm143_vm1, %v114_v10, 0.0  ;;  %v153_v15 = vsel %vm143_vm1, %v115_v13, 0.0  ;;  %v116_v16 = vld [vmem:[%s396_s12 + $0x30] sm:$0xff]  ;;  %v117_v19 = vld [vmem:[%s396_s12 + $0x38] sm:$0xff]  ;;  %v118_v22 = vld [vmem:[%s396_s12 + $0x40] sm:$0xff] }
  0x17   : > { %v155_v18 = vsel %vm143_vm1, %v116_v16, 0.0  ;;  %v157_v21 = vsel %vm143_vm1, %v117_v19, 0.0  ;;  %v159_v24 = vsel %vm143_vm1, %v118_v22, 0.0  ;;  %v119_v25 = vld [vmem:[%s396_s12 + $0x48] sm:$0xff]  ;;  %v218_v29 = vmul.f32 %v111_v2, %v111_v2  ;;  %v120_v31 = vld [vmem:[%s396_s12 + $0x50] sm:$0xff]  ;;  %v121_v33 = vld [vmem:[%s396_s12 + $0x58] sm:$0xff] }
  0x18   : > { %v148_v11 = vadd.f32 %v147_v6, %v146_v8  ;;  %v161_v27 = vsel %vm143_vm1, %v119_v25, 0.0  ;;  %v219_v30 = vmul.f32 %v112_v3, %v112_v3  ;;  %v163_v34 = vsel %vm143_vm1, %v120_v31, 0.0  ;;  %v122_v42 = vld [vmem:[%s396_s12 + $0x60] sm:$0xff]  ;;  %v123_v48 = vld [vmem:[%s396_s12 + $0x68] sm:$0xff]  ;;  %v124_v54 = vld [vmem:[%s396_s12 + $0x70] sm:$0xff] }
  0x19   : > { %v220_v35 = vmul.f32 %v113_v7, %v113_v7  ;;  %v165_v37 = vsel %vm143_vm1, %v121_v33, 0.0  ;;  %v221_v38 = vmul.f32 %v114_v10, %v114_v10  ;;  %v249_v39 = vsel %vm143_vm1, %v217_v28, 0.0  ;;  %v125_v60 = vld [vmem:[%s396_s12 + $0x78] sm:$0xff]  ;;  %v126_v2 = vld [vmem:[%s396_s12 + $0x80] sm:$0xff]  ;;  %v127_v8 = vld [vmem:[%s396_s12 + $0x88] sm:$0xff] }
  0x1a   : > { %v150_v14 = vadd.f32 %v149_v9, %v148_v11  ;;  %v250_v40 = vsel %vm143_vm1, %v218_v29, 0.0  ;;  %v252_v41 = vsel %vm143_vm1, %v219_v30, 0.0  ;;  %v167_v45 = vsel %vm143_vm1, %v122_v42, 0.0 }
  0x1b   : > { %v251_v44 = vadd.f32 %v250_v40, %v249_v39  ;;  %v222_v46 = vmul.f32 %v115_v13, %v115_v13  ;;  %v254_v47 = vsel %vm143_vm1, %v220_v35, 0.0  ;;  %v169_v51 = vsel %vm143_vm1, %v123_v48, 0.0 }
  0x1c   : > { %v152_v17 = vadd.f32 %v151_v12, %v150_v14  ;;  %v223_v52 = vmul.f32 %v116_v16, %v116_v16  ;;  %v256_v53 = vsel %vm143_vm1, %v221_v38, 0.0  ;;  %v171_v57 = vsel %vm143_vm1, %v124_v54, 0.0  ;;  %v128_v14 = vld [vmem:[%s396_s12 + $0x90] sm:$0xff] }
  0x1d   : > { %v253_v50 = vadd.f32 %v252_v41, %v251_v44  ;;  %v224_v58 = vmul.f32 %v117_v19, %v117_v19  ;;  %v258_v59 = vsel %vm143_vm1, %v222_v46, 0.0  ;;  %v173_v63 = vsel %vm143_vm1, %v125_v60, 0.0  ;;  %v132_v38 = vld [vmem:[%s396_s12 + $0xb0] sm:$0xff]  ;;  %v133_v44 = vld [vmem:[%s396_s12 + $0xb8] sm:$0xff] }
  0x1e   : > { %v154_v20 = vadd.f32 %v153_v15, %v152_v17  ;;  %v225_v0 = vmul.f32 %v118_v22, %v118_v22  ;;  %v260_v1 = vsel %vm143_vm1, %v223_v52, 0.0  ;;  %v175_v5 = vsel %vm143_vm1, %v126_v2, 0.0 }
  0x1f   : > { %v255_v56 = vadd.f32 %v254_v47, %v253_v50  ;;  %v226_v6 = vmul.f32 %v119_v25, %v119_v25  ;;  %v262_v7 = vsel %vm143_vm1, %v224_v58, 0.0  ;;  %v177_v11 = vsel %vm143_vm1, %v127_v8, 0.0  ;;  %v134_v50 = vld [vmem:[%s396_s12 + $0xc0] sm:$0xff] }
  0x20   : > { %v156_v23 = vadd.f32 %v155_v18, %v154_v20  ;;  %v227_v12 = vmul.f32 %v120_v31, %v120_v31  ;;  %v264_v13 = vsel %vm143_vm1, %v225_v0, 0.0  ;;  %v179_v17 = vsel %vm143_vm1, %v128_v14, 0.0  ;;  %v129_v20 = vld [vmem:[%s396_s12 + $0x98] sm:$0xff] }
  0x21   : > { %v257_v62 = vadd.f32 %v256_v53, %v255_v56  ;;  %v228_v18 = vmul.f32 %v121_v33, %v121_v33  ;;  %v266_v19 = vsel %vm143_vm1, %v226_v6, 0.0  ;;  %v230_v30 = vmul.f32 %v123_v48, %v123_v48  ;;  %v135_v56 = vld [vmem:[%s396_s12 + $0xc8] sm:$0xff] }
  0x22   : > { %v158_v26 = vadd.f32 %v157_v21, %v156_v23  ;;  %v181_v23 = vsel %vm143_vm1, %v129_v20, 0.0  ;;  %v268_v25 = vsel %vm143_vm1, %v227_v12, 0.0  ;;  %v187_v41 = vsel %vm143_vm1, %v132_v38, 0.0 }
  0x23   : > { %v259_v4 = vadd.f32 %v258_v59, %v257_v62  ;;  %v270_v31 = vsel %vm143_vm1, %v228_v18, 0.0  ;;  %v189_v47 = vsel %vm143_vm1, %v133_v44, 0.0  ;;  %v233_v48 = vmul.f32 %v126_v2, %v126_v2  ;;  %v136_v62 = vld [vmem:[%s396_s12 + $0xd0] sm:$0xff] }
  0x24   : > { %v160_v32 = vadd.f32 %v159_v24, %v158_v26  ;;  %v229_v24 = vmul.f32 %v122_v42, %v122_v42  ;;  %v130_v26 = vld [vmem:[%s396_s12 + $0xa0] sm:$0xff]  ;;  %v232_v42 = vmul.f32 %v125_v60, %v125_v60  ;;  %v191_v53 = vsel %vm143_vm1, %v134_v50, 0.0 }
  0x25   : > { %v261_v10 = vadd.f32 %v260_v1, %v259_v4  ;;  %v183_v29 = vsel %vm143_vm1, %v130_v26, 0.0  ;;  %v193_v59 = vsel %vm143_vm1, %v135_v56, 0.0  ;;  %v235_v60 = vmul.f32 %v128_v14, %v128_v14  ;;  %v137_v4 = vld [vmem:[%s396_s12 + $0xd8] sm:$0xff] }
  0x26   : > { %v162_v36 = vadd.f32 %v161_v27, %v160_v32  ;;  %v131_v32 = vld [vmem:[%s396_s12 + $0xa8] sm:$0xff]  ;;  %v195_v1 = vsel %vm143_vm1, %v136_v62, 0.0  ;;  %v236_v2 = vmul.f32 %v129_v20, %v129_v20  ;;  %v239_v20 = vmul.f32 %v132_v38, %v132_v38 }
  0x27   : > { %v263_v16 = vadd.f32 %v262_v7, %v261_v10  ;;  %v185_v35 = vsel %vm143_vm1, %v131_v32, 0.0  ;;  %v197_v7 = vsel %vm143_vm1, %v137_v4, 0.0  ;;  %v138_v10 = vld [vmem:[%s396_s12 + $0xe0] sm:$0xff]  ;;  %v238_v14 = vmul.f32 %v131_v32, %v131_v32 }
  0x28   : > { %v164_v43 = vadd.f32 %v163_v34, %v162_v36  ;;  %v231_v36 = vmul.f32 %v124_v54, %v124_v54  ;;  %v234_v54 = vmul.f32 %v127_v8, %v127_v8  ;;  %v237_v8 = vmul.f32 %v130_v26, %v130_v26 }
  0x29   : > { %v265_v22 = vadd.f32 %v264_v13, %v263_v16  ;;  %v199_v13 = vsel %vm143_vm1, %v138_v10, 0.0  ;;  %v139_v16 = vld [vmem:[%s396_s12 + $0xe8] sm:$0xff]  ;;  %v240_v26 = vmul.f32 %v133_v44, %v133_v44  ;;  %v241_v32 = vmul.f32 %v134_v50, %v134_v50 }
  0x2a   : > { %v166_v49 = vadd.f32 %v165_v37, %v164_v43  ;;  %v272_v37 = vsel %vm143_vm1, %v229_v24, 0.0  ;;  %v274_v43 = vsel %vm143_vm1, %v230_v30, 0.0  ;;  %v244_v44 = vmul.f32 %v137_v4, %v137_v4 }
  0x2b   : > { %v267_v28 = vadd.f32 %v266_v19, %v265_v22  ;;  %v201_v19 = vsel %vm143_vm1, %v139_v16, 0.0  ;;  %v140_v22 = vld [vmem:[%s396_s12 + $0xf0] sm:$0xff] }
  0x2c   : > { %v168_v55 = vadd.f32 %v167_v45, %v166_v49  ;;  %v276_v49 = vsel %vm143_vm1, %v231_v36, 0.0  ;;  %v242_v36 = vmul.f32 %v135_v56, %v135_v56  ;;  %v247_v56 = vmul.f32 %v140_v22, %v140_v22 }
  0x2d   : > { %v269_v34 = vadd.f32 %v268_v25, %v267_v28  ;;  %v203_v25 = vsel %vm143_vm1, %v140_v22, 0.0  ;;  %v141_v28 = vld [vmem:[%s396_s12 + $0xf8] sm:$0xff] }
  0x2e   : > { %v170_v61 = vadd.f32 %v169_v51, %v168_v55  ;;  %v278_v55 = vsel %vm143_vm1, %v232_v42, 0.0 }
  0x2f   : > { %v271_v40 = vadd.f32 %v270_v31, %v269_v34  ;;  %v205_v31 = vsel %vm143_vm1, %v141_v28, 0.0 }
  0x30   : > { %v172_v3 = vadd.f32 %v171_v57, %v170_v61  ;;  %v280_v61 = vsel %vm143_vm1, %v233_v48, 0.0  ;;  %v245_v48 = vmul.f32 %v138_v10, %v138_v10 }
  0x31   : > { %v273_v46 = vadd.f32 %v272_v37, %v271_v40  ;;  %v294_v37 = vsel %vm143_vm1, %v240_v26, 0.0  ;;  %v243_v40 = vmul.f32 %v136_v62, %v136_v62 }
  0x32   : > { %v174_v9 = vadd.f32 %v173_v63, %v172_v3  ;;  %v282_v3 = vsel %vm143_vm1, %v234_v54, 0.0 }
  0x33   : > { %v275_v52 = vadd.f32 %v274_v43, %v273_v46 }
  0x34   : > { %v176_v15 = vadd.f32 %v175_v5, %v174_v9  ;;  %v284_v9 = vsel %vm143_vm1, %v235_v60, 0.0  ;;  %v142_v60 = vld [vmem:[%s515_s1] sm:$0x1] }
  0x35   : > { %v277_v58 = vadd.f32 %v276_v49, %v275_v52  ;;  %v300_v49 = vsel %vm143_vm1, %v243_v40, 0.0  ;;  %v246_v52 = vmul.f32 %v139_v16, %v139_v16 }
  0x36   : > { %v178_v21 = vadd.f32 %v177_v11, %v176_v15  ;;  %v286_v15 = vsel %vm143_vm1, %v236_v2, 0.0 }
  0x37   : > { %v279_v0 = vadd.f32 %v278_v55, %v277_v58  ;;  %v306_v62 = vsel %vm143_vm1, %v246_v52, 0.0 }
  0x38   : > { %v180_v27 = vadd.f32 %v179_v17, %v178_v21  ;;  %v288_v21 = vsel %vm143_vm1, %v237_v8, 0.0 }
  0x39   : > { %v281_v6 = vadd.f32 %v280_v61, %v279_v0  ;;  %v248_v61 = vmul.f32 %v141_v28, %v141_v28 }
  0x3a   : > { %v182_v33 = vadd.f32 %v181_v23, %v180_v27  ;;  %v290_v27 = vsel %vm143_vm1, %v238_v14, 0.0 }
  0x3b   : > { %v283_v12 = vadd.f32 %v282_v3, %v281_v6  ;;  %v310_v4 = vsel %vm143_vm1, %v248_v61, 0.0 }
  0x3c   : > { %v184_v39 = vadd.f32 %v183_v29, %v182_v33  ;;  %v292_v33 = vsel %vm143_vm1, %v239_v20, 0.0 }
  0x3d   : > { %v285_v18 = vadd.f32 %v284_v9, %v283_v12  ;;  %v216_v12 = vld [vmem:[%s515_s1 + $0x1] sm:$0x1] }
  0x3e   : > { %v186_v45 = vadd.f32 %v185_v35, %v184_v39 }
  0x3f   : > { %v287_v24 = vadd.f32 %v286_v15, %v285_v18 }
  0x40   : > { %v188_v51 = vadd.f32 %v187_v41, %v186_v45  ;;  %v296_v41 = vsel %vm143_vm1, %v241_v32, 0.0  ;;  %v298_v45 = vsel %vm143_vm1, %v242_v36, 0.0 }
  0x41   : > { %v289_v30 = vadd.f32 %v288_v21, %v287_v24 }
  0x42   : > { %v190_v57 = vadd.f32 %v189_v47, %v188_v51 }
  0x43   : > { %v291_v35 = vadd.f32 %v290_v27, %v289_v30 }
  0x44   : > { %v192_v63 = vadd.f32 %v191_v53, %v190_v57  ;;  %v302_v53 = vsel %vm143_vm1, %v244_v44, 0.0  ;;  %v304_v57 = vsel %vm143_vm1, %v245_v48, 0.0 }
  0x45   : > { %v293_v39 = vadd.f32 %v292_v33, %v291_v35 }
  0x46   : > { %v194_v5 = vadd.f32 %v193_v59, %v192_v63 }
  0x47   : > { %v295_v43 = vadd.f32 %v294_v37, %v293_v39 }
  0x48   : > { %v196_v11 = vadd.f32 %v195_v1, %v194_v5  ;;  %v308_v1 = vsel %vm143_vm1, %v247_v56, 0.0 }
  0x49   : > { %v297_v47 = vadd.f32 %v296_v41, %v295_v43 }
  0x4a   : > { %v198_v17 = vadd.f32 %v197_v7, %v196_v11 }
  0x4b   : > { %v299_v51 = vadd.f32 %v298_v45, %v297_v47 }
  0x4c   : > { %v200_v23 = vadd.f32 %v199_v13, %v198_v17 }
  0x4d   : > { %v301_v55 = vadd.f32 %v300_v49, %v299_v51 }
  0x4e   : > { %v202_v29 = vadd.f32 %v201_v19, %v200_v23 }
  0x4f   : > { %v303_v59 = vadd.f32 %v302_v53, %v301_v55 }
  0x50   : > { %v204_v34 = vadd.f32 %v203_v25, %v202_v29 }
  0x51   : > { %v305_v0 = vadd.f32 %v304_v57, %v303_v59 }
  0x52   : > { %v206_v38 = vadd.f32 %v205_v31, %v204_v34 }
  0x53   : > { %v307_v3 = vadd.f32 %v306_v62, %v305_v0 }
  0x54   : > { %v207_v42 = vrot.slane %v206_v38, 4 }
  0x55   : > { %v309_v5 = vadd.f32 %v308_v1, %v307_v3 }
  0x56   : > { %v208_v46 = vadd.f32 %v207_v42, %v206_v38 }
  0x57   : > { %v311_v6 = vadd.f32 %v310_v4, %v309_v5 }
  0x58   : > { %v209_v50 = vrot.slane %v208_v46, 2 }
  0x59   : > { %v312_v7 = vrot.slane %v311_v6, 4 }
  0x5a   : > { %v210_v54 = vadd.f32 %v209_v50, %v208_v46 }
  0x5b   : > { %v313_v8 = vadd.f32 %v312_v7, %v311_v6 }
  0x5c   : > { %v211_v58 = vrot.slane %v210_v54, 1 }
  0x5d   : > { %v314_v9 = vrot.slane %v313_v8, 2 }
  0x5e   : > { %v212_v63 = vadd.f32 %v211_v58, %v210_v54 }
  0x5f   : > { %v315_v10 = vadd.f32 %v314_v9, %v313_v8 }
  0x60   : > { %v213_v2 = vadd.f32 %v212_v63, %v142_v60 }
  0x61   : > { %v316_v11 = vrot.slane %v315_v10, 1 }
  0x62   : > { %215 = vst.msk [vmem:[%s515_s1] sm:$0x1] %vm214_vm2, %v213_v2 }
  0x63   : > { %v317_v13 = vadd.f32 %v316_v11, %v315_v10 }
  0x65   : > { %v318_v14 = vadd.f32 %v317_v13, %v216_v12 }
  0x67   : > { %319 = vst.msk [vmem:[%s515_s1 + $0x1] sm:$0x1] %vm214_vm2, %v318_v14 }
  0x68 PF: > { %s11_s6 = sadd.s32 1, %s372_s6  }
  0x69   : > { %p8_p5 = scmp.ge.s32.totalorder %s11_s6, 4  }
  0x6b   :  { %10 = sbr.rel (!%p8_p5) target bundleno = 1 (0x1), region = 54 }

// kernel: residual_block_forward.5
= control target key start
LH: loop header
LB: loop body
LE: loop exit
PB: predicated region body
PF: predicated region fallthrough
CT: control target
= control target key end

     0   :  { %s2554_s18 = smov 0   ;;  %s3128_s0 = inlined_call_operand.vmem [shape: f32[2,10,10,8], index: 0, kind: input, shape index: {}]   ;;  %s3129_s1 = inlined_call_operand.vmem [shape: f32[10,10,1], index: 1, kind: input, shape index: {}]   ;;  %s3130_s2 = inlined_call_operand.vmem [shape: f32[2,8], index: 2, kind: input, shape index: {}]   ;;  %s3131_s3 = inlined_call_operand.vmem [shape: bf16[9,8,8], index: 3, kind: input, shape index: {}]   ;;  %s3132_s4 = inlined_call_operand.vmem [shape: f32[2,8,8,8], index: 4, kind: input, shape index: {}]   ;;  %s3133_s5 = inlined_call_operand.vmem [shape: f32[2,8,8,8], index: 5, kind: output, shape index: {}]  }
   0x1 LB: > { %s2126_s19 = sadd.s32 4294967295, %s2521_s18   ;;  %p2130_p0 = scmp.ge.s32.totalorder %s2521_s18, 1  ;;  %s2521_s18 = sphi %s2554_s18, %s15_s18  }
   0x2   : > { %p197_p1 = scmp.lt.s32.totalorder %s2521_s18, 3 }
   0x4   : > { %p198_p2 = pnand %p2130_p0, %p197_p1 }
   0x5   : > { %v2565_v0 = vld [vmem:[%s3129_s1 + $0x20] sm:$0xff] (!%p198_p2)  ;;  %v2523_v2 = vmov (!%p198_p2), 0   ;;  %v2574_v3 = vld [vmem:[%s3129_s1 + $0x30] sm:$0xff] (!%p198_p2)  ;;  %vm386_vm0 = vcmask (!%p198_p2), 1043456   ;;  %p230_p3 = scmp.lt.s32.totalorder (!%p198_p2), %s2126_s19, 1  ;;  %vm373_vm8 = vcmask (!%p198_p2), 64512  }
   0x6   : > { %201 = sbr.rel (%p198_p2) target bundleno = 497 (0x1f1), region = 40  ;;  %v264_v1 = vld [vmem:[%s3129_s1] sm:$0xff] (!%p198_p2)  ;;  %2512 = vset.pattern.permute.xlu1 (!%p198_p2), %v2523_v2  ;;  %2511 = vset.pattern.permute.xlu0 (!%p198_p2), %v2523_v2  ;;  %v2579_v4 = vld [vmem:[%s3129_s1 + $0x10] sm:$0xff] (!%p198_p2) }
   0x7   : > { %332 = vperm.xlu1 (!%p198_p2), %2512, %v2565_v0   ;;  %322 = vperm.xlu0 (!%p198_p2), %2511, %v264_v1   ;;  %v2586_v5 = vld [vmem:[%s3129_s1 + $0x21] sm:$0xff] (!%p198_p2)  ;;  %v2181_v6 = vld [vmem:[%s3129_s1 + $0x11] sm:$0xff] (!%p198_p2)  ;;  %v2785_v36 = vld [vmem:[%s3130_s2] ss:$0 sm:$0xff] (!%p198_p2) }
   0x8   : > { %v2595_v7 = vld [vmem:[%s3129_s1 + $0x41] sm:$0xff] (!%p198_p2)  ;;  %v2600_v8 = vld [vmem:[%s3129_s1 + $0x31] sm:$0xff] (!%p198_p2) }
   0x9   : > { %v372_v9 = vld [vmem:[%s3131_s3] sm:$0xf] (!%p198_p2)  ;;  %v2612_v11 = vld [vmem:[%s3131_s3 + $0x10] sm:$0xf] (!%p198_p2)  ;;  %v2669_v21 = vld [vmem:[%s3131_s3 + $0x14] sm:$0xf] (!%p198_p2) }
   0xa   : > { %2491 = vmatprep.subr.msk.bf16.mxu1 (!%p198_p2), %vm386_vm0, %v372_v9  ;;  %v388_v10 = vsel (!%p198_p2), %vm386_vm0, %v372_v9, 0  ;;  %v2617_v12 = vld [vmem:[%s3129_s1 + $0x50] sm:$0xff] (!%p198_p2)  ;;  %v2622_v13 = vld [vmem:[%s3129_s1 + $0x40] sm:$0xff] (!%p198_p2)  ;;  %2495 = vmatprep.subr.msk.bf16.mxu0 (!%p198_p2), %vm386_vm0, %v2612_v11  ;;  %v2630_v14 = vsel (!%p198_p2), %vm386_vm0, %v2612_v11, 0 }
   0xb   : > { %337 = vperm.xlu1 (!%p198_p2), %2512, %v2574_v3   ;;  %327 = vperm.xlu0 (!%p198_p2), %2511, %v2579_v4   ;;  %v2635_v15 = vld [vmem:[%s3129_s1 + $0x70] sm:$0xff] (!%p198_p2)  ;;  %v2640_v16 = vld [vmem:[%s3129_s1 + $0x60] sm:$0xff] (!%p198_p2) }
   0xc   : > { %2328 = vmatpush3.bf16.msra.mxu1 (!%p198_p2), %v388_v10  ;;  %2368 = vmatpush3.bf16.msra.mxu0 (!%p198_p2), %v2630_v14  ;;  %v2648_v17 = vld [vmem:[%s3129_s1 + $0x22] sm:$0xff] (!%p198_p2)  ;;  %v2202_v18 = vld [vmem:[%s3129_s1 + $0x12] sm:$0xff] (!%p198_p2)  ;;  %v2796_v42 = vld [vmem:[%s3130_s2 + $0x1] ss:$0 sm:$0xff] (!%p198_p2) }
   0xd   : > { %v2657_v19 = vld [vmem:[%s3129_s1 + $0x42] sm:$0xff]  ;;  %v2662_v20 = vld [vmem:[%s3129_s1 + $0x32] sm:$0xff]  ;;  %2497 = vmatprep.subr.msk.bf16.mxu0 %vm386_vm0, %v2669_v21  ;;  %s3135_s19 = smov (!%p230_p3, %s2126_s19), 1 }
   0xe   : > { %v471_v22 = vld [vmem:[%s3129_s1 + $0x1] sm:$0xff]  ;;  %v2686_v24 = vld [vmem:[%s3129_s1 + $0x52] sm:$0xff]  ;;  %s2501_s15 = smul.u32 160, %s3135_s19  ;;  %s2280_s16 = sshll.u32 %s3135_s19, 6 }
   0xf   : > { %1122 = vperm.xlu1 %2512, %v2586_v5   ;;  %1117 = vperm.xlu0 %2511, %v2181_v6   ;;  %v2681_v23 = vld [vmem:[%s3129_s1 + $0x62] sm:$0xff]  ;;  %v2705_v27 = vld [vmem:[%s3129_s1 + $0x72] sm:$0xff]  ;;  %s239_s21 = scalar_lea.vmem %s3132_s4, %s2280_s16  ;;  %s3107_s24 = scalar_lea.vmem %s3133_s5, %s2280_s16 }
  0x10   : > { %v2691_v25 = vld [vmem:[%s3131_s3 + $0x4] sm:$0xf]  ;;  %v2712_v28 = vld [vmem:[%s3129_s1 + $0x51] sm:$0xff]  ;;  %s2778_s20 = scalar_lea.vmem %s3128_s0, %s2501_s15 }
  0x11   : > { %2492 = vmatprep.subr.msk.bf16.mxu1 %vm386_vm0, %v2691_v25  ;;  %v2700_v26 = vld [vmem:[%s3129_s1 + $0x82] sm:$0xff]  ;;  %v2719_v29 = vld [vmem:[%s3129_s1 + $0x71] sm:$0xff] }
  0x12   : > { %v2724_v30 = vld [vmem:[%s3129_s1 + $0x61] sm:$0xff]  ;;  %v2230_v32 = vld [vmem:[%s3129_s1 + $0x90] sm:$0xff] }
  0x13   : > { %1132 = vperm.xlu1 %2512, %v2595_v7   ;;  %1127 = vperm.xlu0 %2511, %v2600_v8   ;;  %v669_v31 = vld [vmem:[%s3129_s1 + $0x2] sm:$0xff]  ;;  %v2251_v34 = vld [vmem:[%s3129_s1 + $0x91] sm:$0xff] }
  0x14   : > { %v2229_v33 = vld [vmem:[%s3129_s1 + $0x80] sm:$0xff]  ;;  %v259_v39 = vld [vmem:[%s2778_s20 + $0x30] sm:$0xff] }
  0x15   : > { %v2771_v35 = vld [vmem:[%s3129_s1 + $0x81] sm:$0xff]  ;;  %v257_v40 = vld [vmem:[%s2778_s20 + $0x10] sm:$0xff]  ;;  %v279_v44 = vmul.f32 %v2785_v36, %v259_v39 }
  0x16   : > { %v258_v37 = vld [vmem:[%s2778_s20 + $0x20] sm:$0xff]  ;;  %v277_v46 = vmul.f32 %v2785_v36, %v257_v40  ;;  %v2173_v47 = vld [vmem:[%s2778_s20 + $0x11] sm:$0xff] }
  0x17   : > { %347 = vperm.xlu1 %2512, %v2617_v12   ;;  %342 = vperm.xlu0 %2511, %v2622_v13   ;;  %v256_v38 = vld [vmem:[%s2778_s20] sm:$0xff]  ;;  %v278_v41 = vmul.f32 %v2785_v36, %v258_v37  ;;  %v291_v52 = vadd.f32 %v2796_v42, %v279_v44  ;;  %v1075_v54 = vmul.f32 %v2173_v47, %v2785_v36  ;;  %v2175_v56 = vld [vmem:[%s2778_s20 + $0x31] sm:$0xff] }
  0x18   : > { %v276_v43 = vmul.f32 %v2785_v36, %v256_v38  ;;  %v2174_v45 = vld [vmem:[%s2778_s20 + $0x21] sm:$0xff]  ;;  %v289_v53 = vadd.f32 %v2796_v42, %v277_v46  ;;  %v261_v59 = vld [vmem:[%s2778_s20 + $0x50] sm:$0xff] }
  0x19   : > { %v290_v48 = vadd.f32 %v2796_v42, %v278_v41  ;;  %v1076_v49 = vmul.f32 %v2174_v45, %v2785_v36  ;;  %v2176_v50 = vld [vmem:[%s2778_s20 + $0x41] sm:$0xff]  ;;  %v307_v61 = vmul.f32 0.2, %v291_v52  ;;  %vm299_vm3 = vcmp.ge.f32.partialorder %v291_v52, 0.0  ;;  %v263_v10 = vld [vmem:[%s2778_s20 + $0x70] sm:$0xff] }
  0x1a   : > { %v288_v51 = vadd.f32 %v2796_v42, %v276_v43  ;;  %v1078_v55 = vmul.f32 %v2176_v50, %v2785_v36  ;;  %v305_v62 = vmul.f32 0.2, %v289_v53  ;;  %v1083_v63 = vadd.f32 %v2796_v42, %v1075_v54  ;;  %v260_v2 = vld [vmem:[%s2778_s20 + $0x40] sm:$0xff]  ;;  %v2194_v44 = vld [vmem:[%s2778_s20 + $0x12] sm:$0xff] }
  0x1b   : > { %357 = vperm.xlu1 %2512, %v2635_v15   ;;  %352 = vperm.xlu0 %2511, %v2640_v16   ;;  %v306_v57 = vmul.f32 0.2, %v290_v48  ;;  %v1084_v58 = vadd.f32 %v2796_v42, %v1076_v49  ;;  %vm298_vm1 = vcmp.ge.f32.partialorder %v290_v48, 0.0  ;;  %vm297_vm4 = vcmp.ge.f32.partialorder %v289_v53, 0.0 }
  0x1c   : > { %vm296_vm2 = vcmp.ge.f32.partialorder %v288_v51, 0.0  ;;  %v304_v60 = vmul.f32 0.2, %v288_v51  ;;  %v1086_v1 = vadd.f32 %v2796_v42, %v1078_v55  ;;  %v2827_v9 = vsel %vm299_vm3, %v291_v52, %v307_v61  ;;  %v2196_v52 = vld [vmem:[%s2778_s20 + $0x32] sm:$0xff] }
  0x1d   : > { %vm1092_vm5 = vcmp.ge.f32.partialorder %v1084_v58, 0.0  ;;  %vm1091_vm6 = vcmp.ge.f32.partialorder %v1083_v63, 0.0  ;;  %v2272_v55 = vld [vmem:[%s3129_s1 + $0x92] sm:$0xff] }
  0x1e   : > { %vm1094_vm7 = vcmp.ge.f32.partialorder %v1086_v1, 0.0 }
  0x1f   : > { %1320 = vperm.xlu1 %2512, %v2648_v17   ;;  %1315 = vperm.xlu0 %2511, %v2202_v18  }
  0x23   : > { %1330 = vperm.xlu1 %2512, %v2657_v19   ;;  %1325 = vperm.xlu0 %2511, %v2662_v20  }
  0x27   : > { %526 = vperm.xlu1 %2512, %v2181_v6   ;;  %521 = vperm.xlu0 %2511, %v471_v22   ;;  %v281_v6 = vmul.f32 %v2785_v36, %v261_v59 }
  0x2b   : > { %536 = vperm.xlu1 %2512, %v2600_v8   ;;  %531 = vperm.xlu0 %2511, %v2586_v5  }
  0x2f   : > { %1340 = vperm.xlu1 %2512, %v2681_v23   ;;  %1335 = vperm.xlu0 %2511, %v2686_v24  }
  0x33   : > { %1350 = vperm.xlu1 %2512, %v2700_v26   ;;  %1345 = vperm.xlu0 %2511, %v2705_v27  }
  0x37   : > { %546 = vperm.xlu1 %2512, %v2712_v28   ;;  %541 = vperm.xlu0 %2511, %v2595_v7  }
  0x3b   : > { %556 = vperm.xlu1 %2512, %v2719_v29   ;;  %551 = vperm.xlu0 %2511, %v2724_v30  }
  0x3f   : > { %1520 = vperm.xlu1 %2512, %v2574_v3   ;;  %1515 = vperm.xlu0 %2511, %v2565_v0  }
  0x43   : > { %1530 = vperm.xlu1 %2512, %v2617_v12   ;;  %1525 = vperm.xlu0 %2511, %v2622_v13  }
  0x47   : > { %724 = vperm.xlu1 %2512, %v2202_v18   ;;  %719 = vperm.xlu0 %2511, %v669_v31   ;;  %v262_v18 = vld [vmem:[%s2778_s20 + $0x60] sm:$0xff] }
  0x48   : > { %v282_v40 = vmul.f32 %v2785_v36, %v262_v18  ;;  %v2231_v18 = vld [vmem:[%s3131_s3 + $0x18] sm:$0xf] }
  0x4b   : > { %734 = vperm.xlu1 %2512, %v2662_v20   ;;  %729 = vperm.xlu0 %2511, %v2648_v17  }
  0x4f   : > { %1540 = vperm.xlu1 %2512, %v2635_v15   ;;  %1535 = vperm.xlu0 %2511, %v2640_v16  }
  0x53   : > { %1550 = vperm.xlu1 %2512, %v2230_v32   ;;  %1545 = vperm.xlu0 %2511, %v2229_v33  }
  0x57   : > { %744 = vperm.xlu1 %2512, %v2686_v24   ;;  %739 = vperm.xlu0 %2511, %v2657_v19  }
  0x5b   : > { %754 = vperm.xlu1 %2512, %v2705_v27   ;;  %749 = vperm.xlu0 %2511, %v2681_v23  }
  0x5f   : > { %1718 = vperm.xlu1 %2512, %v2600_v8   ;;  %1713 = vperm.xlu0 %2511, %v2586_v5   ;;  %v1100_v5 = vmul.f32 0.2, %v1084_v58  ;;  %v312_v8 = vsel %vm296_vm2, %v288_v51, %v304_v60  ;;  %v2197_v51 = vld [vmem:[%s2778_s20 + $0x42] sm:$0xff] }
  0x60   : > { %v1276_v61 = vmul.f32 %v2197_v51, %v2785_v36 }
  0x63   : > { %1728 = vperm.xlu1 %2512, %v2712_v28   ;;  %1723 = vperm.xlu0 %2511, %v2595_v7   ;;  %v2823_v7 = vsel %vm298_vm1, %v290_v48, %v306_v57 }
  0x67   : > { %924 = vperm.xlu1 %2512, %v2565_v0   ;;  %919 = vperm.xlu0 %2511, %v2579_v4   ;;  %v1077_v0 = vmul.f32 %v2175_v56, %v2785_v36 }
  0x6b   : > { %934 = vperm.xlu1 %2512, %v2622_v13   ;;  %929 = vperm.xlu0 %2511, %v2574_v3   ;;  %v1099_v13 = vmul.f32 0.2, %v1083_v63 }
  0x6d   : > { %v2846_v37 = vsel %vm1091_vm6, %v1083_v63, %v1099_v13 }
  0x6f   : > { %1738 = vperm.xlu1 %2512, %v2719_v29   ;;  %1733 = vperm.xlu0 %2511, %v2724_v30  }
  0x73   : > { %1748 = vperm.xlu1 %2512, %v2251_v34   ;;  %1743 = vperm.xlu0 %2511, %v2771_v35   ;;  %v2195_v34 = vld [vmem:[%s2778_s20 + $0x22] sm:$0xff] }
  0x74   : > { %v1274_v47 = vmul.f32 %v2195_v34, %v2785_v36 }
  0x76   : > { %v1282_v60 = vadd.f32 %v2796_v42, %v1274_v47 }
  0x77   : > { %944 = vperm.xlu1 %2512, %v2640_v16   ;;  %939 = vperm.xlu0 %2511, %v2617_v12   ;;  %v2830_v12 = vsel %vm297_vm4, %v289_v53, %v305_v62  ;;  %v280_v16 = vmul.f32 %v2785_v36, %v260_v2  ;;  %v586_v53 = vsel %vm386_vm0, %v2691_v25, 0  ;;  %v2876_v25 = vld [vmem:[%s3131_s3 + $0x8] sm:$0xf]  ;;  %v1275_v62 = vmul.f32 %v2196_v52, %v2785_v36 }
  0x78   : > { %vm1290_vm14 = vcmp.ge.f32.partialorder %v1282_v60, 0.0 }
  0x79   : > { %v292_v39 = vadd.f32 %v2796_v42, %v280_v16  ;;  %v1284_v16 = vadd.f32 %v2796_v42, %v1276_v61 }
  0x7b   : > { %954 = vperm.xlu1 %2512, %v2229_v33   ;;  %949 = vperm.xlu0 %2511, %v2635_v15   ;;  %v1085_v15 = vadd.f32 %v2796_v42, %v1077_v0  ;;  %v308_v56 = vmul.f32 0.2, %v292_v39  ;;  %vm300_vm11 = vcmp.ge.f32.partialorder %v292_v39, 0.0  ;;  %vm1292_vm1 = vcmp.ge.f32.partialorder %v1284_v16, 0.0 }
  0x7d   : > { %v1101_v38 = vmul.f32 0.2, %v1085_v15  ;;  %vm1093_vm9 = vcmp.ge.f32.partialorder %v1085_v15, 0.0 }
  0x7f   : > { %1916 = vperm.xlu1 %2512, %v2662_v20   ;;  %1911 = vperm.xlu0 %2511, %v2648_v17   ;;  %v1102_v17 = vmul.f32 0.2, %v1086_v1  ;;  %v2865_v54 = vsel %vm1093_vm9, %v1085_v15, %v1101_v38  ;;  %v1298_v15 = vmul.f32 0.2, %v1282_v60  ;;  %v1300_v38 = vmul.f32 0.2, %v1284_v16 }
  0x81   : > { %v2909_v34 = vsel %vm1290_vm14, %v1282_v60, %v1298_v15 }
  0x83   : > { %1926 = vperm.xlu1 %2512, %v2686_v24   ;;  %1921 = vperm.xlu0 %2511, %v2657_v19   ;;  %v2836_v24 = vsel %vm1092_vm5, %v1084_v58, %v1100_v5 }
  0x86   : > { %v333_v3 = vpop.permute.xlu1 %332  ;;  %v323_v4 = vpop.permute.xlu0 %322 }
  0x87   : > { %1142 = vperm.xlu1 %2512, %v2724_v30   ;;  %1137 = vperm.xlu0 %2511, %v2712_v28   ;;  %v362_v19 = vmul.f32 %v333_v3, %v2823_v7  ;;  %v293_v28 = vadd.f32 %v2796_v42, %v281_v6  ;;  %v283_v30 = vmul.f32 %v2785_v36, %v263_v10 }
  0x88   : > { %v360_v31 = vmul.f32 %v323_v4, %v312_v8  ;;  %v2887_v3 = vsel %vm300_vm11, %v292_v39, %v308_v56  ;;  %v1380_v8 = vsel %vm386_vm0, %v2669_v21, 0  ;;  %v2199_v39 = vld [vmem:[%s2778_s20 + $0x62] sm:$0xff] }
  0x89   : > { %v295_v46 = vadd.f32 %v2796_v42, %v283_v30  ;;  %v309_v50 = vmul.f32 0.2, %v293_v28  ;;  %vm301_vm10 = vcmp.ge.f32.partialorder %v293_v28, 0.0  ;;  %v1278_v47 = vmul.f32 %v2199_v39, %v2785_v36  ;;  %v2201_v56 = vld [vmem:[%s2778_s20 + $0x82] sm:$0xff] }
  0x8a   : > { %v338_v20 = vpop.permute.xlu1 %337  ;;  %v328_v22 = vpop.permute.xlu0 %327 }
  0x8b   : > { %v363_v32 = vmul.f32 %v338_v20, %v2827_v9  ;;  %v361_v33 = vmul.f32 %v328_v22, %v2830_v12  ;;  %1152 = vperm.xlu1 %2512, %v2771_v35   ;;  %1147 = vperm.xlu0 %2511, %v2719_v29   ;;  %v2851_v29 = vsel %vm1094_vm7, %v1086_v1, %v1102_v17  ;;  %v311_v1 = vmul.f32 0.2, %v295_v46 }
  0x8c   : > { %v2885_v2 = vsel %vm301_vm10, %v293_v28, %v309_v50  ;;  %vm303_vm12 = vcmp.ge.f32.partialorder %v295_v46, 0.0  ;;  %v1283_v17 = vadd.f32 %v2796_v42, %v1275_v62  ;;  %v2920_v50 = vsel %vm1292_vm1, %v1284_v16, %v1300_v38 }
  0x8d   : > { %v369_v41 = vpack.c.bf16 %v363_v32, %v362_v19  ;;  %v368_v43 = vpack.c.bf16 %v361_v33, %v360_v31  ;;  %v2903_v21 = vsel %vm303_vm12, %v295_v46, %v311_v1  ;;  %v1280_v62 = vmul.f32 %v2201_v56, %v2785_v36 }
  0x8e   : > { %v1123_v35 = vpop.permute.xlu1 %1122  ;;  %v1118_v45 = vpop.permute.xlu0 %1117  ;;  %vm1291_vm2 = vcmp.ge.f32.partialorder %v1283_v17, 0.0 }
  0x8f   : > { %v1156_v48 = vmul.f32 %v1123_v35, %v2836_v24  ;;  %v1155_v49 = vmul.f32 %v1118_v45, %v2846_v37  ;;  %1936 = vperm.xlu1 %2512, %v2705_v27   ;;  %1931 = vperm.xlu0 %2511, %v2681_v23   ;;  %v294_v27 = vadd.f32 %v2796_v42, %v282_v40 }
  0x90   : > { %2329 = vmatprep.mubr.msk.bf16.mxu1 %vm373_vm8, %v368_v43  ;;  %v1273_v23 = vmul.f32 %v2194_v44, %v2785_v36  ;;  %v1299_v43 = vmul.f32 0.2, %v1283_v17  ;;  %v2198_v44 = vld [vmem:[%s2778_s20 + $0x52] sm:$0xff]  ;;  %v1288_v16 = vadd.f32 %v2796_v42, %v1280_v62 }
  0x91   : > { %2330 = vmatmul.mubr.msk.bf16.vlgmr.msra.gmra.mrb[0].mxu1 %vm373_vm8, %v369_v41  ;;  %v1163_v57 = vpack.c.bf16 %v1156_v48, %v1155_v49  ;;  %v310_v4 = vmul.f32 0.2, %v294_v27  ;;  %vm302_vm13 = vcmp.ge.f32.partialorder %v294_v27, 0.0  ;;  %v1277_v51 = vmul.f32 %v2198_v44, %v2785_v36 }
  0x92   : > { %v1133_v58 = vpop.permute.xlu1 %1132  ;;  %v1128_v59 = vpop.permute.xlu0 %1127  ;;  %2338 = vmatpush3.bf16.msra.mxu1 %v586_v53  ;;  %v1281_v5 = vadd.f32 %v2796_v42, %v1273_v23  ;;  %v2200_v23 = vld [vmem:[%s2778_s20 + $0x72] sm:$0xff]  ;;  %vm1296_vm6 = vcmp.ge.f32.partialorder %v1288_v16, 0.0 }
  0x93   : > { %v1158_v63 = vmul.f32 %v1133_v58, %v2851_v29  ;;  %v1157_v0 = vmul.f32 %v1128_v59, %v2865_v54  ;;  %1946 = vperm.xlu1 %2512, %v2272_v55   ;;  %1941 = vperm.xlu0 %2511, %v2700_v26   ;;  %v463_v26 = vld [vmem:[%s2778_s20 + $0x1] sm:$0xff]  ;;  %v2905_v22 = vsel %vm302_vm13, %v294_v27, %v310_v4 }
  0x94   : > { %2369 = vmatprep.mubr.msk.bf16.mxu0 %vm373_vm8, %v1163_v57  ;;  %2493 = vmatprep.subr.msk.bf16.mxu1 %vm386_vm0, %v2876_v25  ;;  %v1297_v28 = vmul.f32 0.2, %v1281_v5  ;;  %v479_v30 = vmul.f32 %v2785_v36, %v463_v26  ;;  %vm1289_vm15 = vcmp.ge.f32.partialorder %v1281_v5, 0.0  ;;  %v2927_v55 = vsel %vm1291_vm2, %v1283_v17, %v1299_v43  ;;  %v2944_v17 = vld [vmem:[%s3131_s3 + $0x1c] sm:$0xf] }
  0x95   : > { %v1164_v6 = vpack.c.bf16 %v1158_v63, %v1157_v0  ;;  %v1286_v58 = vadd.f32 %v2796_v42, %v1278_v47  ;;  %v1285_v61 = vadd.f32 %v2796_v42, %v1277_v51  ;;  %v1279_v1 = vmul.f32 %v2200_v23, %v2785_v36 }
  0x96   : > { %v348_v10 = vpop.permute.xlu1 %347  ;;  %v343_v13 = vpop.permute.xlu0 %342  ;;  %v2916_v35 = vsel %vm1289_vm15, %v1281_v5, %v1297_v28  ;;  %v487_v45 = vadd.f32 %v2796_v42, %v479_v30  ;;  %v1580_v26 = vsel %vm386_vm0, %v2231_v18, 0 }
  0x97   : > { %v365_v19 = vmul.f32 %v348_v10, %v2885_v2  ;;  %v364_v20 = vmul.f32 %v343_v13, %v2887_v3  ;;  %2370 = vmatmul.mubr.msk.bf16.vlgmr.msra.gmra.mrb[0].mxu0 %vm373_vm8, %v1164_v6  ;;  %v1302_v6 = vmul.f32 0.2, %v1286_v58  ;;  %vm1294_vm4 = vcmp.ge.f32.partialorder %v1286_v58, 0.0 }
  0x98   : > { %2378 = vmatpush3.bf16.msra.mxu0 %v1380_v8  ;;  %v503_v27 = vmul.f32 0.2, %v487_v45  ;;  %vm495_vm3 = vcmp.ge.f32.partialorder %v487_v45, 0.0  ;;  %v468_v8 = vld [vmem:[%s2778_s20 + $0x51] sm:$0xff]  ;;  %v1301_v15 = vmul.f32 0.2, %v1285_v61 }
  0x99   : > { %v370_v31 = vpack.c.bf16 %v365_v19, %v364_v20  ;;  %2498 = vmatprep.subr.msk.bf16.mxu0 %vm386_vm0, %v2231_v18  ;;  %vm1293_vm5 = vcmp.ge.f32.partialorder %v1285_v61, 0.0  ;;  %v1287_v18 = vadd.f32 %v2796_v42, %v1279_v1  ;;  %v484_v28 = vmul.f32 %v2785_v36, %v468_v8  ;;  %v661_v8 = vld [vmem:[%s2778_s20 + $0x2] sm:$0xff] }
  0x9a   : > { %v358_v32 = vpop.permute.xlu1 %357  ;;  %v353_v33 = vpop.permute.xlu0 %352  ;;  %v511_v4 = vsel %vm495_vm3, %v487_v45, %v503_v27  ;;  %v2955_v39 = vsel %vm1294_vm4, %v1286_v58, %v1302_v6 }
  0x9b   : > { %v367_v40 = vmul.f32 %v358_v32, %v2903_v21  ;;  %v366_v41 = vmul.f32 %v353_v33, %v2905_v22  ;;  %2333 = vmatprep.mubr.msk.bf16.mxu1 %vm373_vm8, %v370_v31  ;;  %v470_v31 = vld [vmem:[%s2778_s20 + $0x71] sm:$0xff]  ;;  %v469_v32 = vld [vmem:[%s2778_s20 + $0x61] sm:$0xff]  ;;  %vm1295_vm7 = vcmp.ge.f32.partialorder %v1287_v18, 0.0  ;;  %v1303_v44 = vmul.f32 0.2, %v1287_v18 }
  0x9c   : > { %v492_v45 = vadd.f32 %v2796_v42, %v484_v28  ;;  %v485_v47 = vmul.f32 %v2785_v36, %v469_v32 }
  0x9d   : > { %v371_v46 = vpack.c.bf16 %v367_v40, %v366_v41  ;;  %v1304_v40 = vmul.f32 0.2, %v1288_v16 }
  0x9e   : > { %v1321_v48 = vpop.permute.xlu1 %1320  ;;  %v1316_v49 = vpop.permute.xlu0 %1315  ;;  %v508_v58 = vmul.f32 0.2, %v492_v45  ;;  %vm500_vm9 = vcmp.ge.f32.partialorder %v492_v45, 0.0 }
  0x9f   : > { %v1354_v52 = vmul.f32 %v1321_v48, %v2909_v34  ;;  %v1353_v53 = vmul.f32 %v1316_v49, %v2916_v35  ;;  %2334 = vmatmul.mubr.msk.bf16.gmra.mrb[4].mxu1 %vm373_vm8, %v371_v46  ;;  %v486_v46 = vmul.f32 %v2785_v36, %v470_v31  ;;  %v784_v49 = vsel %vm386_vm0, %v2876_v25, 0 }
  0xa0   : > { %v2976_v23 = vsel %vm1296_vm6, %v1288_v16, %v1304_v40  ;;  %v2987_v1 = vsel %vm500_vm9, %v492_v45, %v508_v58  ;;  %v2222_v45 = vld [vmem:[%s2778_s20 + $0x90] sm:$0xff] }
  0xa1   : > { %v1361_v57 = vpack.c.bf16 %v1354_v52, %v1353_v53  ;;  %v2970_v53 = vld [vmem:[%s3131_s3 + $0xc] sm:$0xf]  ;;  %v494_v25 = vadd.f32 %v2796_v42, %v486_v46 }
  0xa2   : > { %v1331_v59 = vpop.permute.xlu1 %1330  ;;  %v1326_v60 = vpop.permute.xlu0 %1325 }
  0xa3   : > { %v1356_v63 = vmul.f32 %v1331_v59, %v2920_v50  ;;  %v1355_v0 = vmul.f32 %v1326_v60, %v2927_v55  ;;  %2379 = vmatprep.mubr.msk.bf16.mxu0 %vm373_vm8, %v1361_v57  ;;  %v2978_v57 = vsel %vm1295_vm7, %v1287_v18, %v1303_v44  ;;  %v493_v59 = vadd.f32 %v2796_v42, %v485_v47  ;;  %v2221_v47 = vld [vmem:[%s2778_s20 + $0x80] sm:$0xff] }
  0xa4   : > { %vm502_vm10 = vcmp.ge.f32.partialorder %v494_v25, 0.0  ;;  %v1479_v58 = vmul.f32 %v2221_v47, %v2785_v36 }
  0xa5   : > { %v1362_v5 = vpack.c.bf16 %v1356_v63, %v1355_v0  ;;  %vm501_vm11 = vcmp.ge.f32.partialorder %v493_v59, 0.0 }
  0xa6   : > { %v527_v10 = vpop.permute.xlu1 %526  ;;  %v522_v13 = vpop.permute.xlu0 %521 }
  0xa7   : > { %v560_v19 = vmul.f32 %v2846_v37, %v527_v10  ;;  %v559_v20 = vmul.f32 %v522_v13, %v511_v4  ;;  %2380 = vmatmul.mubr.msk.bf16.vlgmr.msra.gmra.mrb[0].mxu0 %vm373_vm8, %v1362_v5  ;;  %v2957_v37 = vsel %vm1293_vm5, %v1285_v61, %v1301_v15  ;;  %v510_v4 = vmul.f32 0.2, %v494_v25 }
  0xa8   : > { %2388 = vmatpush3.bf16.msra.mxu0 %v1580_v26  ;;  %v509_v5 = vmul.f32 0.2, %v493_v59 }
  0xa9   : > { %v567_v30 = vpack.c.bf16 %v560_v19, %v559_v20  ;;  %2499 = vmatprep.subr.msk.bf16.mxu0 %vm386_vm0, %v2944_v17  ;;  %v2993_v16 = vsel %vm502_vm10, %v494_v25, %v510_v4  ;;  %v677_v20 = vmul.f32 %v2785_v36, %v661_v8 }
  0xaa   : > { %v537_v33 = vpop.permute.xlu1 %536  ;;  %v532_v38 = vpop.permute.xlu0 %531  ;;  %v2995_v19 = vsel %vm501_vm11, %v493_v59, %v509_v5 }
  0xab   : > { %v562_v41 = vmul.f32 %v2865_v54, %v537_v33  ;;  %v561_v43 = vmul.f32 %v2836_v24, %v532_v38  ;;  %2339 = vmatprep.mubr.msk.bf16.mxu1 %vm373_vm8, %v567_v30  ;;  %v685_v33 = vadd.f32 %v2796_v42, %v677_v20 }
  0xad   : > { %v568_v48 = vpack.c.bf16 %v562_v41, %v561_v43  ;;  %v701_v46 = vmul.f32 0.2, %v685_v33  ;;  %vm693_vm12 = vcmp.ge.f32.partialorder %v685_v33, 0.0 }
  0xae   : > { %v1341_v51 = vpop.permute.xlu1 %1340  ;;  %v1336_v52 = vpop.permute.xlu0 %1335 }
  0xaf   : > { %v1358_v56 = vmul.f32 %v1341_v51, %v2955_v39  ;;  %v1357_v27 = vmul.f32 %v1336_v52, %v2957_v37  ;;  %2340 = vmatmul.mubr.msk.bf16.vlgmr.msra.gmra.mrb[0].mxu1 %vm373_vm8, %v568_v48  ;;  %v1480_v52 = vmul.f32 %v2222_v45, %v2785_v36  ;;  %v709_v25 = vsel %vm693_vm12, %v685_v33, %v701_v46 }
  0xb0   : > { %2348 = vmatpush3.bf16.msra.mxu1 %v784_v49 }
  0xb1   : > { %v1363_v60 = vpack.c.bf16 %v1358_v56, %v1357_v27  ;;  %2494 = vmatprep.subr.msk.bf16.mxu1 %vm386_vm0, %v2970_v53 }
  0xb2   : > { %v1351_v61 = vpop.permute.xlu1 %1350  ;;  %v1346_v62 = vpop.permute.xlu0 %1345 }
  0xb3   : > { %v1360_v63 = vmul.f32 %v1351_v61, %v2976_v23  ;;  %v1359_v0 = vmul.f32 %v1346_v62, %v2978_v57  ;;  %2383 = vmatprep.mubr.msk.bf16.mxu0 %vm373_vm8, %v1363_v60  ;;  %v1778_v60 = vsel %vm386_vm0, %v2944_v17, 0 }
  0xb5   : > { %v1364_v6 = vpack.c.bf16 %v1360_v63, %v1359_v0  ;;  %v1488_v63 = vadd.f32 %v2796_v42, %v1480_v52  ;;  %v3018_v0 = vld [vmem:[%s3131_s3 + $0x20] sm:$0xf] }
  0xb6   : > { %v547_v26 = vpop.permute.xlu1 %546  ;;  %v542_v10 = vpop.permute.xlu0 %541 }
  0xb7   : > { %v564_v13 = vmul.f32 %v547_v26, %v2987_v1  ;;  %v563_v15 = vmul.f32 %v2851_v29, %v542_v10  ;;  %2384 = vmatmul.mubr.msk.bf16.gmra.mrb[4].mxu0 %vm373_vm8, %v1364_v6  ;;  %v1487_v6 = vadd.f32 %v2796_v42, %v1479_v58  ;;  %vm1496_vm13 = vcmp.ge.f32.partialorder %v1488_v63, 0.0 }
  0xb8   : > { %v1504_v10 = vmul.f32 0.2, %v1488_v63 }
  0xb9   : > { %v569_v18 = vpack.c.bf16 %v564_v13, %v563_v15  ;;  %vm1495_vm14 = vcmp.ge.f32.partialorder %v1487_v6, 0.0 }
  0xba   : > { %v557_v28 = vpop.permute.xlu1 %556  ;;  %v552_v30 = vpop.permute.xlu0 %551 }
  0xbb   : > { %v566_v31 = vmul.f32 %v557_v28, %v2993_v16  ;;  %v565_v32 = vmul.f32 %v552_v30, %v2995_v19  ;;  %2343 = vmatprep.mubr.msk.bf16.mxu1 %vm373_vm8, %v569_v18  ;;  %v984_v18 = vsel %vm386_vm0, %v2970_v53, 0 }
  0xbd   : > { %v570_v38 = vpack.c.bf16 %v566_v31, %v565_v32  ;;  %v1512_v31 = vsel %vm1496_vm13, %v1488_v63, %v1504_v10  ;;  %v2243_v63 = vld [vmem:[%s2778_s20 + $0x91] sm:$0xff] }
  0xbe   : > { %v1521_v40 = vpop.permute.xlu1 %1520  ;;  %v1516_v41 = vpop.permute.xlu0 %1515 }
  0xbf   : > { %v1554_v43 = vmul.f32 %v1521_v40, %v2827_v9  ;;  %v1553_v44 = vmul.f32 %v1516_v41, %v2823_v7  ;;  %2344 = vmatmul.mubr.msk.bf16.gmra.mrb[4].mxu1 %vm373_vm8, %v570_v38 }
  0xc1   : > { %v1561_v48 = vpack.c.bf16 %v1554_v43, %v1553_v44 }
  0xc2   : > { %v1531_v49 = vpop.permute.xlu1 %1530  ;;  %v1526_v51 = vpop.permute.xlu0 %1525 }
  0xc3   : > { %v1556_v56 = vmul.f32 %v1531_v49, %v2885_v2  ;;  %v1555_v27 = vmul.f32 %v1526_v51, %v2887_v3  ;;  %2389 = vmatprep.mubr.msk.bf16.mxu0 %vm373_vm8, %v1561_v48 }
  0xc5   : > { %v1562_v59 = vpack.c.bf16 %v1556_v56, %v1555_v27 }
  0xc6   : > { %v725_v61 = vpop.permute.xlu1 %724  ;;  %v720_v62 = vpop.permute.xlu0 %719 }
  0xc7   : > { %v758_v4 = vmul.f32 %v2916_v35, %v725_v61  ;;  %v757_v5 = vmul.f32 %v720_v62, %v709_v25  ;;  %2390 = vmatmul.mubr.msk.bf16.vlgmr.msra.gmra.mrb[0].mxu0 %vm373_vm8, %v1562_v59  ;;  %v1503_v35 = vmul.f32 0.2, %v1487_v6 }
  0xc8   : > { %2398 = vmatpush3.bf16.msra.mxu0 %v1778_v60 }
  0xc9   : > { %v765_v8 = vpack.c.bf16 %v758_v4, %v757_v5  ;;  %2500 = vmatprep.subr.msk.bf16.mxu0 %vm386_vm0, %v3018_v0  ;;  %v3033_v38 = vsel %vm1495_vm14, %v1487_v6, %v1503_v35  ;;  %v2242_v4 = vld [vmem:[%s2778_s20 + $0x81] sm:$0xff] }
  0xca   : > { %v735_v17 = vpop.permute.xlu1 %734  ;;  %v730_v26 = vpop.permute.xlu0 %729  ;;  %v1677_v10 = vmul.f32 %v2242_v4, %v2785_v36 }
  0xcb   : > { %v760_v13 = vmul.f32 %v2927_v55, %v735_v17  ;;  %v759_v15 = vmul.f32 %v2909_v34, %v730_v26  ;;  %2349 = vmatprep.mubr.msk.bf16.mxu1 %vm373_vm8, %v765_v8  ;;  %v1678_v26 = vmul.f32 %v2243_v63, %v2785_v36 }
  0xcd   : > { %v766_v20 = vpack.c.bf16 %v760_v13, %v759_v15 }
  0xce   : > { %v1541_v28 = vpop.permute.xlu1 %1540  ;;  %v1536_v30 = vpop.permute.xlu0 %1535 }
  0xcf   : > { %v1558_v32 = vmul.f32 %v1541_v28, %v2903_v21  ;;  %v1557_v33 = vmul.f32 %v1536_v30, %v2905_v22  ;;  %2350 = vmatmul.mubr.msk.bf16.vlgmr.msra.gmra.mrb[0].mxu1 %vm373_vm8, %v766_v20 }
  0xd0   : > { %2358 = vmatpush3.bf16.msra.mxu1 %v984_v18  ;;  %v1685_v18 = vadd.f32 %v2796_v42, %v1677_v10 }
  0xd1   : > { %v1563_v40 = vpack.c.bf16 %v1558_v32, %v1557_v33  ;;  %2496 = vmatprep.subr.msk.bf16.mxu1 %vm386_vm0, %v2612_v11 }
  0xd2   : > { %v1551_v41 = vpop.permute.xlu1 %1550  ;;  %v1546_v43 = vpop.permute.xlu0 %1545  ;;  %vm1693_vm15 = vcmp.ge.f32.partialorder %v1685_v18, 0.0 }
  0xd3   : > { %v1560_v44 = vmul.f32 %v1551_v41, %v1512_v31  ;;  %v1559_v53 = vmul.f32 %v1546_v43, %v3033_v38  ;;  %2393 = vmatprep.mubr.msk.bf16.mxu0 %vm373_vm8, %v1563_v40 }
  0xd5   : > { %v1564_v45 = vpack.c.bf16 %v1560_v44, %v1559_v53 }
  0xd6   : > { %v745_v46 = vpop.permute.xlu1 %744  ;;  %v740_v47 = vpop.permute.xlu0 %739 }
  0xd7   : > { %v762_v48 = vmul.f32 %v2957_v37, %v745_v46  ;;  %v761_v49 = vmul.f32 %v2920_v50, %v740_v47  ;;  %2394 = vmatmul.mubr.msk.bf16.gmra.mrb[4].mxu0 %vm373_vm8, %v1564_v45 }
  0xd9   : > { %v767_v51 = vpack.c.bf16 %v762_v48, %v761_v49 }
  0xda   : > { %v755_v11 = vpop.permute.xlu1 %754  ;;  %v750_v52 = vpop.permute.xlu0 %749 }
  0xdb   : > { %v764_v56 = vmul.f32 %v2978_v57, %v755_v11  ;;  %v763_v27 = vmul.f32 %v2955_v39, %v750_v52  ;;  %2353 = vmatprep.mubr.msk.bf16.mxu1 %vm373_vm8, %v767_v51 }
  0xdd   : > { %v768_v58 = vpack.c.bf16 %v764_v56, %v763_v27 }
  0xde   : > { %v1719_v25 = vpop.permute.xlu1 %1718  ;;  %v1714_v59 = vpop.permute.xlu0 %1713 }
  0xdf   : > { %v1752_v60 = vmul.f32 %v1719_v25, %v2865_v54  ;;  %v1751_v61 = vmul.f32 %v1714_v59, %v2836_v24  ;;  %2354 = vmatmul.mubr.msk.bf16.gmra.mrb[4].mxu1 %vm373_vm8, %v768_v58  ;;  %v1976_v24 = vsel %vm386_vm0, %v3018_v0, 0 }
  0xe1   : > { %v1759_v62 = vpack.c.bf16 %v1752_v60, %v1751_v61 }
  0xe2   : > { %v1729_v5 = vpop.permute.xlu1 %1728  ;;  %v1724_v6 = vpop.permute.xlu0 %1723 }
  0xe3   : > { %v1754_v8 = vmul.f32 %v1729_v5, %v2987_v1  ;;  %v1753_v17 = vmul.f32 %v1724_v6, %v2851_v29  ;;  %2399 = vmatprep.mubr.msk.bf16.mxu0 %vm373_vm8, %v1759_v62  ;;  %v1686_v29 = vadd.f32 %v2796_v42, %v1678_v26  ;;  %v2264_v62 = vld [vmem:[%s2778_s20 + $0x92] sm:$0xff] }
  0xe5   : > { %v1760_v54 = vpack.c.bf16 %v1754_v8, %v1753_v17  ;;  %v1702_v32 = vmul.f32 0.2, %v1686_v29  ;;  %vm1694_vm0 = vcmp.ge.f32.partialorder %v1686_v29, 0.0 }
  0xe6   : > { %v925_v13 = vpop.permute.xlu1 %924  ;;  %v920_v15 = vpop.permute.xlu0 %919 }
  0xe7   : > { %v958_v35 = vmul.f32 %v925_v13, %v2823_v7  ;;  %v957_v20 = vmul.f32 %v920_v15, %v2830_v12  ;;  %2400 = vmatmul.mubr.msk.bf16.vlgmr.msra.gmra.mrb[0].mxu0 %vm373_vm8, %v1760_v54  ;;  %v1701_v7 = vmul.f32 0.2, %v1685_v18  ;;  %v1710_v43 = vsel %vm1694_vm0, %v1686_v29, %v1702_v32 }
  0xe8   : > { %2408 = vmatpush3.bf16.msra.mxu0 %v1976_v24 }
  0xe9   : > { %v965_v28 = vpack.c.bf16 %v958_v35, %v957_v20  ;;  %v1709_v44 = vsel %vm1693_vm15, %v1685_v18, %v1701_v7 }
  0xea   : > { %v935_v30 = vpop.permute.xlu1 %934  ;;  %v930_v36 = vpop.permute.xlu0 %929 }
  0xeb   : > { %v960_v31 = vmul.f32 %v935_v30, %v2887_v3  ;;  %v959_v0 = vmul.f32 %v930_v36, %v2827_v9  ;;  %2359 = vmatprep.mubr.msk.bf16.mxu1 %vm373_vm8, %v965_v28 }
  0xed   : > { %v966_v33 = vpack.c.bf16 %v960_v31, %v959_v0 }
  0xee   : > { %v1739_v12 = vpop.permute.xlu1 %1738  ;;  %v1734_v40 = vpop.permute.xlu0 %1733 }
  0xef   : > { %v1756_v41 = vmul.f32 %v1739_v12, %v2993_v16  ;;  %v1755_v42 = vmul.f32 %v1734_v40, %v2995_v19  ;;  %2360 = vmatmul.mubr.msk.bf16.vlgmr.msra.gmra.mrb[0].mxu1 %vm373_vm8, %v966_v33  ;;  %v248_v40 = vld [vmem:[%s239_s21] sm:$0xff] }
  0xf0   : > { %2418 = vmatpush3.bf16.msra.mxu1 %v2630_v14 }
  0xf1   : > { %v1761_v9 = vpack.c.bf16 %v1756_v41, %v1755_v42  ;;  %v251_v41 = vld [vmem:[%s239_s21 + $0x18] sm:$0xff] }
  0xf2   : > { %v1749_v3 = vpop.permute.xlu1 %1748  ;;  %v1744_v53 = vpop.permute.xlu0 %1743 }
  0xf3   : > { %v1758_v45 = vmul.f32 %v1749_v3, %v1710_v43  ;;  %v1757_v46 = vmul.f32 %v1744_v53, %v1709_v44  ;;  %2403 = vmatprep.mubr.msk.bf16.mxu0 %vm373_vm8, %v1761_v9  ;;  %v249_v43 = vld [vmem:[%s239_s21 + $0x8] sm:$0xff] }
  0xf5   : > { %v1762_v47 = vpack.c.bf16 %v1758_v45, %v1757_v46 }
  0xf6   : > { %v945_v48 = vpop.permute.xlu1 %944  ;;  %v940_v49 = vpop.permute.xlu0 %939 }
  0xf7   : > { %v962_v51 = vmul.f32 %v945_v48, %v2905_v22  ;;  %v961_v11 = vmul.f32 %v940_v49, %v2885_v2  ;;  %2404 = vmatmul.mubr.msk.bf16.gmra.mrb[4].mxu0 %vm373_vm8, %v1762_v47 }
  0xf9   : > { %v967_v52 = vpack.c.bf16 %v962_v51, %v961_v11 }
  0xfa   : > { %v955_v56 = vpop.permute.xlu1 %954  ;;  %v950_v14 = vpop.permute.xlu0 %949 }
  0xfb   : > { %v964_v27 = vmul.f32 %v3033_v38, %v955_v56  ;;  %v963_v58 = vmul.f32 %v950_v14, %v2903_v21  ;;  %2363 = vmatprep.mubr.msk.bf16.mxu1 %vm373_vm8, %v967_v52  ;;  %v2513_v21 = vld [vmem:[%s3130_s2] ss:$0 sm:$0xff] }
  0xfc   : > { %v1876_v6 = vmul.f32 %v2513_v21, %v2264_v62 }
  0xfd   : > { %v968_v25 = vpack.c.bf16 %v964_v27, %v963_v58  ;;  %v254_v27 = vld [vmem:[%s239_s21 + $0x30] sm:$0xff]  ;;  %v252_v58 = vld [vmem:[%s239_s21 + $0x20] sm:$0xff] }
  0xfe   : > { %v1917_v59 = vpop.permute.xlu1 %1916  ;;  %v1912_v60 = vpop.permute.xlu0 %1911 }
  0xff   : > { %v1950_v61 = vmul.f32 %v1917_v59, %v2927_v55  ;;  %v1949_v22 = vmul.f32 %v1912_v60, %v2909_v34  ;;  %2364 = vmatmul.mubr.msk.bf16.gmra.mrb[4].mxu1 %vm373_vm8, %v968_v25  ;;  %v255_v25 = vld [vmem:[%s239_s21 + $0x38] sm:$0xff]  ;;  %v253_v60 = vld [vmem:[%s239_s21 + $0x28] sm:$0xff] }
 0x101   : > { %v1957_v2 = vpack.c.bf16 %v1950_v61, %v1949_v22 }
 0x102   : > { %v1927_v63 = vpop.permute.xlu1 %1926  ;;  %v1922_v4 = vpop.permute.xlu0 %1921 }
 0x103   : > { %v1952_v5 = vmul.f32 %v1927_v63, %v2957_v37  ;;  %v1951_v38 = vmul.f32 %v1922_v4, %v2920_v50  ;;  %2409 = vmatprep.mubr.msk.bf16.mxu0 %vm373_vm8, %v1957_v2  ;;  %v2514_v50 = vld [vmem:[%s3130_s2 + $0x1] ss:$0 sm:$0xff] }
 0x104   : > { %v1884_v37 = vadd.f32 %v2514_v50, %v1876_v6 }
 0x105   : > { %v1958_v55 = vpack.c.bf16 %v1952_v5, %v1951_v38 }
 0x106   : > { %v1143_v8 = vpop.permute.xlu1 %1142  ;;  %v1138_v34 = vpop.permute.xlu0 %1137  ;;  %v1900_v35 = vmul.f32 0.2, %v1884_v37  ;;  %vm1892_vm1 = vcmp.ge.f32.partialorder %v1884_v37, 0.0 }
 0x107   : > { %v1160_v17 = vmul.f32 %v1143_v8, %v2995_v19  ;;  %v1159_v26 = vmul.f32 %v1138_v34, %v2987_v1  ;;  %2410 = vmatmul.mubr.msk.bf16.vlgmr.msra.gmra.mrb[0].mxu0 %vm373_vm8, %v1958_v55 }
 0x108   : > { %v1908_v28 = vsel %vm1892_vm1, %v1884_v37, %v1900_v35 }
 0x109   : > { %v1165_v10 = vpack.c.bf16 %v1160_v17, %v1159_v26 }
 0x10a   : > { %v1153_v54 = vpop.permute.xlu1 %1152  ;;  %v1148_v24 = vpop.permute.xlu0 %1147 }
 0x10b   : > { %v1162_v13 = vmul.f32 %v1709_v44, %v1153_v54  ;;  %v1161_v15 = vmul.f32 %v1148_v24, %v2993_v16  ;;  %2373 = vmatprep.mubr.msk.bf16.mxu1 %vm373_vm8, %v1165_v10 }
 0x10d   : > { %v1166_v20 = vpack.c.bf16 %v1162_v13, %v1161_v15 }
 0x10e   : > { %v1937_v19 = vpop.permute.xlu1 %1936  ;;  %v1932_v1 = vpop.permute.xlu0 %1931 }
 0x10f   : > { %v1954_v29 = vmul.f32 %v1937_v19, %v2978_v57  ;;  %v1953_v18 = vmul.f32 %v1932_v1, %v2955_v39  ;;  %2374 = vmatmul.mubr.msk.bf16.vlgmr.msra.gmra.mrb[4].mxu1 %vm373_vm8, %v1166_v20  ;;  %v250_v39 = vld [vmem:[%s239_s21 + $0x10] sm:$0xff] }
 0x111   : > { %v1959_v30 = vpack.c.bf16 %v1954_v29, %v1953_v18 }
 0x112   : > { %v1947_v36 = vpop.permute.xlu1 %1946  ;;  %v1942_v31 = vpop.permute.xlu0 %1941 }
 0x113   : > { %v1956_v0 = vmul.f32 %v1947_v36, %v1908_v28  ;;  %v1955_v16 = vmul.f32 %v1942_v31, %v2976_v23  ;;  %2413 = vmatprep.mubr.msk.bf16.mxu0 %vm373_vm8, %v1959_v30 }
 0x115   : > { %v1960_v32 = vpack.c.bf16 %v1956_v0, %v1955_v16 }
 0x117   : > { %2414 = vmatmul.mubr.msk.bf16.gmra.mrb[4].mxu0 %vm373_vm8, %v1960_v32 }
 0x1c2   : > { %v2361_v7 = vpop.f32.mrb[0].mxu1 }
 0x1c3   : > { %v1020_v33 = vpop.f32.mrb[1].mxu1  ;;  %v2419_v42 = vadd.f32 %v2361_v7, %v250_v39 }
 0x1c4   : > { %v2362_v57 = vpop.f32.mrb[2].mxu1  ;;  %v2421_v23 = vadd.f32 %v1020_v33, %v248_v40 }
 0x1c5   : > { %v1023_v12 = vpop.f32.mrb[3].mxu1  ;;  %v2423_v9 = vadd.f32 %v2362_v57, %v251_v41 }
 0x1c6   : > { %v2425_v45 = vadd.f32 %v1023_v12, %v249_v43 }
 0x1da   : > { %v2411_v44 = vpop.f32.mrb[0].mxu0 }
 0x1db   : > { %v2420_v3 = vadd.f32 %v2419_v42, %v2411_v44  ;;  %v2012_v53 = vpop.f32.mrb[1].mxu0 }
 0x1dc   : > { %v2422_v46 = vadd.f32 %v2421_v23, %v2012_v53  ;;  %v2412_v47 = vpop.f32.mrb[2].mxu0 }
 0x1dd   : > { %2053 = vst.msk [vmem:[%s3107_s24 + $0x10] sm:$0xff] %vm373_vm8, %v2420_v3  ;;  %v2424_v48 = vadd.f32 %v2423_v9, %v2412_v47  ;;  %v2015_v49 = vpop.f32.mrb[3].mxu0 }
 0x1de   : > { %2051 = vst.msk [vmem:[%s3107_s24] sm:$0xff] %vm373_vm8, %v2422_v46  ;;  %v2426_v51 = vadd.f32 %v2425_v45, %v2015_v49 }
 0x1df   : > { %2054 = vst.msk [vmem:[%s3107_s24 + $0x18] sm:$0xff] %vm373_vm8, %v2424_v48 }
 0x1e0   : > { %2052 = vst.msk [vmem:[%s3107_s24 + $0x8] sm:$0xff] %vm373_vm8, %v2426_v51 }
 0x1e2   : > { %v2375_v11 = vpop.f32.mrb[4].mxu1 }
 0x1e3   : > { %v1234_v52 = vpop.f32.mrb[5].mxu1  ;;  %v2427_v59 = vadd.f32 %v2375_v11, %v254_v27 }
 0x1e4   : > { %v2376_v56 = vpop.f32.mrb[6].mxu1  ;;  %v2429_v61 = vadd.f32 %v1234_v52, %v252_v58 }
 0x1e5   : > { %v1237_v14 = vpop.f32.mrb[7].mxu1  ;;  %v2431_v2 = vadd.f32 %v2376_v56, %v255_v25 }
 0x1e6   : > { %v2433_v4 = vadd.f32 %v1237_v14, %v253_v60 }
 0x1ea   : > { %v2415_v22 = vpop.f32.mrb[4].mxu0 }
 0x1eb   : > { %v2428_v62 = vadd.f32 %v2427_v59, %v2415_v22  ;;  %v2028_v63 = vpop.f32.mrb[5].mxu0 }
 0x1ec   : > { %v2430_v5 = vadd.f32 %v2429_v61, %v2028_v63  ;;  %v2416_v38 = vpop.f32.mrb[6].mxu0 }
 0x1ed   : > { %2057 = vst.msk [vmem:[%s3107_s24 + $0x30] sm:$0xff] %vm373_vm8, %v2428_v62  ;;  %v2432_v21 = vadd.f32 %v2431_v2, %v2416_v38  ;;  %v2031_v6 = vpop.f32.mrb[7].mxu0 }
 0x1ee   : > { %2055 = vst.msk [vmem:[%s3107_s24 + $0x20] sm:$0xff] %vm373_vm8, %v2430_v5  ;;  %v2434_v55 = vadd.f32 %v2433_v4, %v2031_v6 }
 0x1ef   : > { %2058 = vst.msk [vmem:[%s3107_s24 + $0x38] sm:$0xff] %vm373_vm8, %v2432_v21 }
 0x1f0   : > { %2056 = vst.msk [vmem:[%s3107_s24 + $0x28] sm:$0xff] %vm373_vm8, %v2434_v55 }
 0x1f1 PF: > { %s15_s18 = sadd.s32 1, %s2521_s18  }
 0x1f2   : > { %p12_p4 = scmp.ge.s32.totalorder %s15_s18, 4  }
 0x1f4   :  { %14 = sbr.rel (!%p12_p4) target bundleno = 1 (0x1), region = 85 }

// kernel: residual_block_forward.4
= control target key start
LH: loop header
LB: loop body
LE: loop exit
PB: predicated region body
PF: predicated region fallthrough
CT: control target
= control target key end

     0   :  { %s4034_s24 = smov 0   ;;  %s5450_s0 = inlined_call_operand.vmem [shape: f32[2,36,9,4], index: 0, kind: input, shape index: {}]   ;;  %s5451_s1 = inlined_call_operand.vmem [shape: f32[36,9,1], index: 1, kind: input, shape index: {}]   ;;  %s5452_s2 = inlined_call_operand.vmem [shape: f32[4,4], index: 2, kind: input, shape index: {}]   ;;  %s5453_s3 = inlined_call_operand.vmem [shape: bf16[9,4,8], index: 3, kind: input, shape index: {}]   ;;  %s5454_s4 = inlined_call_operand.vmem [shape: bf16[9,4,8], index: 4, kind: input, shape index: {}]   ;;  %s5455_s5 = inlined_call_operand.vmem [shape: f32[2,8,8,8], index: 5, kind: output, shape index: {0}]   ;;  %s5456_s6 = inlined_call_operand.vmem [shape: f32[2,8,8,8], index: 6, kind: output, shape index: {1}]   ;;  %s5457_s7 = inlined_call_operand.vmem [shape: f32[2,2,8], index: 7, kind: output, shape index: {2}]  }
   0x1 LB: > { %s3334_s25 = sadd.s32 4294967295, %s3991_s24   ;;  %p3338_p0 = scmp.ge.s32.totalorder %s3991_s24, 1  ;;  %s3991_s24 = sphi %s4034_s24, %s18_s24  }
   0x2   : > { %p242_p1 = scmp.lt.s32.totalorder %s3991_s24, 3 }
   0x4   : > { %p243_p2 = pnand %p3338_p0, %p242_p1 }
   0x6   : > { %246 = sbr.rel (%p243_p2) target bundleno = 527 (0x20f), region = 40 }
   0xd   : > { %v4045_v0 = vld [vmem:[%s5451_s1 + $0xb0] sm:$0xff]  ;;  %v3993_v2 = vmov 0   ;;  %v4054_v3 = vld [vmem:[%s5451_s1 + $0xc0] sm:$0xff]  ;;  %vm562_vm0 = vcmask 1041408   ;;  %p283_p3 = scmp.lt.s32.totalorder %s3334_s25, 1 }
   0xe   : > { %v3357_v1 = vld [vmem:[%s5451_s1 + $0x90] sm:$0xff]  ;;  %3980 = vset.pattern.permute.xlu1 %v3993_v2  ;;  %3979 = vset.pattern.permute.xlu0 %v3993_v2  ;;  %v4059_v4 = vld [vmem:[%s5451_s1 + $0xa0] sm:$0xff] }
   0xf   : > { %507 = vperm.xlu1 %3980, %v4045_v0   ;;  %497 = vperm.xlu0 %3979, %v3357_v1   ;;  %v4066_v5 = vld [vmem:[%s5451_s1 + $0xe0] sm:$0xff]  ;;  %v4071_v6 = vld [vmem:[%s5451_s1 + $0xd0] sm:$0xff]  ;;  %s5517_s25 = smov (!%p283_p3, %s3334_s25), 1 }
  0x10   : > { %v4078_v7 = vld [vmem:[%s5451_s1 + $0x100] sm:$0xff]  ;;  %v4083_v8 = vld [vmem:[%s5451_s1 + $0xf0] sm:$0xff]  ;;  %s3969_s20 = smul.u32 576, %s5517_s25  ;;  %s3344_s23 = sshll.u32 %s5517_s25, 1 }
  0x11   : > { %v4090_v9 = vld [vmem:[%s5451_s1 + $0x10] sm:$0xff]  ;;  %v315_v10 = vld [vmem:[%s5451_s1] sm:$0xff]  ;;  %s301_s28 = scalar_lea.vmem %s5457_s7, %s3344_s23 }
  0x12   : > { %v4099_v11 = vld [vmem:[%s5451_s1 + $0x30] sm:$0xff]  ;;  %v4104_v12 = vld [vmem:[%s5451_s1 + $0x20] sm:$0xff]  ;;  %s4253_s29 = scalar_lea.vmem %s5450_s0, %s3969_s20 }
  0x13   : > { %512 = vperm.xlu1 %3980, %v4054_v3   ;;  %502 = vperm.xlu0 %3979, %v4059_v4   ;;  %v3374_v13 = vld [vmem:[%s5454_s4 + $0x2] sm:$0x3]  ;;  %v4117_v15 = vld [vmem:[%s5454_s4] sm:$0x3]  ;;  %v4125_v17 = vld [vmem:[%s5451_s1 + $0x50] sm:$0xff] }
  0x14   : > { %v3365_v14 = vld [vmem:[%s5453_s3 + $0x2] sm:$0x3]  ;;  %3953 = vmatprep.subr.msk.bf16.mxu1 %vm562_vm0, %v3374_v13  ;;  %v778_v16 = vsel %vm562_vm0, %v3374_v13, 0  ;;  %v4138_v20 = vld [vmem:[%s5453_s3] sm:$0x3]  ;;  %v4145_v21 = vld [vmem:[%s5451_s1 + $0x70] sm:$0xff] }
  0x15   : > { %3951 = vmatprep.subr.msk.bf16.mxu0 %vm562_vm0, %v3365_v14  ;;  %v4130_v18 = vld [vmem:[%s5451_s1 + $0x40] sm:$0xff]  ;;  %3664 = vmatpush3.bf16.msra.mxu1 %v778_v16  ;;  %v564_v19 = vsel %vm562_vm0, %v3365_v14, 0  ;;  %v4159_v23 = vld [vmem:[%s5451_s1 + $0x11] sm:$0xff] }
  0x16   : > { %3954 = vmatprep.subr.msk.bf16.mxu1 %vm562_vm0, %v4117_v15  ;;  %3644 = vmatpush3.bf16.msra.mxu0 %v564_v19  ;;  %v4150_v22 = vld [vmem:[%s5451_s1 + $0x60] sm:$0xff]  ;;  %v4168_v25 = vld [vmem:[%s5451_s1 + $0x31] sm:$0xff] }
  0x17   : > { %522 = vperm.xlu1 %3980, %v4066_v5   ;;  %517 = vperm.xlu0 %3979, %v4071_v6   ;;  %v933_v24 = vld [vmem:[%s5451_s1 + $0x1] sm:$0xff]  ;;  %v4180_v27 = vld [vmem:[%s5451_s1 + $0x51] sm:$0xff]  ;;  %v4294_v61 = vld [vmem:[%s5452_s2] ss:$0 sm:$0xff] }
  0x18   : > { %3952 = vmatprep.subr.msk.bf16.mxu0 %vm562_vm0, %v4138_v20  ;;  %v4173_v26 = vld [vmem:[%s5451_s1 + $0x21] sm:$0xff]  ;;  %v4192_v29 = vld [vmem:[%s5451_s1 + $0x71] sm:$0xff] }
  0x19   : > { %v4185_v28 = vld [vmem:[%s5451_s1 + $0x41] sm:$0xff]  ;;  %v3402_v31 = vld [vmem:[%s5451_s1 + $0x130] sm:$0xff] }
  0x1a   : > { %v4197_v30 = vld [vmem:[%s5451_s1 + $0x61] sm:$0xff]  ;;  %v3404_v33 = vld [vmem:[%s5451_s1 + $0x150] sm:$0xff] }
  0x1b   : > { %532 = vperm.xlu1 %3980, %v4078_v7   ;;  %527 = vperm.xlu0 %3979, %v4083_v8   ;;  %v3401_v32 = vld [vmem:[%s5451_s1 + $0x120] sm:$0xff]  ;;  %v3406_v35 = vld [vmem:[%s5451_s1 + $0x170] sm:$0xff] }
  0x1c   : > { %v3403_v34 = vld [vmem:[%s5451_s1 + $0x140] sm:$0xff]  ;;  %v3408_v37 = vld [vmem:[%s5451_s1 + $0x190] sm:$0xff] }
  0x1d   : > { %v3405_v36 = vld [vmem:[%s5451_s1 + $0x160] sm:$0xff]  ;;  %v3427_v40 = vld [vmem:[%s5451_s1 + $0x1b0] sm:$0xff] }
  0x1e   : > { %v3407_v38 = vld [vmem:[%s5451_s1 + $0x180] sm:$0xff]  ;;  %v3429_v42 = vld [vmem:[%s5451_s1 + $0x1d0] sm:$0xff] }
  0x1f   : > { %354 = vperm.xlu1 %3980, %v4090_v9   ;;  %349 = vperm.xlu0 %3979, %v315_v10   ;;  %v3428_v39 = vld [vmem:[%s5451_s1 + $0x1c0] sm:$0xff]  ;;  %v3431_v44 = vld [vmem:[%s5451_s1 + $0x1f0] sm:$0xff] }
  0x20   : > { %v3430_v41 = vld [vmem:[%s5451_s1 + $0x1e0] sm:$0xff]  ;;  %v3433_v46 = vld [vmem:[%s5451_s1 + $0x210] sm:$0xff] }
  0x21   : > { %v3432_v43 = vld [vmem:[%s5451_s1 + $0x200] sm:$0xff]  ;;  %v3351_v48 = vld [vmem:[%s4253_s29 + $0xb0] sm:$0xff] }
  0x22   : > { %v3434_v45 = vld [vmem:[%s5451_s1 + $0x220] sm:$0xff]  ;;  %v3349_v49 = vld [vmem:[%s4253_s29 + $0x90] sm:$0xff] }
  0x23   : > { %364 = vperm.xlu1 %3980, %v4099_v11   ;;  %359 = vperm.xlu0 %3979, %v4104_v12   ;;  %v4264_v47 = vld [vmem:[%s5452_s2 + $0x2] ss:$0 sm:$0xff]  ;;  %v3454_v51 = vld [vmem:[%s5451_s1 + $0x131] sm:$0xff]  ;;  %v4280_v55 = vld [vmem:[%s5452_s2 + $0x3] ss:$0 sm:$0xff] }
  0x24   : > { %v3352_v50 = vld [vmem:[%s4253_s29 + $0xc0] sm:$0xff]  ;;  %v713_v53 = vmul.f32 %v3351_v48, %v4264_v47  ;;  %v711_v54 = vmul.f32 %v3349_v49, %v4264_v47  ;;  %v3456_v58 = vld [vmem:[%s5451_s1 + $0x151] sm:$0xff] }
  0x25   : > { %v3453_v52 = vld [vmem:[%s5451_s1 + $0x121] sm:$0xff]  ;;  %v714_v56 = vmul.f32 %v3352_v50, %v4264_v47  ;;  %v3353_v10 = vld [vmem:[%s4253_s29 + $0xd0] sm:$0xff] }
  0x26   : > { %v3350_v57 = vld [vmem:[%s4253_s29 + $0xa0] sm:$0xff]  ;;  %v721_v62 = vadd.f32 %v4280_v55, %v713_v53  ;;  %v719_v63 = vadd.f32 %v4280_v55, %v711_v54  ;;  %v3458_v16 = vld [vmem:[%s5451_s1 + $0x171] sm:$0xff] }
  0x27   : > { %374 = vperm.xlu1 %3980, %v4125_v17   ;;  %369 = vperm.xlu0 %3979, %v4130_v18   ;;  %v3455_v59 = vld [vmem:[%s5451_s1 + $0x141] sm:$0xff]  ;;  %v722_v1 = vadd.f32 %v4280_v55, %v714_v56  ;;  %v712_v2 = vmul.f32 %v3350_v57, %v4264_v47  ;;  %v308_v56 = vld [vmem:[%s4253_s29 + $0x10] sm:$0xff] }
  0x28   : > { %v3354_v60 = vld [vmem:[%s4253_s29 + $0xe0] sm:$0xff]  ;;  %vm729_vm1 = vcmp.ge.f32.partialorder %v721_v62, 0.0  ;;  %vm727_vm2 = vcmp.ge.f32.partialorder %v719_v63, 0.0 }
  0x29   : > { %v3356_v13 = vld [vmem:[%s4253_s29 + $0x100] sm:$0xff]  ;;  %v716_v14 = vmul.f32 %v3354_v60, %v4264_v47  ;;  %vm730_vm3 = vcmp.ge.f32.partialorder %v722_v1, 0.0 }
  0x2a   : > { %v3457_v19 = vld [vmem:[%s5451_s1 + $0x161] sm:$0xff] }
  0x2b   : > { %384 = vperm.xlu1 %3980, %v4145_v21   ;;  %379 = vperm.xlu0 %3979, %v4150_v22  }
  0x2f   : > { %964 = vperm.xlu1 %3980, %v4159_v23   ;;  %959 = vperm.xlu0 %3979, %v933_v24   ;;  %v481_v24 = vmul.f32 %v3351_v48, %v4294_v61 }
  0x33   : > { %974 = vperm.xlu1 %3980, %v4168_v25   ;;  %969 = vperm.xlu0 %3979, %v4173_v26  }
  0x37   : > { %984 = vperm.xlu1 %3980, %v4180_v27   ;;  %979 = vperm.xlu0 %3979, %v4185_v28  }
  0x3b   : > { %994 = vperm.xlu1 %3980, %v4192_v29   ;;  %989 = vperm.xlu0 %3979, %v4197_v30  }
  0x3f   : > { %1282 = vperm.xlu1 %3980, %v3402_v31   ;;  %1277 = vperm.xlu0 %3979, %v3401_v32   ;;  %v479_v31 = vmul.f32 %v3349_v49, %v4294_v61  ;;  %v482_v32 = vmul.f32 %v3352_v50, %v4294_v61 }
  0x43   : > { %1292 = vperm.xlu1 %3980, %v3404_v33   ;;  %1287 = vperm.xlu0 %3979, %v3403_v34   ;;  %v480_v33 = vmul.f32 %v3350_v57, %v4294_v61  ;;  %v4316_v34 = vld [vmem:[%s5452_s2 + $0x1] ss:$0 sm:$0xff] }
  0x44   : > { %v4334_v48 = vadd.f32 %v4316_v34, %v479_v31  ;;  %v4337_v49 = vadd.f32 %v4316_v34, %v482_v32  ;;  %v307_v57 = vld [vmem:[%s4253_s29] sm:$0xff] }
  0x45   : > { %v4340_v50 = vadd.f32 %v4316_v34, %v480_v33 }
  0x47   : > { %1302 = vperm.xlu1 %3980, %v3406_v35   ;;  %1297 = vperm.xlu0 %3979, %v3405_v36   ;;  %v737_v35 = vmul.f32 0.2, %v721_v62  ;;  %v735_v36 = vmul.f32 0.2, %v719_v63 }
  0x4b   : > { %1312 = vperm.xlu1 %3980, %v3408_v37   ;;  %1307 = vperm.xlu0 %3979, %v3407_v38   ;;  %v715_v37 = vmul.f32 %v3353_v10, %v4264_v47  ;;  %v718_v38 = vmul.f32 %v3356_v13, %v4264_v47 }
  0x4d   : > { %v723_v53 = vadd.f32 %v4280_v55, %v715_v37  ;;  %v726_v54 = vadd.f32 %v4280_v55, %v718_v38 }
  0x4f   : > { %1600 = vperm.xlu1 %3980, %v3428_v39   ;;  %1595 = vperm.xlu0 %3979, %v3427_v40   ;;  %v738_v39 = vmul.f32 0.2, %v722_v1  ;;  %v720_v40 = vadd.f32 %v4280_v55, %v712_v2  ;;  %v486_v2 = vmul.f32 %v3356_v13, %v4294_v61  ;;  %vm731_vm6 = vcmp.ge.f32.partialorder %v723_v53, 0.0 }
  0x50   : > { %v739_v31 = vmul.f32 0.2, %v723_v53  ;;  %vm734_vm7 = vcmp.ge.f32.partialorder %v726_v54, 0.0  ;;  %v742_v32 = vmul.f32 0.2, %v726_v54 }
  0x51   : > { %vm728_vm4 = vcmp.ge.f32.partialorder %v720_v40, 0.0 }
  0x53   : > { %1610 = vperm.xlu1 %3980, %v3430_v41   ;;  %1605 = vperm.xlu0 %3979, %v3429_v42   ;;  %v484_v41 = vmul.f32 %v3354_v60, %v4294_v61  ;;  %v724_v42 = vadd.f32 %v4280_v55, %v716_v14  ;;  %v310_v14 = vld [vmem:[%s4253_s29 + $0x30] sm:$0xff] }
  0x54   : > { %v407_v13 = vmul.f32 %v4264_v47, %v310_v14 }
  0x55   : > { %vm732_vm5 = vcmp.ge.f32.partialorder %v724_v42, 0.0 }
  0x57   : > { %1620 = vperm.xlu1 %3980, %v3432_v43   ;;  %1615 = vperm.xlu0 %3979, %v3431_v44   ;;  %v3355_v43 = vld [vmem:[%s4253_s29 + $0xf0] sm:$0xff] }
  0x58   : > { %v3460_v44 = vld [vmem:[%s5451_s1 + $0x191] sm:$0xff]  ;;  %v717_v60 = vmul.f32 %v3355_v43, %v4264_v47 }
  0x5a   : > { %v725_v33 = vadd.f32 %v4280_v55, %v717_v60 }
  0x5b   : > { %1630 = vperm.xlu1 %3980, %v3434_v45   ;;  %1625 = vperm.xlu0 %3979, %v3433_v46   ;;  %v3459_v45 = vld [vmem:[%s5451_s1 + $0x181] sm:$0xff]  ;;  %v4331_v46 = vadd.f32 %v4316_v34, %v481_v24  ;;  %v404_v24 = vmul.f32 %v4264_v47, %v307_v57 }
  0x5c   : > { %vm733_vm8 = vcmp.ge.f32.partialorder %v725_v33, 0.0 }
  0x5f   : > { %1916 = vperm.xlu1 %3980, %v3454_v51   ;;  %1911 = vperm.xlu0 %3979, %v3453_v52   ;;  %v4343_v51 = vsel %vm729_vm1, %v721_v62, %v737_v35  ;;  %v4346_v52 = vsel %vm727_vm2, %v719_v63, %v735_v36  ;;  %v4357_v62 = vadd.f32 %v4316_v34, %v484_v41  ;;  %v309_v36 = vld [vmem:[%s4253_s29 + $0x20] sm:$0xff] }
  0x60   : > { %v483_v63 = vmul.f32 %v3353_v10, %v4294_v61  ;;  %v328_v35 = vmul.f32 %v4294_v61, %v308_v56  ;;  %v327_v10 = vmul.f32 %v4294_v61, %v307_v57  ;;  %v4383_v41 = vadd.f32 %v4316_v34, %v486_v2  ;;  %v311_v57 = vld [vmem:[%s4253_s29 + $0x40] sm:$0xff] }
  0x61   : > { %v329_v2 = vmul.f32 %v4294_v61, %v309_v36 }
  0x62   : > { %v4376_v38 = vadd.f32 %v4316_v34, %v483_v63  ;;  %v4407_v60 = vadd.f32 %v4316_v34, %v328_v35  ;;  %v314_v63 = vld [vmem:[%s4253_s29 + $0x70] sm:$0xff] }
  0x63   : > { %1926 = vperm.xlu1 %3980, %v3456_v58   ;;  %1921 = vperm.xlu0 %3979, %v3455_v59   ;;  %v4353_v58 = vsel %vm730_vm3, %v722_v1, %v738_v39  ;;  %v736_v59 = vmul.f32 0.2, %v720_v40  ;;  %v485_v1 = vmul.f32 %v3355_v43, %v4294_v61  ;;  %v4380_v39 = vsel %vm562_vm0, %v4117_v15, 0 }
  0x64   : > { %v4399_v15 = vsel %vm734_vm7, %v726_v54, %v742_v32  ;;  %5458 = vst [vmem:[#allocation2_spill] sm:$0xff] %v4407_v60  ;;  %v330_v54 = vmul.f32 %v4294_v61, %v310_v14  ;;  %v411_v14 = vmul.f32 %v4264_v47, %v314_v63  ;;  %v925_v60 = vld [vmem:[%s4253_s29 + $0x1] sm:$0xff] }
  0x65   : > { %v4373_v37 = vsel %vm728_vm4, %v720_v40, %v736_v59  ;;  %v4392_v40 = vsel %vm562_vm0, %v4138_v20, 0  ;;  %v741_v59 = vmul.f32 0.2, %v725_v33  ;;  %v4410_v20 = vadd.f32 %v4316_v34, %v327_v10 }
  0x67   : > { %1936 = vperm.xlu1 %3980, %v3458_v16   ;;  %1931 = vperm.xlu0 %3979, %v3457_v19   ;;  %v740_v16 = vmul.f32 0.2, %v724_v42  ;;  %v405_v19 = vmul.f32 %v4264_v47, %v308_v56  ;;  %v4402_v56 = vadd.f32 %v4316_v34, %v485_v1  ;;  %5459 = vst [vmem:[#allocation3_spill] sm:$0xff] %v4410_v20  ;;  %v313_v1 = vld [vmem:[%s4253_s29 + $0x60] sm:$0xff] }
  0x68   : > { %v4429_v35 = vsel %vm733_vm8, %v725_v33, %v741_v59  ;;  %v423_v20 = vadd.f32 %v4280_v55, %v411_v14  ;;  %v334_v14 = vmul.f32 %v4294_v61, %v314_v63 }
  0x69   : > { %v4386_v43 = vsel %vm732_vm5, %v724_v42, %v740_v16  ;;  %v406_v42 = vmul.f32 %v4264_v47, %v309_v36  ;;  %v410_v36 = vmul.f32 %v4264_v47, %v313_v1 }
  0x6a   : > { %vm431_vm15 = vcmp.ge.f32.partialorder %v423_v20, 0.0 }
  0x6b   : > { %1946 = vperm.xlu1 %3980, %v3460_v44   ;;  %1941 = vperm.xlu0 %3979, %v3459_v45   ;;  %v312_v44 = vld [vmem:[%s4253_s29 + $0x50] sm:$0xff]  ;;  %v4396_v45 = vsel %vm731_vm6, %v723_v53, %v739_v31  ;;  %v419_v53 = vadd.f32 %v4280_v55, %v407_v13  ;;  %v408_v31 = vmul.f32 %v4264_v47, %v311_v57 }
  0x6c   : > { %v409_v16 = vmul.f32 %v4264_v47, %v312_v44  ;;  %v418_v32 = vadd.f32 %v4280_v55, %v406_v42  ;;  %v331_v13 = vmul.f32 %v4294_v61, %v311_v57  ;;  %v4439_v42 = vadd.f32 %v4316_v34, %v329_v2  ;;  %v4445_v57 = vld [vmem:[%s5453_s3 + $0x4] sm:$0x3] }
  0x6d   : > { %v435_v10 = vmul.f32 0.2, %v419_v53  ;;  %vm427_vm11 = vcmp.ge.f32.partialorder %v419_v53, 0.0 }
  0x6e   : > { %5461 = vst [vmem:[#allocation5_spill] sm:$0xff] %v4439_v42  ;;  %v421_v33 = vadd.f32 %v4280_v55, %v409_v16  ;;  %v926_v16 = vld [vmem:[%s4253_s29 + $0x11] sm:$0xff]  ;;  %vm426_vm12 = vcmp.ge.f32.partialorder %v418_v32, 0.0  ;;  %v434_v42 = vmul.f32 0.2, %v418_v32 }
  0x6f   : > { %2234 = vperm.xlu1 %3980, %v4104_v12   ;;  %2229 = vperm.xlu0 %3979, %v4090_v9   ;;  %v417_v12 = vadd.f32 %v4280_v55, %v405_v19  ;;  %v416_v9 = vadd.f32 %v4280_v55, %v404_v24 }
  0x70   : > { %vm429_vm13 = vcmp.ge.f32.partialorder %v421_v33, 0.0 }
  0x71   : > { %vm425_vm9 = vcmp.ge.f32.partialorder %v417_v12, 0.0  ;;  %v433_v19 = vmul.f32 0.2, %v417_v12  ;;  %v432_v24 = vmul.f32 0.2, %v416_v9  ;;  %vm424_vm10 = vcmp.ge.f32.partialorder %v416_v9, 0.0 }
  0x73   : > { %2244 = vperm.xlu1 %3980, %v4130_v18   ;;  %2239 = vperm.xlu0 %3979, %v4099_v11   ;;  %v332_v18 = vmul.f32 %v4294_v61, %v312_v44  ;;  %v4426_v11 = vld [vmem:[%s5454_s4 + $0x4] sm:$0x3]  ;;  %v4436_v44 = vadd.f32 %v4316_v34, %v330_v54  ;;  %v4454_v59 = vsel %vm424_vm10, %v416_v9, %v432_v24 }
  0x74   : > { %5462 = vst [vmem:[#allocation6_spill] sm:$0xff] %v4454_v59  ;;  %v420_v54 = vadd.f32 %v4280_v55, %v408_v31  ;;  %v4459_v2 = vsel %vm562_vm0, %v4426_v11, 0  ;;  %v4472_v9 = vadd.f32 %v4316_v34, %v331_v13  ;;  %v422_v24 = vadd.f32 %v4280_v55, %v410_v36  ;;  %v927_v31 = vld [vmem:[%s4253_s29 + $0x21] sm:$0xff] }
  0x75   : > { %5460 = vst [vmem:[#allocation4_spill] sm:$0xff] %v4436_v44  ;;  %5463 = vst [vmem:[#allocation7_spill] sm:$0xff] %v4459_v2  ;;  %v4463_v44 = vadd.f32 %v4316_v34, %v332_v18  ;;  %v4478_v2 = vsel %vm562_vm0, %v4445_v57, 0  ;;  %v437_v18 = vmul.f32 0.2, %v421_v33  ;;  %v333_v13 = vmul.f32 %v4294_v61, %v313_v1 }
  0x76   : > { %5466 = vst [vmem:[#allocation10_spill] sm:$0xff] %v4472_v9  ;;  %5467 = vst [vmem:[#allocation11_spill] sm:$0xff] %v4478_v2  ;;  %v1099_v9 = vmul.f32 %v4264_v47, %v925_v60  ;;  %vm428_vm14 = vcmp.ge.f32.partialorder %v420_v54, 0.0  ;;  %v439_v2 = vmul.f32 0.2, %v423_v20  ;;  %v941_v1 = vmul.f32 %v4294_v61, %v925_v60 }
  0x77   : > { %2254 = vperm.xlu1 %3980, %v4150_v22   ;;  %2249 = vperm.xlu0 %3979, %v4125_v17   ;;  %v3486_v17 = vld [vmem:[%s5451_s1 + $0x80] sm:$0xff]  ;;  %v4451_v22 = vsel %vm425_vm9, %v417_v12, %v433_v19  ;;  %5464 = vst [vmem:[#allocation8_spill] sm:$0xff] %v4463_v44  ;;  %v928_v12 = vld [vmem:[%s4253_s29 + $0x31] sm:$0xff]  ;;  %v4469_v19 = vsel %vm427_vm11, %v419_v53, %v435_v10  ;;  %v436_v10 = vmul.f32 0.2, %v420_v54  ;;  %vm430_vm1 = vcmp.ge.f32.partialorder %v422_v24, 0.0 }
  0x78   : > { %5465 = vst [vmem:[#allocation9_spill] sm:$0xff] %v4469_v19  ;;  %v1100_v53 = vmul.f32 %v4264_v47, %v926_v16  ;;  %v1102_v36 = vmul.f32 %v4264_v47, %v928_v12  ;;  %v4489_v44 = vsel %vm426_vm12, %v418_v32, %v434_v42  ;;  %v438_v63 = vmul.f32 0.2, %v422_v24  ;;  %v930_v42 = vld [vmem:[%s4253_s29 + $0x51] sm:$0xff] }
  0x79   : > { %5468 = vst [vmem:[#allocation12_spill] sm:$0xff] %v4489_v44  ;;  %v4495_v19 = vsel %vm429_vm13, %v421_v33, %v437_v18  ;;  %v929_v44 = vld [vmem:[%s4253_s29 + $0x41] sm:$0xff]  ;;  %v4504_v59 = vsel %vm428_vm14, %v420_v54, %v436_v10  ;;  %v4507_v60 = vadd.f32 %v4316_v34, %v333_v13  ;;  %v932_v33 = vld [vmem:[%s4253_s29 + $0x71] sm:$0xff]  ;;  %v4513_v18 = vsel %vm431_vm15, %v423_v20, %v439_v2 }
  0x7a   : > { %v1108_v32 = vadd.f32 %v4280_v55, %v1100_v53  ;;  %v944_v53 = vmul.f32 %v4294_v61, %v928_v12  ;;  %v931_v54 = vld [vmem:[%s4253_s29 + $0x61] sm:$0xff]  ;;  %v4521_v10 = vsel %vm430_vm1, %v422_v24, %v438_v63  ;;  %v4524_v13 = vadd.f32 %v4316_v34, %v941_v1 }
  0x7b   : > { %2264 = vperm.xlu1 %3980, %v3486_v17   ;;  %2259 = vperm.xlu0 %3979, %v4145_v21   ;;  %v942_v17 = vmul.f32 %v4294_v61, %v926_v16  ;;  %v1101_v21 = vmul.f32 %v4264_v47, %v927_v31  ;;  %v4498_v16 = vadd.f32 %v4316_v34, %v334_v14  ;;  %v4536_v63 = vld [vmem:[%s5454_s4 + $0x6] sm:$0x3]  ;;  %vm549_vm9 = vcmask 31744  }
  0x7c   : > { %5471 = vst [vmem:[#allocation15_spill] sm:$0xff] %v4521_v10  ;;  %5472 = vst [vmem:[#allocation16_spill] sm:$0xff] %v4524_v13  ;;  %vm1116_vm2 = vcmp.ge.f32.partialorder %v1108_v32, 0.0  ;;  %v1124_v20 = vmul.f32 0.2, %v1108_v32  ;;  %v943_v2 = vmul.f32 %v4294_v61, %v927_v31  ;;  %v1106_v12 = vmul.f32 %v4264_v47, %v932_v33 }
  0x7d   : > { %5469 = vst [vmem:[#allocation13_spill] sm:$0xff] %v4498_v16  ;;  %v4516_v14 = vadd.f32 %v4316_v34, %v942_v17  ;;  %v1109_v16 = vadd.f32 %v4280_v55, %v1101_v21  ;;  %v946_v21 = vmul.f32 %v4294_v61, %v930_v42  ;;  %v945_v1 = vmul.f32 %v4294_v61, %v929_v44 }
  0x7e   : > { %v4541_v31 = vadd.f32 %v4316_v34, %v944_v53  ;;  %v4549_v10 = vsel %vm1116_vm2, %v1108_v32, %v1124_v20  ;;  %v4556_v53 = vsel %vm562_vm0, %v4536_v63, 0 }
  0x7f   : > { %2552 = vperm.xlu1 %3980, %v4045_v0   ;;  %2547 = vperm.xlu0 %3979, %v4059_v4   ;;  %v1107_v0 = vadd.f32 %v4280_v55, %v1099_v9  ;;  %v1110_v4 = vadd.f32 %v4280_v55, %v1102_v36  ;;  %5470 = vst [vmem:[#allocation14_spill] sm:$0xff] %v4516_v14  ;;  %vm1117_vm5 = vcmp.ge.f32.partialorder %v1109_v16, 0.0  ;;  %v3394_v14 = vld [vmem:[%s4253_s29 + $0x130] sm:$0xff]  ;;  %5474 = vst [vmem:[#allocation18_spill] sm:$0xff] %v4549_v10 }
  0x80   : > { %v1104_v9 = vmul.f32 %v4264_v47, %v930_v42  ;;  %v1103_v36 = vmul.f32 %v4264_v47, %v929_v44  ;;  %5473 = vst [vmem:[#allocation17_spill] sm:$0xff] %v4541_v31  ;;  %v4552_v44 = vadd.f32 %v4316_v34, %v943_v2  ;;  %5476 = vst [vmem:[#allocation20_spill] sm:$0xff] %v4556_v53  ;;  %v3393_v31 = vld [vmem:[%s4253_s29 + $0x120] sm:$0xff] }
  0x81   : > { %v1123_v24 = vmul.f32 0.2, %v1107_v0  ;;  %v1126_v17 = vmul.f32 0.2, %v1110_v4  ;;  %vm1115_vm3 = vcmp.ge.f32.partialorder %v1107_v0, 0.0  ;;  %vm1118_vm4 = vcmp.ge.f32.partialorder %v1110_v4, 0.0 }
  0x82   : > { %v1112_v13 = vadd.f32 %v4280_v55, %v1104_v9  ;;  %v1111_v42 = vadd.f32 %v4280_v55, %v1103_v36  ;;  %5475 = vst [vmem:[#allocation19_spill] sm:$0xff] %v4552_v44  ;;  %v1114_v9 = vadd.f32 %v4280_v55, %v1106_v12  ;;  %v3512_v36 = vld [vmem:[%s5451_s1 + $0x110] sm:$0xff]  ;;  %v4569_v32 = vadd.f32 %v4316_v34, %v946_v21 }
  0x83   : > { %2562 = vperm.xlu1 %3980, %v4071_v6   ;;  %2557 = vperm.xlu0 %3979, %v4054_v3   ;;  %v1105_v6 = vmul.f32 %v4264_v47, %v931_v54  ;;  %v1125_v3 = vmul.f32 0.2, %v1109_v16  ;;  %v4575_v53 = vadd.f32 %v4316_v34, %v945_v1  ;;  %v948_v12 = vmul.f32 %v4294_v61, %v932_v33 }
  0x84   : > { %5479 = vst [vmem:[#allocation23_spill] sm:$0xff] %v4569_v32  ;;  %v1418_v44 = vmul.f32 %v3394_v14, %v4264_v47  ;;  %vm1120_vm6 = vcmp.ge.f32.partialorder %v1112_v13, 0.0  ;;  %vm1119_vm7 = vcmp.ge.f32.partialorder %v1111_v42, 0.0  ;;  %vm1122_vm8 = vcmp.ge.f32.partialorder %v1114_v9, 0.0  ;;  %v4595_v32 = vld [vmem:[%s5454_s4 + $0x8] sm:$0x3] }
  0x85   : > { %v1113_v20 = vadd.f32 %v4280_v55, %v1105_v6  ;;  %v4572_v2 = vsel %vm1117_vm5, %v1109_v16, %v1125_v3  ;;  %5481 = vst [vmem:[#allocation25_spill] sm:$0xff] %v4575_v53  ;;  %v1130_v16 = vmul.f32 0.2, %v1114_v9  ;;  %v947_v33 = vmul.f32 %v4294_v61, %v931_v54 }
  0x86   : > { %5480 = vst [vmem:[#allocation24_spill] sm:$0xff] %v4572_v2  ;;  %v1260_v21 = vmul.f32 %v3394_v14, %v4294_v61  ;;  %v1259_v3 = vmul.f32 %v3393_v31, %v4294_v61  ;;  %v1417_v1 = vmul.f32 %v3393_v31, %v4264_v47  ;;  %v4611_v10 = vadd.f32 %v4316_v34, %v948_v12 }
  0x87   : > { %2572 = vperm.xlu1 %3980, %v4083_v8   ;;  %2567 = vperm.xlu0 %3979, %v4066_v5   ;;  %v4563_v8 = vsel %vm1115_vm3, %v1107_v0, %v1123_v24  ;;  %v4566_v5 = vsel %vm1118_vm4, %v1110_v4, %v1126_v17  ;;  %v3396_v0 = vld [vmem:[%s4253_s29 + $0x150] sm:$0xff]  ;;  %v4584_v4 = vld [vmem:[%s5453_s3 + $0x6] sm:$0x3]  ;;  %v1128_v24 = vmul.f32 0.2, %v1112_v13  ;;  %vm1121_vm10 = vcmp.ge.f32.partialorder %v1113_v20, 0.0 }
  0x88   : > { %5477 = vst [vmem:[#allocation21_spill] sm:$0xff] %v4563_v8  ;;  %5478 = vst [vmem:[#allocation22_spill] sm:$0xff] %v4566_v5  ;;  %v1127_v17 = vmul.f32 0.2, %v1111_v42  ;;  %v1129_v6 = vmul.f32 0.2, %v1113_v20  ;;  %v1262_v53 = vmul.f32 %v3396_v0, %v4294_v61  ;;  %v1420_v54 = vmul.f32 %v3396_v0, %v4264_v47 }
  0x89   : > { %v4602_v14 = vsel %vm562_vm0, %v4584_v4, 0  ;;  %v4605_v5 = vsel %vm1120_vm6, %v1112_v13, %v1128_v24  ;;  %v4616_v0 = vsel %vm1122_vm8, %v1114_v9, %v1130_v16  ;;  %v4622_v13 = vadd.f32 %v4316_v34, %v1260_v21 }
  0x8a   : > { %5482 = vst [vmem:[#allocation26_spill] sm:$0xff] %v4602_v14  ;;  %v4608_v8 = vsel %vm1119_vm7, %v1111_v42, %v1127_v17  ;;  %v4619_v14 = vadd.f32 %v4316_v34, %v947_v33  ;;  %v4626_v42 = vsel %vm562_vm0, %v4595_v32, 0  ;;  %v4630_v12 = vsel %vm1121_vm10, %v1113_v20, %v1129_v6 }
  0x8b   : > { %2582 = vperm.xlu1 %3980, %v3512_v36   ;;  %2577 = vperm.xlu0 %3979, %v4078_v7   ;;  %v1426_v7 = vadd.f32 %v4280_v55, %v1418_v44  ;;  %v3395_v36 = vld [vmem:[%s4253_s29 + $0x140] sm:$0xff]  ;;  %5483 = vst [vmem:[#allocation27_spill] sm:$0xff] %v4626_v42  ;;  %v1425_v9 = vadd.f32 %v4280_v55, %v1417_v1 }
  0x8c   : > { %v1261_v44 = vmul.f32 %v3395_v36, %v4294_v61  ;;  %v4637_v24 = vadd.f32 %v4316_v34, %v1262_v53  ;;  %v4640_v16 = vadd.f32 %v4280_v55, %v1420_v54  ;;  %v1419_v33 = vmul.f32 %v3395_v36, %v4264_v47 }
  0x8d   : > { %vm1434_vm11 = vcmp.ge.f32.partialorder %v1426_v7, 0.0  ;;  %v1442_v17 = vmul.f32 0.2, %v1426_v7  ;;  %vm1433_vm12 = vcmp.ge.f32.partialorder %v1425_v9, 0.0 }
  0x8e   : > { %v508_v2 = vpop.permute.xlu1 %507  ;;  %v498_v31 = vpop.permute.xlu0 %497  ;;  %5485 = vst [vmem:[#allocation29_spill] sm:$0xff] %v4637_v24  ;;  %v4648_v53 = vadd.f32 %v4316_v34, %v1261_v44  ;;  %vm1436_vm13 = vcmp.ge.f32.partialorder %v4640_v16, 0.0 }
  0x8f   : > { %2868 = vperm.xlu1 %3980, %v4173_v26   ;;  %2863 = vperm.xlu0 %3979, %v4159_v23   ;;  %v4633_v26 = vadd.f32 %v4316_v34, %v1259_v3  ;;  %v3398_v23 = vld [vmem:[%s4253_s29 + $0x170] sm:$0xff]  ;;  %v537_v20 = vmul.f32 %v508_v2, %v4331_v46  ;;  %v535_v21 = vmul.f32 %v498_v31, %v4334_v48  ;;  %v3397_v46 = vld [vmem:[%s4253_s29 + $0x160] sm:$0xff] }
  0x90   : > { %v751_v6 = vmul.f32 %v4346_v52, %v498_v31  ;;  %5486 = vst [vmem:[#allocation30_spill] sm:$0xff] %v4648_v53  ;;  %v753_v48 = vmul.f32 %v4343_v51, %v508_v2  ;;  %v1441_v52 = vmul.f32 0.2, %v1425_v9  ;;  %v1422_v31 = vmul.f32 %v3398_v23, %v4264_v47 }
  0x91   : > { %5484 = vst [vmem:[#allocation28_spill] sm:$0xff] %v4633_v26  ;;  %v1264_v51 = vmul.f32 %v3398_v23, %v4294_v61 }
  0x92   : > { %v513_v3 = vpop.permute.xlu1 %512  ;;  %v503_v1 = vpop.permute.xlu0 %502  ;;  %v4688_v23 = vsel %vm1433_vm12, %v1425_v9, %v1441_v52 }
  0x93   : > { %v538_v42 = vmul.f32 %v513_v3, %v4337_v49  ;;  %v754_v54 = vmul.f32 %v4353_v58, %v513_v3  ;;  %v536_v24 = vmul.f32 %v503_v1, %v4340_v50  ;;  %v752_v36 = vmul.f32 %v4373_v37, %v503_v1  ;;  %2878 = vperm.xlu1 %3980, %v4185_v28   ;;  %v3400_v3 = vld [vmem:[%s4253_s29 + $0x190] sm:$0xff] }
  0x94   : > { %2873 = vperm.xlu0 %3979, %v4168_v25   ;;  %v1427_v58 = vadd.f32 %v4280_v55, %v1419_v33  ;;  %v4662_v28 = vsel %vm1434_vm11, %v1426_v7, %v1442_v17  ;;  %v1421_v25 = vmul.f32 %v3397_v46, %v4264_v47  ;;  %v1444_v7 = vmul.f32 0.2, %v4640_v16 }
  0x95   : > { %v544_v44 = vpack.c.bf16 %v538_v42, %v537_v20  ;;  %v543_v53 = vpack.c.bf16 %v536_v24, %v535_v21  ;;  %v759_v49 = vpack.c.bf16 %v752_v36, %v751_v6  ;;  %v760_v50 = vpack.c.bf16 %v754_v54, %v753_v48 }
  0x96   : > { %v523_v26 = vpop.permute.xlu1 %522  ;;  %v518_v37 = vpop.permute.xlu0 %517  ;;  %v4676_v17 = vadd.f32 %v4280_v55, %v1422_v31  ;;  %vm1435_vm14 = vcmp.ge.f32.partialorder %v1427_v58, 0.0  ;;  %v1429_v20 = vadd.f32 %v4280_v55, %v1421_v25  ;;  %v1266_v21 = vmul.f32 %v3400_v3, %v4294_v61 }
  0x97   : > { %v540_v2 = vmul.f32 %v523_v26, %v4357_v62  ;;  %v756_v1 = vmul.f32 %v4386_v43, %v523_v26  ;;  %v539_v42 = vmul.f32 %v518_v37, %v4376_v38  ;;  %v755_v24 = vmul.f32 %v4396_v45, %v518_v37  ;;  %2888 = vperm.xlu1 %3980, %v4197_v30  }
  0x98   : > { %2883 = vperm.xlu0 %3979, %v4180_v27   ;;  %3645 = vmatprep.mubr.msk.bf16.mxu0 %vm549_vm9, %v543_v53  ;;  %v1424_v62 = vmul.f32 %v3400_v3, %v4264_v47  ;;  %v3538_v27 = vld [vmem:[%s5451_s1 + $0x81] sm:$0xff]  ;;  %v1443_v30 = vmul.f32 0.2, %v1427_v58  ;;  %v1263_v38 = vmul.f32 %v3397_v46, %v4294_v61  ;;  %v4702_v9 = vsel %vm1436_vm13, %v4640_v16, %v1444_v7 }
  0x99   : > { %v545_v43 = vpack.c.bf16 %v540_v2, %v539_v42  ;;  %v761_v26 = vpack.c.bf16 %v756_v1, %v755_v24  ;;  %3665 = vmatprep.mubr.msk.bf16.mxu1 %vm549_vm9, %v759_v49  ;;  %3646 = vmatmul.mubr.msk.bf16.vlgmr.msra.gmra.mrb[0].mxu0 %vm549_vm9, %v544_v44  ;;  %vm1438_vm15 = vcmp.ge.f32.partialorder %v4676_v17, 0.0  ;;  %v3420_v16 = vld [vmem:[%s4253_s29 + $0x1c0] sm:$0xff]  ;;  %vm1437_vm1 = vcmp.ge.f32.partialorder %v1429_v20, 0.0  ;;  %v3419_v24 = vld [vmem:[%s4253_s29 + $0x1b0] sm:$0xff] }
  0x9a   : > { %3666 = vmatmul.mubr.msk.bf16.vlgmr.msra.gmra.mrb[0].mxu1 %vm549_vm9, %v760_v50  ;;  %v533_v45 = vpop.permute.xlu1 %532  ;;  %v528_v33 = vpop.permute.xlu0 %527  ;;  %3654 = vmatpush3.bf16.msra.mxu0 %v4392_v40  ;;  %v3399_v40 = vld [vmem:[%s4253_s29 + $0x180] sm:$0xff]  ;;  %v4724_v31 = vadd.f32 %v4316_v34, %v1266_v21  ;;  %v5488_v50 = vld [vmem:[#allocation3_spill] sm:$0xff]  ;;  %v1736_v42 = vmul.f32 %v3420_v16, %v4264_v47 }
  0x9b   : > { %3674 = vmatpush3.bf16.msra.mxu1 %v4380_v39  ;;  %v542_v6 = vmul.f32 %v533_v45, %v4383_v41  ;;  %v758_v53 = vmul.f32 %v4399_v15, %v533_v45  ;;  %v541_v54 = vmul.f32 %v528_v33, %v4402_v56  ;;  %v757_v36 = vmul.f32 %v4429_v35, %v528_v33  ;;  %v5487_v49 = vld [vmem:[#allocation2_spill] sm:$0xff]  ;;  %v5490_v33 = vld [vmem:[#allocation4_spill] sm:$0xff] }
  0x9c   : > { %2898 = vperm.xlu1 %3980, %v3538_v27   ;;  %2893 = vperm.xlu0 %3979, %v4192_v29   ;;  %v4705_v39 = vadd.f32 %v4316_v34, %v1264_v51  ;;  %v1432_v41 = vadd.f32 %v4280_v55, %v1424_v62  ;;  %v4712_v56 = vsel %vm1435_vm14, %v1427_v58, %v1443_v30  ;;  %v1446_v29 = vmul.f32 0.2, %v4676_v17  ;;  %v5489_v51 = vld [vmem:[#allocation6_spill] sm:$0xff] }
  0x9d   : > { %v546_v15 = vpack.c.bf16 %v542_v6, %v541_v54  ;;  %3649 = vmatprep.mubr.msk.bf16.mxu0 %vm549_vm9, %v545_v43  ;;  %3669 = vmatprep.mubr.msk.bf16.mxu1 %vm549_vm9, %v761_v26  ;;  %v4716_v35 = vadd.f32 %v4316_v34, %v1263_v38  ;;  %v762_v46 = vpack.c.bf16 %v758_v53, %v757_v36  ;;  %v5491_v6 = vld [vmem:[#allocation9_spill] sm:$0xff] }
  0x9e   : > { %v355_v48 = vpop.permute.xlu1 %354  ;;  %v350_v52 = vpop.permute.xlu0 %349  ;;  %3956 = vmatprep.subr.msk.bf16.mxu1 %vm562_vm0, %v4426_v11  ;;  %3955 = vmatprep.subr.msk.bf16.mxu0 %vm562_vm0, %v4445_v57  ;;  %v1423_v44 = vmul.f32 %v3399_v40, %v4264_v47  ;;  %v4734_v11 = vld [vmem:[%s5453_s3 + $0x8] sm:$0x3]  ;;  %v1445_v57 = vmul.f32 0.2, %v1429_v20  ;;  %v1448_v2 = vmul.f32 0.2, %v1432_v41  ;;  %v1265_v1 = vmul.f32 %v3399_v40, %v4294_v61 }
  0x9f   : > { %v388_v58 = vmul.f32 %v355_v48, %v5487_v49  ;;  %v449_v3 = vmul.f32 %v4451_v22, %v355_v48  ;;  %v387_v37 = vmul.f32 %v350_v52, %v5488_v50  ;;  %v448_v25 = vmul.f32 %v5489_v51, %v350_v52  ;;  %v5492_v54 = vld [vmem:[#allocation5_spill] sm:$0xff]  ;;  %v5493_v40 = vld [vmem:[#allocation12_spill] sm:$0xff] }
  0xa0   : > { %v1578_v22 = vmul.f32 %v3420_v16, %v4294_v61  ;;  %v1577_v43 = vmul.f32 %v3419_v24, %v4294_v61  ;;  %v4746_v30 = vsel %vm1438_vm15, %v4676_v17, %v1446_v29  ;;  %vm1440_vm2 = vcmp.ge.f32.partialorder %v1432_v41, 0.0  ;;  %v3422_v16 = vld [vmem:[%s4253_s29 + $0x1e0] sm:$0xff] }
  0xa1   : > { %v395_v7 = vpack.c.bf16 %v388_v58, %v387_v37  ;;  %v456_v62 = vpack.c.bf16 %v449_v3, %v448_v25  ;;  %3650 = vmatmul.mubr.msk.bf16.gmra.mrb[4].mxu0 %vm549_vm9, %v546_v15  ;;  %v1431_v38 = vadd.f32 %v4280_v55, %v1423_v44  ;;  %v4751_v45 = vsel %vm562_vm0, %v4734_v11, 0  ;;  %v3421_v25 = vld [vmem:[%s4253_s29 + $0x1d0] sm:$0xff] }
  0xa2   : > { %3670 = vmatmul.mubr.msk.bf16.gmra.mrb[4].mxu1 %vm549_vm9, %v762_v46  ;;  %v365_v26 = vpop.permute.xlu1 %364  ;;  %v360_v27 = vpop.permute.xlu0 %359  ;;  %v4761_v17 = vsel %vm1437_vm1, %v1429_v20, %v1445_v57  ;;  %v4764_v29 = vadd.f32 %v4316_v34, %v1265_v1  ;;  %v1744_v46 = vadd.f32 %v4280_v55, %v1736_v42  ;;  %v1735_v48 = vmul.f32 %v3419_v24, %v4264_v47  ;;  %v5494_v57 = vld [vmem:[#allocation8_spill] sm:$0xff] }
  0xa3   : > { %v390_v21 = vmul.f32 %v365_v26, %v5490_v33  ;;  %v451_v53 = vmul.f32 %v5491_v6, %v365_v26  ;;  %v389_v36 = vmul.f32 %v360_v27, %v5492_v54  ;;  %v450_v15 = vmul.f32 %v5493_v40, %v360_v27  ;;  %3655 = vmatprep.mubr.msk.bf16.mxu0 %vm549_vm9, %v395_v7  ;;  %v3424_v7 = vld [vmem:[%s4253_s29 + $0x200] sm:$0xff] }
  0xa4   : > { %3675 = vmatprep.mubr.msk.bf16.mxu1 %vm549_vm9, %v456_v62  ;;  %v4768_v44 = vsel %vm1440_vm2, %v1432_v41, %v1448_v2  ;;  %v4771_v49 = vadd.f32 %v4316_v34, %v1578_v22  ;;  %v4774_v58 = vadd.f32 %v4316_v34, %v1577_v43  ;;  %vm1439_vm3 = vcmp.ge.f32.partialorder %v1431_v38, 0.0  ;;  %v5495_v2 = vld [vmem:[#allocation10_spill] sm:$0xff]  ;;  %v4787_v62 = vld [vmem:[%s5454_s4 + $0xa] sm:$0x3] }
  0xa5   : > { %v396_v52 = vpack.c.bf16 %v390_v21, %v389_v36  ;;  %v457_v3 = vpack.c.bf16 %v451_v53, %v450_v15  ;;  %v1580_v37 = vmul.f32 %v3422_v16, %v4294_v61  ;;  %v1738_v51 = vmul.f32 %v3422_v16, %v4264_v47  ;;  %v5496_v53 = vld [vmem:[#allocation11_spill] sm:$0xff]  ;;  %v3423_v15 = vld [vmem:[%s4253_s29 + $0x1f0] sm:$0xff] }
  0xa6   : > { %v375_v20 = vpop.permute.xlu1 %374  ;;  %v370_v50 = vpop.permute.xlu0 %369  ;;  %v1447_v22 = vmul.f32 0.2, %v1431_v38  ;;  %v1760_v43 = vmul.f32 0.2, %v1744_v46  ;;  %v1743_v26 = vadd.f32 %v4280_v55, %v1735_v48  ;;  %v1579_v27 = vmul.f32 %v3421_v25, %v4294_v61  ;;  %v5497_v48 = vld [vmem:[#allocation7_spill] sm:$0xff] }
  0xa7   : > { %v392_v1 = vmul.f32 %v375_v20, %v5494_v57  ;;  %v453_v41 = vmul.f32 %v4495_v19, %v375_v20  ;;  %v391_v42 = vmul.f32 %v370_v50, %v5495_v2  ;;  %v452_v24 = vmul.f32 %v4504_v59, %v370_v50 }
  0xa8   : > { %vm1752_vm4 = vcmp.ge.f32.partialorder %v1744_v46, 0.0  ;;  %v1737_v59 = vmul.f32 %v3421_v25, %v4264_v47  ;;  %v4796_v54 = vadd.f32 %v4316_v34, %v1580_v37  ;;  %v1746_v36 = vadd.f32 %v4280_v55, %v1738_v51  ;;  %v5499_v37 = vld [vmem:[#allocation15_spill] sm:$0xff] }
  0xa9   : > { %v397_v33 = vpack.c.bf16 %v392_v1, %v391_v42  ;;  %v458_v21 = vpack.c.bf16 %v453_v41, %v452_v24  ;;  %3656 = vmatmul.mubr.msk.bf16.vlgmr.msra.gmra.mrb[0].mxu0 %vm549_vm9, %v396_v52  ;;  %v1740_v40 = vmul.f32 %v3424_v7, %v4264_v47  ;;  %v4803_v16 = vsel %vm562_vm0, %v4787_v62, 0  ;;  %v5498_v52 = vld [vmem:[#allocation13_spill] sm:$0xff] }
  0xaa   : > { %3676 = vmatmul.mubr.msk.bf16.vlgmr.msra.gmra.mrb[0].mxu1 %vm549_vm9, %v457_v3  ;;  %v385_v19 = vpop.permute.xlu1 %384  ;;  %v380_v6 = vpop.permute.xlu0 %379  ;;  %3684 = vmatpush3.bf16.msra.mxu0 %v5496_v53  ;;  %v4813_v51 = vsel %vm1439_vm3, %v1431_v38, %v1447_v22  ;;  %v4816_v57 = vsel %vm1752_vm4, %v1744_v46, %v1760_v43  ;;  %v1759_v1 = vmul.f32 0.2, %v1743_v26  ;;  %v4819_v41 = vadd.f32 %v4316_v34, %v1579_v27  ;;  %v3426_v38 = vld [vmem:[%s4253_s29 + $0x220] sm:$0xff] }
  0xab   : > { %3694 = vmatpush3.bf16.msra.mxu1 %v5497_v48  ;;  %v394_v3 = vmul.f32 %v385_v19, %v5498_v52  ;;  %v455_v20 = vmul.f32 %v4513_v18, %v385_v19  ;;  %v393_v50 = vmul.f32 %v380_v6, %v4507_v60  ;;  %v454_v25 = vmul.f32 %v5499_v37, %v380_v6  ;;  %v5500_v27 = vld [vmem:[#allocation14_spill] sm:$0xff]  ;;  %v5502_v19 = vld [vmem:[#allocation16_spill] sm:$0xff] }
  0xac   : > { %3659 = vmatprep.mubr.msk.bf16.mxu0 %vm549_vm9, %v397_v33  ;;  %3679 = vmatprep.mubr.msk.bf16.mxu1 %vm549_vm9, %v458_v21  ;;  %vm1751_vm5 = vcmp.ge.f32.partialorder %v1743_v26, 0.0  ;;  %v1745_v60 = vadd.f32 %v4280_v55, %v1737_v59  ;;  %v1739_v18 = vmul.f32 %v3423_v15, %v4264_v47  ;;  %vm1754_vm6 = vcmp.ge.f32.partialorder %v1746_v36, 0.0  ;;  %v5501_v21 = vld [vmem:[#allocation18_spill] sm:$0xff] }
  0xad   : > { %v398_v2 = vpack.c.bf16 %v394_v3, %v393_v50  ;;  %3958 = vmatprep.subr.msk.bf16.mxu1 %vm562_vm0, %v4536_v63  ;;  %3957 = vmatprep.subr.msk.bf16.mxu0 %vm562_vm0, %v4584_v4  ;;  %v459_v42 = vpack.c.bf16 %v455_v20, %v454_v25  ;;  %v1762_v22 = vmul.f32 0.2, %v1746_v36  ;;  %v1748_v43 = vadd.f32 %v4280_v55, %v1740_v40  ;;  %v5503_v4 = vld [vmem:[#allocation21_spill] sm:$0xff] }
  0xae   : > { %v965_v46 = vpop.permute.xlu1 %964  ;;  %v960_v24 = vpop.permute.xlu0 %959  ;;  %v4833_v48 = vsel %vm1751_vm5, %v1743_v26, %v1759_v1  ;;  %v1582_v59 = vmul.f32 %v3424_v7, %v4294_v61  ;;  %v1581_v52 = vmul.f32 %v3423_v15, %v4294_v61  ;;  %v1742_v3 = vmul.f32 %v3426_v38, %v4264_v47  ;;  %v3425_v15 = vld [vmem:[%s4253_s29 + $0x210] sm:$0xff]  ;;  %v5504_v1 = vld [vmem:[#allocation17_spill] sm:$0xff] }
  0xaf   : > { %v998_v33 = vmul.f32 %v965_v46, %v5500_v27  ;;  %v1140_v63 = vmul.f32 %v5501_v21, %v965_v46  ;;  %v997_v6 = vmul.f32 %v960_v24, %v5502_v19  ;;  %v1139_v53 = vmul.f32 %v5503_v4, %v960_v24  ;;  %v5505_v27 = vld [vmem:[#allocation22_spill] sm:$0xff] }
  0xb0   : > { %v1761_v40 = vmul.f32 0.2, %v1745_v60  ;;  %v1747_v37 = vadd.f32 %v4280_v55, %v1739_v18  ;;  %v4842_v26 = vsel %vm1754_vm6, %v1746_v36, %v1762_v22  ;;  %vm1753_vm7 = vcmp.ge.f32.partialorder %v1745_v60, 0.0 }
  0xb1   : > { %v1005_v20 = vpack.c.bf16 %v998_v33, %v997_v6  ;;  %v1147_v50 = vpack.c.bf16 %v1140_v63, %v1139_v53  ;;  %3660 = vmatmul.mubr.msk.bf16.gmra.mrb[4].mxu0 %vm549_vm9, %v398_v2  ;;  %vm1756_vm8 = vcmp.ge.f32.partialorder %v1748_v43, 0.0  ;;  %v1764_v7 = vmul.f32 0.2, %v1748_v43  ;;  %v5506_v2 = vld [vmem:[#allocation19_spill] sm:$0xff]  ;;  %v5507_v63 = vld [vmem:[#allocation24_spill] sm:$0xff] }
  0xb2   : > { %3680 = vmatmul.mubr.msk.bf16.gmra.mrb[4].mxu1 %vm549_vm9, %v459_v42  ;;  %v975_v25 = vpop.permute.xlu1 %974  ;;  %v970_v46 = vpop.permute.xlu0 %969  ;;  %v4852_v36 = vadd.f32 %v4316_v34, %v1582_v59  ;;  %v4855_v42 = vadd.f32 %v4316_v34, %v1581_v52  ;;  %v1584_v22 = vmul.f32 %v3426_v38, %v4294_v61  ;;  %v1750_v19 = vadd.f32 %v4280_v55, %v1742_v3  ;;  %v5508_v38 = vld [vmem:[#allocation23_spill] sm:$0xff] }
  0xb3   : > { %v1000_v24 = vmul.f32 %v975_v25, %v5504_v1  ;;  %v1142_v33 = vmul.f32 %v5505_v27, %v975_v25  ;;  %v999_v21 = vmul.f32 %v970_v46, %v5506_v2  ;;  %v1141_v18 = vmul.f32 %v5507_v63, %v970_v46  ;;  %3685 = vmatprep.mubr.msk.bf16.mxu0 %vm549_vm9, %v1005_v20  ;;  %v3446_v20 = vld [vmem:[%s4253_s29 + $0x131] sm:$0xff]  ;;  %v3445_v2 = vld [vmem:[%s4253_s29 + $0x121] sm:$0xff] }
  0xb4   : > { %3695 = vmatprep.mubr.msk.bf16.mxu1 %vm549_vm9, %v1147_v50  ;;  %v4859_v4 = vsel %vm1753_vm7, %v1745_v60, %v1761_v40  ;;  %vm1755_vm10 = vcmp.ge.f32.partialorder %v1747_v37, 0.0  ;;  %v1741_v53 = vmul.f32 %v3425_v15, %v4264_v47  ;;  %v4864_v59 = vsel %vm1756_vm8, %v1748_v43, %v1764_v7 }
  0xb5   : > { %v1006_v6 = vpack.c.bf16 %v1000_v24, %v999_v21  ;;  %v1148_v25 = vpack.c.bf16 %v1142_v33, %v1141_v18  ;;  %v1763_v52 = vmul.f32 0.2, %v1747_v37  ;;  %v1583_v1 = vmul.f32 %v3425_v15, %v4294_v61  ;;  %v5509_v24 = vld [vmem:[#allocation25_spill] sm:$0xff] }
  0xb6   : > { %v985_v50 = vpop.permute.xlu1 %984  ;;  %v980_v46 = vpop.permute.xlu0 %979  ;;  %v4873_v21 = vadd.f32 %v4316_v34, %v1584_v22  ;;  %v1766_v33 = vmul.f32 0.2, %v1750_v19  ;;  %v1894_v63 = vmul.f32 %v3446_v20, %v4294_v61  ;;  %v2052_v43 = vmul.f32 %v3446_v20, %v4264_v47 }
  0xb7   : > { %v1002_v27 = vmul.f32 %v985_v50, %v5508_v38  ;;  %v1144_v3 = vmul.f32 %v4605_v5, %v985_v50  ;;  %v1001_v60 = vmul.f32 %v980_v46, %v5509_v24  ;;  %v1143_v40 = vmul.f32 %v4608_v8, %v980_v46  ;;  %v4883_v8 = vld [vmem:[%s5453_s3 + $0xa] sm:$0x3]  ;;  %v5510_v46 = vld [vmem:[#allocation26_spill] sm:$0xff]  ;;  %v5511_v38 = vld [vmem:[#allocation20_spill] sm:$0xff] }
  0xb8   : > { %v1749_v15 = vadd.f32 %v4280_v55, %v1741_v53  ;;  %v1893_v5 = vmul.f32 %v3445_v2, %v4294_v61  ;;  %v4888_v20 = vsel %vm1755_vm10, %v1747_v37, %v1763_v52  ;;  %vm1758_vm11 = vcmp.ge.f32.partialorder %v1750_v19, 0.0 }
  0xb9   : > { %v1007_v7 = vpack.c.bf16 %v1002_v27, %v1001_v60  ;;  %v1149_v18 = vpack.c.bf16 %v1144_v3, %v1143_v40  ;;  %3686 = vmatmul.mubr.msk.bf16.vlgmr.msra.gmra.mrb[0].mxu0 %vm549_vm9, %v1006_v6  ;;  %v4891_v6 = vadd.f32 %v4316_v34, %v1583_v1  ;;  %v2051_v53 = vmul.f32 %v3445_v2, %v4264_v47  ;;  %v3448_v60 = vld [vmem:[%s4253_s29 + $0x151] sm:$0xff] }
  0xba   : > { %3696 = vmatmul.mubr.msk.bf16.vlgmr.msra.gmra.mrb[0].mxu1 %vm549_vm9, %v1148_v25  ;;  %v995_v22 = vpop.permute.xlu1 %994  ;;  %v990_v50 = vpop.permute.xlu0 %989  ;;  %3704 = vmatpush3.bf16.msra.mxu0 %v5510_v46  ;;  %v4903_v37 = vadd.f32 %v4316_v34, %v1894_v63  ;;  %v2060_v47 = vadd.f32 %v4280_v55, %v2052_v43  ;;  %v1896_v52 = vmul.f32 %v3448_v60, %v4294_v61  ;;  %vm1757_vm12 = vcmp.ge.f32.partialorder %v1749_v15, 0.0  ;;  %v3447_v61 = vld [vmem:[%s4253_s29 + $0x141] sm:$0xff]  ;;  %v3450_v63 = vld [vmem:[%s4253_s29 + $0x171] sm:$0xff] }
  0xbb   : > { %3714 = vmatpush3.bf16.msra.mxu1 %v5511_v38  ;;  %v1004_v27 = vmul.f32 %v995_v22, %v4611_v10  ;;  %v1146_v3 = vmul.f32 %v4616_v0, %v995_v22  ;;  %v1003_v25 = vmul.f32 %v990_v50, %v4619_v14  ;;  %v1145_v24 = vmul.f32 %v4630_v12, %v990_v50  ;;  %v4925_v12 = vld [vmem:[%s5454_s4 + $0xc] sm:$0x3] }
  0xbc   : > { %3689 = vmatprep.mubr.msk.bf16.mxu0 %vm549_vm9, %v1007_v7  ;;  %3699 = vmatprep.mubr.msk.bf16.mxu1 %vm549_vm9, %v1149_v18  ;;  %v4909_v10 = vsel %vm562_vm0, %v4883_v8, 0  ;;  %v4916_v14 = vsel %vm1758_vm11, %v1750_v19, %v1766_v33  ;;  %v4919_v55 = vadd.f32 %v4316_v34, %v1893_v5  ;;  %v4936_v34 = vld [vmem:[%s5452_s2 + $0x2] ss:$0 sm:$0xff]  ;;  %v5512_v18 = vld [vmem:[#allocation28_spill] sm:$0xff]  ;;  %vm2068_vm13 = vcmp.ge.f32.partialorder %v2060_v47, 0.0 }
  0xbd   : > { %v1008_v0 = vpack.c.bf16 %v1004_v27, %v1003_v25  ;;  %3960 = vmatprep.subr.msk.bf16.mxu1 %vm562_vm0, %v4595_v32  ;;  %3959 = vmatprep.subr.msk.bf16.mxu0 %vm562_vm0, %v4734_v11  ;;  %v1150_v1 = vpack.c.bf16 %v1146_v3, %v1145_v24  ;;  %v1765_v32 = vmul.f32 0.2, %v1749_v15  ;;  %v4930_v11 = vld [vmem:[%s5452_s2 + $0x3] ss:$0 sm:$0xff]  ;;  %v2054_v33 = vmul.f32 %v4936_v34, %v3448_v60 }
  0xbe   : > { %v1283_v40 = vpop.permute.xlu1 %1282  ;;  %v1278_v2 = vpop.permute.xlu0 %1277  ;;  %v2059_v19 = vadd.f32 %v4930_v11, %v2051_v53  ;;  %v2076_v50 = vmul.f32 0.2, %v2060_v47  ;;  %v2053_v46 = vmul.f32 %v4936_v34, %v3447_v61  ;;  %v4947_v53 = vsel %vm562_vm0, %v4925_v12, 0  ;;  %v3449_v3 = vld [vmem:[%s4253_s29 + $0x161] sm:$0xff] }
  0xbf   : > { %v1316_v43 = vmul.f32 %v1283_v40, %v4622_v13  ;;  %v1458_v7 = vmul.f32 %v4662_v28, %v1283_v40  ;;  %v1315_v5 = vmul.f32 %v1278_v2, %v5512_v18  ;;  %v1457_v22 = vmul.f32 %v4688_v23, %v1278_v2  ;;  %v4953_v13 = vld [vmem:[%s5452_s2] ss:$0 sm:$0xff]  ;;  %v5513_v2 = vld [vmem:[#allocation29_spill] sm:$0xff] }
  0xc0   : > { %v1895_v28 = vmul.f32 %v4953_v13, %v3447_v61  ;;  %v2056_v23 = vmul.f32 %v4936_v34, %v3450_v63  ;;  %v4960_v60 = vsel %vm1757_vm12, %v1749_v15, %v1765_v32  ;;  %vm2067_vm14 = vcmp.ge.f32.partialorder %v2059_v19, 0.0 }
  0xc1   : > { %v1323_v38 = vpack.c.bf16 %v1316_v43, %v1315_v5  ;;  %v1465_v27 = vpack.c.bf16 %v1458_v7, %v1457_v22  ;;  %3690 = vmatmul.mubr.msk.bf16.gmra.mrb[4].mxu0 %vm549_vm9, %v1008_v0  ;;  %v4965_v0 = vld [vmem:[%s5452_s2 + $0x1] ss:$0 sm:$0xff]  ;;  %v2062_v61 = vadd.f32 %v4930_v11, %v2054_v33  ;;  %v4978_v32 = vsel %vm2068_vm13, %v2060_v47, %v2076_v50 }
  0xc2   : > { %3700 = vmatmul.mubr.msk.bf16.gmra.mrb[4].mxu1 %vm549_vm9, %v1150_v1  ;;  %v1293_v25 = vpop.permute.xlu1 %1292  ;;  %v1288_v24 = vpop.permute.xlu0 %1287  ;;  %v4968_v40 = vadd.f32 %v4965_v0, %v1896_v52  ;;  %v5514_v7 = vld [vmem:[#allocation30_spill] sm:$0xff]  ;;  %v2075_v5 = vmul.f32 0.2, %v2059_v19  ;;  %v2061_v52 = vadd.f32 %v4930_v11, %v2053_v46  ;;  %v2055_v33 = vmul.f32 %v4936_v34, %v3449_v3 }
  0xc3   : > { %v1318_v43 = vmul.f32 %v1293_v25, %v5513_v2  ;;  %v1460_v1 = vmul.f32 %v4702_v9, %v1293_v25  ;;  %v1317_v18 = vmul.f32 %v1288_v24, %v5514_v7  ;;  %v1459_v15 = vmul.f32 %v4712_v56, %v1288_v24  ;;  %3705 = vmatprep.mubr.msk.bf16.mxu0 %vm549_vm9, %v1323_v38  ;;  %v3452_v7 = vld [vmem:[%s4253_s29 + $0x191] sm:$0xff] }
  0xc4   : > { %3715 = vmatprep.mubr.msk.bf16.mxu1 %vm549_vm9, %v1465_v27  ;;  %v4983_v9 = vadd.f32 %v4965_v0, %v1895_v28  ;;  %v1898_v25 = vmul.f32 %v4953_v13, %v3450_v63  ;;  %v2064_v56 = vadd.f32 %v4930_v11, %v2056_v23  ;;  %vm2070_vm15 = vcmp.ge.f32.partialorder %v2062_v61, 0.0 }
  0xc5   : > { %v1324_v22 = vpack.c.bf16 %v1318_v43, %v1317_v18  ;;  %v1466_v38 = vpack.c.bf16 %v1460_v1, %v1459_v15  ;;  %v2078_v47 = vmul.f32 0.2, %v2062_v61  ;;  %v1897_v50 = vmul.f32 %v4953_v13, %v3449_v3 }
  0xc6   : > { %v1303_v24 = vpop.permute.xlu1 %1302  ;;  %v1298_v27 = vpop.permute.xlu0 %1297  ;;  %v4994_v63 = vsel %vm2067_vm14, %v2059_v19, %v2075_v5  ;;  %vm2069_vm1 = vcmp.ge.f32.partialorder %v2061_v52, 0.0  ;;  %v2077_v23 = vmul.f32 0.2, %v2061_v52  ;;  %v2063_v1 = vadd.f32 %v4930_v11, %v2055_v33 }
  0xc7   : > { %v1320_v46 = vmul.f32 %v1303_v24, %v4705_v39  ;;  %v1462_v2 = vmul.f32 %v4746_v30, %v1303_v24  ;;  %v1319_v43 = vmul.f32 %v1298_v27, %v4716_v35  ;;  %v1461_v28 = vmul.f32 %v4761_v17, %v1298_v27  ;;  %v3451_v35 = vld [vmem:[%s4253_s29 + $0x181] sm:$0xff] }
  0xc8   : > { %v4999_v39 = vadd.f32 %v4965_v0, %v1898_v25  ;;  %v2080_v30 = vmul.f32 0.2, %v2064_v56  ;;  %v5005_v19 = vsel %vm2070_vm15, %v2062_v61, %v2078_v47  ;;  %vm2072_vm2 = vcmp.ge.f32.partialorder %v2064_v56, 0.0  ;;  %v3472_v27 = vld [vmem:[%s4253_s29 + $0x20] sm:$0xff] }
  0xc9   : > { %v1325_v18 = vpack.c.bf16 %v1320_v46, %v1319_v43  ;;  %v1467_v15 = vpack.c.bf16 %v1462_v2, %v1461_v28  ;;  %3706 = vmatmul.mubr.msk.bf16.vlgmr.msra.gmra.mrb[0].mxu0 %vm549_vm9, %v1324_v22  ;;  %v5008_v5 = vadd.f32 %v4965_v0, %v1897_v50  ;;  %v2058_v33 = vmul.f32 %v4936_v34, %v3452_v7  ;;  %v5515_v22 = vld [vmem:[#allocation27_spill] sm:$0xff] }
  0xca   : > { %3716 = vmatmul.mubr.msk.bf16.vlgmr.msra.gmra.mrb[0].mxu1 %vm549_vm9, %v1466_v38  ;;  %v1313_v17 = vpop.permute.xlu1 %1312  ;;  %v1308_v3 = vpop.permute.xlu0 %1307  ;;  %3724 = vmatpush3.bf16.msra.mxu0 %v4751_v45  ;;  %v5020_v61 = vsel %vm2069_vm1, %v2061_v52, %v2077_v23  ;;  %v2079_v47 = vmul.f32 0.2, %v2063_v1  ;;  %v1900_v50 = vmul.f32 %v4953_v13, %v3452_v7  ;;  %vm2071_vm3 = vcmp.ge.f32.partialorder %v2063_v1, 0.0 }
  0xcb   : > { %3734 = vmatpush3.bf16.msra.mxu1 %v5515_v22  ;;  %v1322_v25 = vmul.f32 %v1313_v17, %v4724_v31  ;;  %v1464_v24 = vmul.f32 %v4768_v44, %v1313_v17  ;;  %v1321_v38 = vmul.f32 %v1308_v3, %v4764_v29  ;;  %v1463_v45 = vmul.f32 %v4813_v51, %v1308_v3  ;;  %v3471_v51 = vld [vmem:[%s4253_s29 + $0x10] sm:$0xff] }
  0xcc   : > { %3709 = vmatprep.mubr.msk.bf16.mxu0 %vm549_vm9, %v1325_v18  ;;  %3719 = vmatprep.mubr.msk.bf16.mxu1 %vm549_vm9, %v1467_v15  ;;  %v2057_v31 = vmul.f32 %v4936_v34, %v3451_v35  ;;  %v5029_v29 = vsel %vm2072_vm2, %v2064_v56, %v2080_v30  ;;  %v1899_v44 = vmul.f32 %v4953_v13, %v3451_v35  ;;  %v5043_v15 = vld [vmem:[%s5453_s3 + $0xc] sm:$0x3] }
  0xcd   : > { %v1326_v46 = vpack.c.bf16 %v1322_v25, %v1321_v38  ;;  %3962 = vmatprep.subr.msk.bf16.mxu1 %vm562_vm0, %v4787_v62  ;;  %3961 = vmatprep.subr.msk.bf16.mxu0 %vm562_vm0, %v4883_v8  ;;  %v1468_v52 = vpack.c.bf16 %v1464_v24, %v1463_v45  ;;  %v2066_v28 = vadd.f32 %v4930_v11, %v2058_v33  ;;  %v3474_v24 = vld [vmem:[%s4253_s29 + $0x40] sm:$0xff]  ;;  %v5065_v38 = vsel %vm562_vm0, %v5043_v15, 0 }
  0xce   : > { %v1601_v2 = vpop.permute.xlu1 %1600  ;;  %v1596_v43 = vpop.permute.xlu0 %1595  ;;  %v2212_v7 = vmul.f32 %v4953_v13, %v3472_v27  ;;  %v2370_v23 = vmul.f32 %v4936_v34, %v3472_v27  ;;  %v5045_v30 = vsel %vm2071_vm3, %v2063_v1, %v2079_v47  ;;  %v5048_v35 = vadd.f32 %v4965_v0, %v1900_v50 }
  0xcf   : > { %v1634_v62 = vmul.f32 %v1601_v2, %v4771_v49  ;;  %v1776_v8 = vmul.f32 %v4816_v57, %v1601_v2  ;;  %v1633_v56 = vmul.f32 %v1596_v43, %v4774_v58  ;;  %v1775_v18 = vmul.f32 %v4833_v48, %v1596_v43 }
  0xd0   : > { %v2065_v17 = vadd.f32 %v4930_v11, %v2057_v31  ;;  %v2369_v49 = vmul.f32 %v4936_v34, %v3471_v51  ;;  %v5054_v58 = vadd.f32 %v4965_v0, %v1899_v44  ;;  %v2211_v48 = vmul.f32 %v4953_v13, %v3471_v51  ;;  %v3473_v31 = vld [vmem:[%s4253_s29 + $0x30] sm:$0xff] }
  0xd1   : > { %v1641_v57 = vpack.c.bf16 %v1634_v62, %v1633_v56  ;;  %v1783_v3 = vpack.c.bf16 %v1776_v8, %v1775_v18  ;;  %3710 = vmatmul.mubr.msk.bf16.gmra.mrb[4].mxu0 %vm549_vm9, %v1326_v46  ;;  %vm2074_vm4 = vcmp.ge.f32.partialorder %v2066_v28, 0.0  ;;  %v5059_v22 = vadd.f32 %v4965_v0, %v2212_v7 }
  0xd2   : > { %3720 = vmatmul.mubr.msk.bf16.gmra.mrb[4].mxu1 %vm549_vm9, %v1468_v52  ;;  %v1611_v1 = vpop.permute.xlu1 %1610  ;;  %v1606_v33 = vpop.permute.xlu0 %1605  ;;  %v2378_v25 = vadd.f32 %v4930_v11, %v2370_v23  ;;  %v2082_v46 = vmul.f32 0.2, %v2066_v28  ;;  %vm2073_vm5 = vcmp.ge.f32.partialorder %v2065_v17, 0.0  ;;  %v2377_v44 = vadd.f32 %v4930_v11, %v2369_v49 }
  0xd3   : > { %v1636_v45 = vmul.f32 %v1611_v1, %v4796_v54  ;;  %v1778_v27 = vmul.f32 %v4842_v26, %v1611_v1  ;;  %v1635_v47 = vmul.f32 %v1606_v33, %v4819_v41  ;;  %v1777_v50 = vmul.f32 %v4859_v4, %v1606_v33  ;;  %3725 = vmatprep.mubr.msk.bf16.mxu0 %vm549_vm9, %v1641_v57  ;;  %v3476_v26 = vld [vmem:[%s4253_s29 + $0x60] sm:$0xff] }
  0xd4   : > { %3735 = vmatprep.mubr.msk.bf16.mxu1 %vm549_vm9, %v1783_v3  ;;  %v2214_v51 = vmul.f32 %v4953_v13, %v3474_v24  ;;  %v2081_v2 = vmul.f32 0.2, %v2065_v17  ;;  %v5077_v54 = vadd.f32 %v4965_v0, %v2211_v48  ;;  %v2372_v41 = vmul.f32 %v4936_v34, %v3474_v24 }
  0xd5   : > { %v1642_v52 = vpack.c.bf16 %v1636_v45, %v1635_v47  ;;  %v1784_v4 = vpack.c.bf16 %v1778_v27, %v1777_v50  ;;  %vm2386_vm6 = vcmp.ge.f32.partialorder %v2378_v25, 0.0  ;;  %v2394_v23 = vmul.f32 0.2, %v2378_v25 }
  0xd6   : > { %v1621_v43 = vpop.permute.xlu1 %1620  ;;  %v1616_v7 = vpop.permute.xlu0 %1615  ;;  %v2371_v62 = vmul.f32 %v4936_v34, %v3473_v31  ;;  %v5087_v57 = vsel %vm2074_vm4, %v2066_v28, %v2082_v46  ;;  %v2393_v3 = vmul.f32 0.2, %v2377_v44  ;;  %v5090_v48 = vadd.f32 %v4965_v0, %v2214_v51 }
  0xd7   : > { %v1638_v8 = vmul.f32 %v1621_v43, %v4852_v36  ;;  %v1780_v56 = vmul.f32 %v4864_v59, %v1621_v43  ;;  %v1637_v18 = vmul.f32 %v1616_v7, %v4855_v42  ;;  %v1779_v49 = vmul.f32 %v4888_v20, %v1616_v7  ;;  %v3475_v42 = vld [vmem:[%s4253_s29 + $0x50] sm:$0xff]  ;;  %v5100_v20 = vld [vmem:[%s5454_s4 + $0xe] sm:$0x3]  ;;  %v3478_v43 = vld [vmem:[%s4253_s29 + $0x80] sm:$0xff] }
  0xd8   : > { %v2374_v1 = vmul.f32 %v4936_v34, %v3476_v26  ;;  %v2380_v36 = vadd.f32 %v4930_v11, %v2372_v41  ;;  %v2213_v59 = vmul.f32 %v4953_v13, %v3473_v31  ;;  %v5105_v27 = vsel %vm2073_vm5, %v2065_v17, %v2081_v2 }
  0xd9   : > { %v1643_v33 = vpack.c.bf16 %v1638_v8, %v1637_v18  ;;  %v1785_v24 = vpack.c.bf16 %v1780_v56, %v1779_v49  ;;  %3726 = vmatmul.mubr.msk.bf16.vlgmr.msra.gmra.mrb[0].mxu0 %vm549_vm9, %v1642_v52  ;;  %v5108_v47 = vsel %vm2386_vm6, %v2378_v25, %v2394_v23  ;;  %vm2385_vm7 = vcmp.ge.f32.partialorder %v2377_v44, 0.0 }
  0xda   : > { %3736 = vmatmul.mubr.msk.bf16.vlgmr.msra.gmra.mrb[0].mxu1 %vm549_vm9, %v1784_v4  ;;  %v1631_v28 = vpop.permute.xlu1 %1630  ;;  %v1626_v45 = vpop.permute.xlu0 %1625  ;;  %3744 = vmatpush3.bf16.msra.mxu0 %v4909_v10  ;;  %v2379_v50 = vadd.f32 %v4930_v11, %v2371_v62  ;;  %v2216_v10 = vmul.f32 %v4953_v13, %v3476_v26  ;;  %v2382_v17 = vadd.f32 %v4930_v11, %v2374_v1  ;;  %vm2388_vm8 = vcmp.ge.f32.partialorder %v2380_v36, 0.0 }
  0xdb   : > { %3754 = vmatpush3.bf16.msra.mxu1 %v4803_v16  ;;  %v1640_v31 = vmul.f32 %v1631_v28, %v4873_v21  ;;  %v1782_v46 = vmul.f32 %v4916_v14, %v1631_v28  ;;  %v1639_v51 = vmul.f32 %v1626_v45, %v4891_v6  ;;  %v1781_v52 = vmul.f32 %v4960_v60, %v1626_v45 }
  0xdc   : > { %3729 = vmatprep.mubr.msk.bf16.mxu0 %vm549_vm9, %v1643_v33  ;;  %3739 = vmatprep.mubr.msk.bf16.mxu1 %vm549_vm9, %v1785_v24  ;;  %v2373_v25 = vmul.f32 %v4936_v34, %v3475_v42  ;;  %v5123_v16 = vsel %vm562_vm0, %v5100_v20, 0  ;;  %v5127_v6 = vsel %vm2385_vm7, %v2377_v44, %v2393_v3  ;;  %v5130_v14 = vadd.f32 %v4965_v0, %v2213_v59 }
  0xdd   : > { %v1644_v21 = vpack.c.bf16 %v1640_v31, %v1639_v51  ;;  %3964 = vmatprep.subr.msk.bf16.mxu1 %vm562_vm0, %v4925_v12  ;;  %3963 = vmatprep.subr.msk.bf16.mxu0 %vm562_vm0, %v5043_v15  ;;  %v1786_v60 = vpack.c.bf16 %v1782_v46, %v1781_v52  ;;  %v2396_v26 = vmul.f32 0.2, %v2380_v36  ;;  %vm2387_vm10 = vcmp.ge.f32.partialorder %v2379_v50, 0.0  ;;  %v3497_v51 = vld [vmem:[%s4253_s29 + $0xa0] sm:$0xff] }
  0xde   : > { %v1917_v2 = vpop.permute.xlu1 %1916  ;;  %v1912_v41 = vpop.permute.xlu0 %1911  ;;  %v2395_v4 = vmul.f32 0.2, %v2379_v50  ;;  %v5140_v62 = vadd.f32 %v4965_v0, %v2216_v10  ;;  %v2398_v15 = vmul.f32 0.2, %v2382_v17  ;;  %v2215_v8 = vmul.f32 %v4953_v13, %v3475_v42 }
  0xdf   : > { %v1950_v7 = vmul.f32 %v1917_v2, %v4903_v37  ;;  %v2092_v12 = vmul.f32 %v4978_v32, %v1917_v2  ;;  %v1949_v44 = vmul.f32 %v1912_v41, %v4919_v55  ;;  %v2091_v23 = vmul.f32 %v4994_v63, %v1912_v41  ;;  %v3477_v32 = vld [vmem:[%s4253_s29 + $0x70] sm:$0xff] }
  0xe0   : > { %v2381_v56 = vadd.f32 %v4930_v11, %v2373_v25  ;;  %vm2390_vm11 = vcmp.ge.f32.partialorder %v2382_v17, 0.0  ;;  %v2376_v37 = vmul.f32 %v4936_v34, %v3478_v43  ;;  %v5149_v3 = vsel %vm2388_vm8, %v2380_v36, %v2396_v26  ;;  %v3498_v36 = vld [vmem:[%s4253_s29 + $0xb0] sm:$0xff] }
  0xe1   : > { %v1957_v18 = vpack.c.bf16 %v1950_v7, %v1949_v44  ;;  %v2099_v49 = vpack.c.bf16 %v2092_v12, %v2091_v23  ;;  %3730 = vmatmul.mubr.msk.bf16.gmra.mrb[4].mxu0 %vm549_vm9, %v1644_v21  ;;  %v5152_v1 = vsel %vm2387_vm10, %v2379_v50, %v2395_v4  ;;  %v2218_v33 = vmul.f32 %v4953_v13, %v3478_v43  ;;  %v3500_v43 = vld [vmem:[%s4253_s29 + $0xd0] sm:$0xff]  ;;  %v3513_v7 = vld [vmem:[%s5453_s3 + $0xe] sm:$0x3] }
  0xe2   : > { %3740 = vmatmul.mubr.msk.bf16.gmra.mrb[4].mxu1 %vm549_vm9, %v1786_v60  ;;  %v1927_v55 = vpop.permute.xlu1 %1926  ;;  %v1922_v63 = vpop.permute.xlu0 %1921  ;;  %v2217_v24 = vmul.f32 %v4953_v13, %v3477_v32  ;;  %v5164_v50 = vsel %vm2390_vm11, %v2382_v17, %v2398_v15  ;;  %v5167_v31 = vadd.f32 %v4965_v0, %v2215_v8  ;;  %v2397_v46 = vmul.f32 0.2, %v2381_v56  ;;  %v3499_v8 = vld [vmem:[%s4253_s29 + $0xc0] sm:$0xff] }
  0xe3   : > { %v1952_v59 = vmul.f32 %v1927_v55, %v4968_v40  ;;  %v2094_v42 = vmul.f32 %v5005_v19, %v1927_v55  ;;  %v1951_v28 = vmul.f32 %v1922_v63, %v4983_v9  ;;  %v2093_v45 = vmul.f32 %v5020_v61, %v1922_v63  ;;  %3745 = vmatprep.mubr.msk.bf16.mxu0 %vm549_vm9, %v1957_v18 }
  0xe4   : > { %3755 = vmatprep.mubr.msk.bf16.mxu1 %vm549_vm9, %v2099_v49  ;;  %v2375_v40 = vmul.f32 %v4936_v34, %v3477_v32  ;;  %vm2389_vm12 = vcmp.ge.f32.partialorder %v2381_v56, 0.0  ;;  %v2384_v9 = vadd.f32 %v4930_v11, %v2376_v37  ;;  %v2530_v61 = vmul.f32 %v4953_v13, %v3498_v36 }
  0xe5   : > { %v1958_v19 = vpack.c.bf16 %v1952_v59, %v1951_v28  ;;  %v2100_v52 = vpack.c.bf16 %v2094_v42, %v2093_v45  ;;  %v5174_v17 = vadd.f32 %v4965_v0, %v2218_v33  ;;  %v5177_v21 = vadd.f32 %v4965_v0, %v2217_v24 }
  0xe6   : > { %v1937_v10 = vpop.permute.xlu1 %1936  ;;  %v1932_v25 = vpop.permute.xlu0 %1931  ;;  %v2688_v60 = vmul.f32 %v4936_v34, %v3498_v36  ;;  %v5189_v12 = vsel %vm2389_vm12, %v2381_v56, %v2397_v46  ;;  %v2383_v44 = vadd.f32 %v4930_v11, %v2375_v40  ;;  %v2529_v23 = vmul.f32 %v4953_v13, %v3497_v51  ;;  %v3502_v40 = vld [vmem:[%s4253_s29 + $0xf0] sm:$0xff] }
  0xe7   : > { %v1954_v2 = vmul.f32 %v1937_v10, %v4999_v39  ;;  %v2096_v41 = vmul.f32 %v5029_v29, %v1937_v10  ;;  %v1953_v26 = vmul.f32 %v1932_v25, %v5008_v5  ;;  %v2095_v4 = vmul.f32 %v5045_v30, %v1932_v25 }
  0xe8   : > { %v2687_v39 = vmul.f32 %v4936_v34, %v3497_v51  ;;  %v2400_v5 = vmul.f32 0.2, %v2384_v9  ;;  %v5196_v30 = vadd.f32 %v4965_v0, %v2530_v61  ;;  %vm2392_vm13 = vcmp.ge.f32.partialorder %v2384_v9, 0.0  ;;  %v3501_v51 = vld [vmem:[%s4253_s29 + $0xe0] sm:$0xff] }
  0xe9   : > { %v1959_v15 = vpack.c.bf16 %v1954_v2, %v1953_v26  ;;  %v2101_v29 = vpack.c.bf16 %v2096_v41, %v2095_v4  ;;  %3746 = vmatmul.mubr.msk.bf16.vlgmr.msra.gmra.mrb[0].mxu0 %vm549_vm9, %v1958_v19  ;;  %v2696_v49 = vadd.f32 %v4930_v11, %v2688_v60  ;;  %v2690_v37 = vmul.f32 %v4936_v34, %v3500_v43 }
  0xea   : > { %3756 = vmatmul.mubr.msk.bf16.vlgmr.msra.gmra.mrb[0].mxu1 %vm549_vm9, %v2100_v52  ;;  %v1947_v18 = vpop.permute.xlu1 %1946  ;;  %v1942_v56 = vpop.permute.xlu0 %1941  ;;  %3764 = vmatpush3.bf16.msra.mxu0 %v5065_v38  ;;  %v5204_v32 = vsel %vm562_vm0, %v3513_v7, 0  ;;  %v2399_v38 = vmul.f32 0.2, %v2383_v44  ;;  %v5214_v59 = vadd.f32 %v4965_v0, %v2529_v23  ;;  %v2695_v42 = vadd.f32 %v4930_v11, %v2687_v39 }
  0xeb   : > { %3774 = vmatpush3.bf16.msra.mxu1 %v4947_v53  ;;  %v1956_v55 = vmul.f32 %v1947_v18, %v5048_v35  ;;  %v2098_v63 = vmul.f32 %v5087_v57, %v1947_v18  ;;  %v1955_v33 = vmul.f32 %v1942_v56, %v5054_v58  ;;  %v2097_v24 = vmul.f32 %v5105_v27, %v1942_v56 }
  0xec   : > { %3749 = vmatprep.mubr.msk.bf16.mxu0 %vm549_vm9, %v1959_v15  ;;  %3759 = vmatprep.mubr.msk.bf16.mxu1 %vm549_vm9, %v2101_v29  ;;  %v2689_v53 = vmul.f32 %v4936_v34, %v3499_v8  ;;  %v5221_v58 = vsel %vm2392_vm13, %v2384_v9, %v2400_v5  ;;  %vm2391_vm14 = vcmp.ge.f32.partialorder %v2383_v44, 0.0  ;;  %v2532_v57 = vmul.f32 %v4953_v13, %v3500_v43  ;;  %v3504_v5 = vld [vmem:[%s4253_s29 + $0x110] sm:$0xff] }
  0xed   : > { %v1960_v35 = vpack.c.bf16 %v1956_v55, %v1955_v33  ;;  %3966 = vmatprep.subr.msk.bf16.mxu1 %vm562_vm0, %v5100_v20  ;;  %3965 = vmatprep.subr.msk.bf16.mxu0 %vm562_vm0, %v3513_v7  ;;  %v2102_v27 = vpack.c.bf16 %v2098_v63, %v2097_v24  ;;  %vm2704_vm15 = vcmp.ge.f32.partialorder %v2696_v49, 0.0  ;;  %v2712_v36 = vmul.f32 0.2, %v2696_v49  ;;  %v3503_v63 = vld [vmem:[%s4253_s29 + $0x100] sm:$0xff] }
  0xee   : > { %v2235_v28 = vpop.permute.xlu1 %2234  ;;  %v2230_v45 = vpop.permute.xlu0 %2229  ;;  %v2698_v46 = vadd.f32 %v4930_v11, %v2690_v37  ;;  %v5232_v52 = vsel %vm2391_vm14, %v2383_v44, %v2399_v38  ;;  %vm2703_vm1 = vcmp.ge.f32.partialorder %v2695_v42, 0.0  ;;  %v2531_v10 = vmul.f32 %v4953_v13, %v3499_v8 }
  0xef   : > { %v2268_v19 = vmul.f32 %v2235_v28, %v5059_v22  ;;  %v2410_v20 = vmul.f32 %v5108_v47, %v2235_v28  ;;  %v2267_v9 = vmul.f32 %v2230_v45, %v5077_v54  ;;  %v2409_v61 = vmul.f32 %v5127_v6, %v2230_v45 }
  0xf0   : > { %v2697_v25 = vadd.f32 %v4930_v11, %v2689_v53  ;;  %v2711_v41 = vmul.f32 0.2, %v2695_v42  ;;  %v2692_v22 = vmul.f32 %v4936_v34, %v3502_v40  ;;  %vm2706_vm2 = vcmp.ge.f32.partialorder %v2698_v46, 0.0 }
  0xf1   : > { %v2275_v60 = vpack.c.bf16 %v2268_v19, %v2267_v9  ;;  %v2417_v2 = vpack.c.bf16 %v2410_v20, %v2409_v61  ;;  %3750 = vmatmul.mubr.msk.bf16.gmra.mrb[4].mxu0 %vm549_vm9, %v1960_v35  ;;  %v2714_v6 = vmul.f32 0.2, %v2698_v46  ;;  %v2534_v26 = vmul.f32 %v4953_v13, %v3502_v40  ;;  %v3539_v20 = vld [vmem:[%s5453_s3 + $0x10] sm:$0x3] }
  0xf2   : > { %3760 = vmatmul.mubr.msk.bf16.gmra.mrb[4].mxu1 %vm549_vm9, %v2102_v27  ;;  %v2245_v54 = vpop.permute.xlu1 %2244  ;;  %v2240_v47 = vpop.permute.xlu0 %2239  ;;  %v2691_v4 = vmul.f32 %v4936_v34, %v3501_v51  ;;  %v5248_v39 = vsel %vm2704_vm15, %v2696_v49, %v2712_v36  ;;  %v5251_v15 = vadd.f32 %v4965_v0, %v2532_v57  ;;  %v5254_v29 = vadd.f32 %v4965_v0, %v2531_v10 }
  0xf3   : > { %v2270_v43 = vmul.f32 %v2245_v54, %v5090_v48  ;;  %v2412_v7 = vmul.f32 %v5149_v3, %v2245_v54  ;;  %v2269_v44 = vmul.f32 %v2240_v47, %v5130_v14  ;;  %v2411_v23 = vmul.f32 %v5152_v1, %v2240_v47  ;;  %3765 = vmatprep.mubr.msk.bf16.mxu0 %vm549_vm9, %v2275_v60 }
  0xf4   : > { %3775 = vmatprep.mubr.msk.bf16.mxu1 %vm549_vm9, %v2417_v2  ;;  %v2713_v48 = vmul.f32 0.2, %v2697_v25  ;;  %v2719_v14 = vsel %vm2703_vm1, %v2695_v42, %v2711_v41  ;;  %vm2705_vm3 = vcmp.ge.f32.partialorder %v2697_v25, 0.0  ;;  %v2700_v1 = vadd.f32 %v4930_v11, %v2692_v22 }
  0xf5   : > { %v2276_v3 = vpack.c.bf16 %v2270_v43, %v2269_v44  ;;  %v2418_v8 = vpack.c.bf16 %v2412_v7, %v2411_v23  ;;  %v5260_v49 = vsel %vm2706_vm2, %v2698_v46, %v2714_v6  ;;  %v5263_v37 = vadd.f32 %v4965_v0, %v2534_v26  ;;  %v3526_v44 = vld [vmem:[%s4253_s29 + $0x41] sm:$0xff] }
  0xf6   : > { %v2255_v18 = vpop.permute.xlu1 %2254  ;;  %v2250_v56 = vpop.permute.xlu0 %2249  ;;  %v2699_v55 = vadd.f32 %v4930_v11, %v2691_v4  ;;  %v5271_v53 = vsel %vm2705_vm3, %v2697_v25, %v2713_v48  ;;  %v2533_v35 = vmul.f32 %v4953_v13, %v3501_v51  ;;  %v2536_v57 = vmul.f32 %v4953_v13, %v3504_v5 }
  0xf7   : > { %v2272_v33 = vmul.f32 %v2255_v18, %v5140_v62  ;;  %v2414_v24 = vmul.f32 %v5164_v50, %v2255_v18  ;;  %v2271_v38 = vmul.f32 %v2250_v56, %v5167_v31  ;;  %v2413_v42 = vmul.f32 %v5189_v12, %v2250_v56  ;;  %v3544_v62 = vld [vmem:[%s5454_s4 + $0x10] sm:$0x3]  ;;  %v3524_v31 = vld [vmem:[%s4253_s29 + $0x21] sm:$0xff] }
  0xf8   : > { %v2694_v27 = vmul.f32 %v4936_v34, %v3504_v5  ;;  %v2716_v36 = vmul.f32 0.2, %v2700_v1  ;;  %v2693_v50 = vmul.f32 %v4936_v34, %v3503_v63  ;;  %vm2708_vm4 = vcmp.ge.f32.partialorder %v2700_v1, 0.0  ;;  %v3525_v18 = vld [vmem:[%s4253_s29 + $0x31] sm:$0xff] }
  0xf9   : > { %v2277_v28 = vpack.c.bf16 %v2272_v33, %v2271_v38  ;;  %v2419_v45 = vpack.c.bf16 %v2414_v24, %v2413_v42  ;;  %3766 = vmatmul.mubr.msk.bf16.vlgmr.msra.gmra.mrb[0].mxu0 %vm549_vm9, %v2276_v3  ;;  %vm2707_vm5 = vcmp.ge.f32.partialorder %v2699_v55, 0.0  ;;  %v2715_v40 = vmul.f32 0.2, %v2699_v55  ;;  %v3528_v42 = vld [vmem:[%s4253_s29 + $0x61] sm:$0xff] }
  0xfa   : > { %3776 = vmatmul.mubr.msk.bf16.vlgmr.msra.gmra.mrb[0].mxu1 %vm549_vm9, %v2418_v8  ;;  %v2265_v12 = vpop.permute.xlu1 %2264  ;;  %v2260_v46 = vpop.permute.xlu0 %2259  ;;  %3784 = vmatpush3.bf16.msra.mxu0 %v5204_v32  ;;  %v2535_v19 = vmul.f32 %v4953_v13, %v3503_v63  ;;  %v2541_v10 = vadd.f32 %v4965_v0, %v2533_v35  ;;  %v2702_v25 = vadd.f32 %v4930_v11, %v2694_v27  ;;  %vm3145_vm1 = vcmask 64512  }
  0xfb   : > { %3794 = vmatpush3.bf16.msra.mxu1 %v5123_v16  ;;  %v2274_v9 = vmul.f32 %v2265_v12, %v5174_v17  ;;  %v2416_v61 = vmul.f32 %v5221_v58, %v2265_v12  ;;  %v2273_v51 = vmul.f32 %v2260_v46, %v5177_v21  ;;  %v2415_v32 = vmul.f32 %v5232_v52, %v2260_v46  ;;  %v3523_v58 = vld [vmem:[%s4253_s29 + $0x11] sm:$0xff] }
  0xfc   : > { %3769 = vmatprep.mubr.msk.bf16.mxu0 %vm549_vm9, %v2277_v28  ;;  %3779 = vmatprep.mubr.msk.bf16.mxu1 %vm549_vm9, %v2419_v45  ;;  %v3004_v60 = vmul.f32 %v4936_v34, %v3524_v31  ;;  %v2724_v16 = vsel %vm2708_vm4, %v2700_v1, %v2716_v36  ;;  %v5301_v17 = vsel %vm562_vm0, %v3544_v62, 0  ;;  %v2701_v21 = vadd.f32 %v4930_v11, %v2693_v50  ;;  %v3527_v12 = vld [vmem:[%s4253_s29 + $0x51] sm:$0xff] }
  0xfd   : > { %v2278_v2 = vpack.c.bf16 %v2274_v9, %v2273_v51  ;;  %3968 = vmatprep.subr.msk.bf16.mxu1 %vm562_vm0, %v3544_v62  ;;  %3967 = vmatprep.subr.msk.bf16.mxu0 %vm562_vm0, %v3539_v20  ;;  %v2420_v52 = vpack.c.bf16 %v2416_v61, %v2415_v32  ;;  %v2723_v54 = vsel %vm2707_vm5, %v2699_v55, %v2715_v40  ;;  %vm2710_vm6 = vcmp.ge.f32.partialorder %v2702_v25, 0.0 }
  0xfe   : > { %v2553_v41 = vpop.permute.xlu1 %2552  ;;  %v2548_v22 = vpop.permute.xlu0 %2547  ;;  %v5308_v47 = vadd.f32 %v4965_v0, %v2536_v57  ;;  %v5311_v6 = vadd.f32 %v4965_v0, %v2535_v19  ;;  %v2718_v23 = vmul.f32 0.2, %v2702_v25  ;;  %v3012_v48 = vadd.f32 %v4930_v11, %v3004_v60 }
  0xff   : > { %v2586_v26 = vmul.f32 %v2553_v41, %v5196_v30  ;;  %v2728_v4 = vmul.f32 %v5248_v39, %v2553_v41  ;;  %v2585_v43 = vmul.f32 %v2548_v22, %v5214_v59  ;;  %v2727_v7 = vmul.f32 %v2719_v14, %v2548_v22  ;;  %v3529_v41 = vld [vmem:[%s4253_s29 + $0x71] sm:$0xff] }
 0x100   : > { %v3003_v3 = vmul.f32 %v4936_v34, %v3523_v58  ;;  %v2717_v8 = vmul.f32 0.2, %v2701_v21  ;;  %v2846_v30 = vmul.f32 %v4953_v13, %v3524_v31  ;;  %vm2709_vm7 = vcmp.ge.f32.partialorder %v2701_v21, 0.0 }
 0x101   : > { %v2593_v1 = vpack.c.bf16 %v2586_v26, %v2585_v43  ;;  %v2735_v5 = vpack.c.bf16 %v2728_v4, %v2727_v7  ;;  %3770 = vmatmul.mubr.msk.bf16.gmra.mrb[4].mxu0 %vm549_vm9, %v2278_v2  ;;  %v2845_v14 = vmul.f32 %v4953_v13, %v3523_v58  ;;  %v3006_v56 = vmul.f32 %v4936_v34, %v3526_v44 }
 0x102   : > { %3780 = vmatmul.mubr.msk.bf16.gmra.mrb[4].mxu1 %vm549_vm9, %v2420_v52  ;;  %v2563_v59 = vpop.permute.xlu1 %2562  ;;  %v2558_v39 = vpop.permute.xlu0 %2557  ;;  %v2928_v55 = vsel %vm562_vm0, %v3539_v20, 0  ;;  %v2726_v35 = vsel %vm2710_vm6, %v2702_v25, %v2718_v23  ;;  %v3028_v57 = vmul.f32 0.2, %v3012_v48  ;;  %v3011_v27 = vadd.f32 %v4930_v11, %v3003_v3  ;;  %v3530_v52 = vld [vmem:[%s4253_s29 + $0x81] sm:$0xff]  ;;  %s3551_s29 = sshll.u32 %s5517_s25, 6 }
 0x103   : > { %v2588_v63 = vmul.f32 %v2563_v59, %v5251_v15  ;;  %v2730_v33 = vmul.f32 %v5260_v49, %v2563_v59  ;;  %v2587_v24 = vmul.f32 %v2558_v39, %v5254_v29  ;;  %v2729_v38 = vmul.f32 %v5271_v53, %v2558_v39  ;;  %3785 = vmatprep.mubr.msk.bf16.mxu0 %vm549_vm9, %v2593_v1  ;;  %s5388_s19 = scalar_lea.vmem %s5455_s5, %s3551_s29  ;;  %s5393_s22 = scalar_lea.vmem %s5456_s6, %s3551_s29 }
 0x104   : > { %3795 = vmatprep.mubr.msk.bf16.mxu1 %vm549_vm9, %v2735_v5  ;;  %v3005_v28 = vmul.f32 %v4936_v34, %v3525_v18  ;;  %v2725_v49 = vsel %vm2709_vm7, %v2701_v21, %v2717_v8  ;;  %v2854_v29 = vadd.f32 %v4965_v0, %v2846_v30  ;;  %vm3020_vm0 = vcmp.ge.f32.partialorder %v3012_v48, 0.0 }
 0x105   : > { %v2594_v15 = vpack.c.bf16 %v2588_v63, %v2587_v24  ;;  %v2736_v53 = vpack.c.bf16 %v2730_v33, %v2729_v38  ;;  %v2853_v62 = vadd.f32 %v4965_v0, %v2845_v14  ;;  %v3014_v50 = vadd.f32 %v4930_v11, %v3006_v56 }
 0x106   : > { %v2573_v45 = vpop.permute.xlu1 %2572  ;;  %v2568_v36 = vpop.permute.xlu0 %2567  ;;  %v3008_v31 = vmul.f32 %v4936_v34, %v3528_v42  ;;  %v3036_v9 = vsel %vm3020_vm0, %v3012_v48, %v3028_v57  ;;  %v3027_v61 = vmul.f32 0.2, %v3011_v27  ;;  %v2848_v51 = vmul.f32 %v4953_v13, %v3526_v44 }
 0x107   : > { %v2590_v46 = vmul.f32 %v2573_v45, %v5263_v37  ;;  %v2732_v40 = vmul.f32 %v2724_v16, %v2573_v45  ;;  %v2589_v19 = vmul.f32 %v2568_v36, %v2541_v10  ;;  %v2731_v20 = vmul.f32 %v2723_v54, %v2568_v36 }
 0x108   : > { %v3013_v32 = vadd.f32 %v4930_v11, %v3005_v28  ;;  %vm3019_vm8 = vcmp.ge.f32.partialorder %v3011_v27, 0.0  ;;  %v3007_v2 = vmul.f32 %v4936_v34, %v3527_v12  ;;  %vm3022_vm10 = vcmp.ge.f32.partialorder %v3014_v50, 0.0 }
 0x109   : > { %v2595_v25 = vpack.c.bf16 %v2590_v46, %v2589_v19  ;;  %v2737_v60 = vpack.c.bf16 %v2732_v40, %v2731_v20  ;;  %3786 = vmatmul.mubr.msk.bf16.vlgmr.msra.gmra.mrb[0].mxu0 %vm549_vm9, %v2594_v15  ;;  %v3030_v16 = vmul.f32 0.2, %v3014_v50  ;;  %v2847_v21 = vmul.f32 %v4953_v13, %v3525_v18 }
 0x10a   : > { %3796 = vmatmul.mubr.msk.bf16.vlgmr.msra.gmra.mrb[0].mxu1 %vm549_vm9, %v2736_v53  ;;  %v2583_v37 = vpop.permute.xlu1 %2582  ;;  %v2578_v10 = vpop.permute.xlu0 %2577  ;;  %3804 = vmatpush3.bf16.msra.mxu0 %v2928_v55  ;;  %v3016_v58 = vadd.f32 %v4930_v11, %v3008_v31  ;;  %v3035_v43 = vsel %vm3019_vm8, %v3011_v27, %v3027_v61  ;;  %v2856_v7 = vadd.f32 %v4965_v0, %v2848_v51  ;;  %v3029_v44 = vmul.f32 0.2, %v3013_v32 }
 0x10b   : > { %3814 = vmatpush3.bf16.msra.mxu1 %v5301_v17  ;;  %v2592_v22 = vmul.f32 %v2583_v37, %v5308_v47  ;;  %v2734_v54 = vmul.f32 %v2726_v35, %v2583_v37  ;;  %v2591_v26 = vmul.f32 %v2578_v10, %v5311_v6  ;;  %v2733_v4 = vmul.f32 %v2725_v49, %v2578_v10 }
 0x10c   : > { %3789 = vmatprep.mubr.msk.bf16.mxu0 %vm549_vm9, %v2595_v25  ;;  %3799 = vmatprep.mubr.msk.bf16.mxu1 %vm549_vm9, %v2737_v60  ;;  %v2850_v23 = vmul.f32 %v4953_v13, %v3528_v42  ;;  %v3015_v17 = vadd.f32 %v4930_v11, %v3007_v2  ;;  %v3010_v47 = vmul.f32 %v4936_v34, %v3530_v52  ;;  %vm3021_vm11 = vcmp.ge.f32.partialorder %v3013_v32, 0.0 }
 0x10d   : > { %v2596_v48 = vpack.c.bf16 %v2592_v22, %v2591_v26  ;;  %v3009_v3 = vmul.f32 %v4936_v34, %v3529_v41  ;;  %v2738_v6 = vpack.c.bf16 %v2734_v54, %v2733_v4  ;;  %v3038_v5 = vsel %vm3022_vm10, %v3014_v50, %v3030_v16 }
 0x10e   : > { %v2869_v1 = vpop.permute.xlu1 %2868  ;;  %v2855_v8 = vadd.f32 %v4965_v0, %v2847_v21  ;;  %v2864_v59 = vpop.permute.xlu0 %2863  ;;  %v3032_v39 = vmul.f32 0.2, %v3016_v58  ;;  %v2849_v14 = vmul.f32 %v4953_v13, %v3527_v12  ;;  %v2858_v63 = vadd.f32 %v4965_v0, %v2850_v23 }
 0x10f   : > { %v2902_v30 = vmul.f32 %v2869_v1, %v2854_v29  ;;  %v3044_v18 = vmul.f32 %v3036_v9, %v2869_v1  ;;  %v2901_v56 = vmul.f32 %v2864_v59, %v2853_v62  ;;  %v3043_v55 = vmul.f32 %v3035_v43, %v2864_v59 }
 0x110   : > { %vm3024_vm12 = vcmp.ge.f32.partialorder %v3016_v58, 0.0  ;;  %v3037_v34 = vsel %vm3021_vm11, %v3013_v32, %v3029_v44  ;;  %v3031_v33 = vmul.f32 0.2, %v3015_v17  ;;  %v3018_v24 = vadd.f32 %v4930_v11, %v3010_v47 }
 0x111   : > { %3790 = vmatmul.mubr.msk.bf16.gmra.mrb[4].mxu0 %vm549_vm9, %v2596_v48  ;;  %v3017_v38 = vadd.f32 %v4930_v11, %v3009_v3  ;;  %v2909_v42 = vpack.c.bf16 %v2902_v30, %v2901_v56  ;;  %v3051_v35 = vpack.c.bf16 %v3044_v18, %v3043_v55  ;;  %vm3023_vm13 = vcmp.ge.f32.partialorder %v3015_v17, 0.0 }
 0x112   : > { %3800 = vmatmul.mubr.msk.bf16.gmra.mrb[4].mxu1 %vm549_vm9, %v2738_v6  ;;  %v2879_v57 = vpop.permute.xlu1 %2878  ;;  %v2852_v27 = vmul.f32 %v4953_v13, %v3530_v52  ;;  %v3040_v29 = vsel %vm3024_vm12, %v3016_v58, %v3032_v39  ;;  %v2857_v53 = vadd.f32 %v4965_v0, %v2849_v14  ;;  %v2851_v11 = vmul.f32 %v4953_v13, %v3529_v41 }
 0x113   : > { %v2904_v28 = vmul.f32 %v2879_v57, %v2856_v7  ;;  %v3046_v15 = vmul.f32 %v3038_v5, %v2879_v57  ;;  %v2874_v49 = vpop.permute.xlu0 %2873  ;;  %3805 = vmatprep.mubr.msk.bf16.mxu0 %vm549_vm9, %v2909_v42  ;;  %3815 = vmatprep.mubr.msk.bf16.mxu1 %vm549_vm9, %v3051_v35  ;;  %v3039_v62 = vsel %vm3023_vm13, %v3015_v17, %v3031_v33  ;;  %v3034_v50 = vmul.f32 0.2, %v3018_v24 }
 0x114   : > { %v2903_v45 = vmul.f32 %v2874_v49, %v2855_v8  ;;  %v3045_v36 = vmul.f32 %v3037_v34, %v2874_v49  ;;  %v3033_v31 = vmul.f32 0.2, %v3017_v38  ;;  %vm3026_vm14 = vcmp.ge.f32.partialorder %v3018_v24, 0.0 }
 0x115   : > { %vm3025_vm15 = vcmp.ge.f32.partialorder %v3017_v38, 0.0  ;;  %v2860_v32 = vadd.f32 %v4965_v0, %v2852_v27  ;;  %v2859_v25 = vadd.f32 %v4965_v0, %v2851_v11  ;;  %v3042_v13 = vsel %vm3026_vm14, %v3018_v24, %v3034_v50 }
 0x116   : > { %v2910_v12 = vpack.c.bf16 %v2904_v28, %v2903_v45  ;;  %v3052_v46 = vpack.c.bf16 %v3046_v15, %v3045_v36  ;;  %v2889_v40 = vpop.permute.xlu1 %2888  ;;  %v3041_v60 = vsel %vm3025_vm15, %v3017_v38, %v3033_v31 }
 0x117   : > { %v2906_v19 = vmul.f32 %v2889_v40, %v2858_v63  ;;  %v3048_v20 = vmul.f32 %v3040_v29, %v2889_v40  ;;  %v2884_v9 = vpop.permute.xlu0 %2883 }
 0x118   : > { %v2905_v61 = vmul.f32 %v2884_v9, %v2857_v53  ;;  %v3047_v51 = vmul.f32 %v3039_v62, %v2884_v9 }
 0x119   : > { %3806 = vmatmul.mubr.msk.bf16.vlgmr.msra.gmra.mrb[0].mxu0 %vm549_vm9, %v2910_v12 }
 0x11a   : > { %v2911_v2 = vpack.c.bf16 %v2906_v19, %v2905_v61  ;;  %v3053_v37 = vpack.c.bf16 %v3048_v20, %v3047_v51  ;;  %3816 = vmatmul.mubr.msk.bf16.vlgmr.msra.gmra.mrb[0].mxu1 %vm549_vm9, %v3052_v46 }
 0x11b   : > { %v2899_v10 = vpop.permute.xlu1 %2898  ;;  %v2894_v16 = vpop.permute.xlu0 %2893 }
 0x11c   : > { %v2908_v21 = vmul.f32 %v2899_v10, %v2860_v32  ;;  %v3050_v58 = vmul.f32 %v3042_v13, %v2899_v10  ;;  %v2907_v52 = vmul.f32 %v2894_v16, %v2859_v25  ;;  %v3049_v41 = vmul.f32 %v3041_v60, %v2894_v16  ;;  %3809 = vmatprep.mubr.msk.bf16.mxu0 %vm549_vm9, %v2911_v2 }
 0x11d   : > { %3819 = vmatprep.mubr.msk.bf16.mxu1 %vm549_vm9, %v3053_v37 }
 0x11e   : > { %v2912_v0 = vpack.c.bf16 %v2908_v21, %v2907_v52  ;;  %v3054_v22 = vpack.c.bf16 %v3050_v58, %v3049_v41 }
 0x121   : > { %3810 = vmatmul.mubr.msk.bf16.gmra.mrb[4].mxu0 %vm549_vm9, %v2912_v0 }
 0x122   : > { %3820 = vmatmul.mubr.msk.bf16.gmra.mrb[4].mxu1 %vm549_vm9, %v3054_v22  ;;  %vm3183_vm9 = vcmask 57344  }
 0x1ec   : > { %v3807_v54 = vpop.f32.mrb[0].mxu0 }
 0x1ed   : > { %3148 = vst.msk [vmem:[%s5388_s19 + $0x10] sm:$0xff] %vm3145_vm1, %v3807_v54  ;;  %v3817_v26 = vpop.f32.mrb[0].mxu1  ;;  %v2964_v4 = vpop.f32.mrb[1].mxu0 }
 0x1ee   : > { %3156 = vst.msk [vmem:[%s5393_s22 + $0x10] sm:$0xff] %vm3145_vm1, %v3817_v26  ;;  %3146 = vst.msk [vmem:[%s5388_s19] sm:$0xff] %vm3145_vm1, %v2964_v4  ;;  %v3106_v43 = vpop.f32.mrb[1].mxu1  ;;  %v3808_v7 = vpop.f32.mrb[2].mxu0  ;;  %v3187_v47 = vmul.f32 %v3817_v26, %v3817_v26  ;;  %v3165_v8 = vsel %vm3145_vm1, %v3817_v26, 0.0 }
 0x1ef   : > { %3154 = vst.msk [vmem:[%s5393_s22] sm:$0xff] %vm3145_vm1, %v3106_v43  ;;  %v3185_v44 = vmul.f32 %v3106_v43, %v3106_v43  ;;  %3149 = vst.msk [vmem:[%s5388_s19 + $0x18] sm:$0xff] %vm3145_vm1, %v3808_v7  ;;  %v3818_v23 = vpop.f32.mrb[2].mxu1  ;;  %v2967_v48 = vpop.f32.mrb[3].mxu0  ;;  %v3162_v3 = vsel %vm3145_vm1, %v3106_v43, 0.0 }
 0x1f0   : > { %3157 = vst.msk [vmem:[%s5393_s22 + $0x18] sm:$0xff] %vm3145_vm1, %v3818_v23  ;;  %3147 = vst.msk [vmem:[%s5388_s19 + $0x8] sm:$0xff] %vm3145_vm1, %v2967_v48  ;;  %v3109_v17 = vpop.f32.mrb[3].mxu1  ;;  %v3188_v18 = vmul.f32 %v3818_v23, %v3818_v23  ;;  %v3196_v55 = vsel %vm3145_vm1, %v3187_v47, 0.0  ;;  %v3167_v63 = vsel %vm3145_vm1, %v3818_v23, 0.0 }
 0x1f1   : > { %3155 = vst.msk [vmem:[%s5393_s22 + $0x8] sm:$0xff] %vm3145_vm1, %v3109_v17  ;;  %v3163_v6 = vsel %vm3145_vm1, %v3109_v17, 0.0  ;;  %v3186_v1 = vmul.f32 %v3109_v17, %v3109_v17  ;;  %v3193_v30 = vsel %vm3145_vm1, %v3185_v44, 0.0 }
 0x1f2   : > { %v3164_v5 = vadd.f32 %v3163_v6, %v3162_v3  ;;  %v3198_v57 = vsel %vm3145_vm1, %v3188_v18, 0.0 }
 0x1f3   : > { %v3194_v59 = vsel %vm3145_vm1, %v3186_v1, 0.0 }
 0x1f4   : > { %v3166_v39 = vadd.f32 %v3165_v8, %v3164_v5  ;;  %v3195_v14 = vadd.f32 %v3194_v59, %v3193_v30  ;;  %v3811_v56 = vpop.f32.mrb[4].mxu0 }
 0x1f5   : > { %3152 = vst.msk [vmem:[%s5388_s19 + $0x30] sm:$0xff] %vm3145_vm1, %v3811_v56  ;;  %v3821_v34 = vpop.f32.mrb[4].mxu1  ;;  %v2980_v33 = vpop.f32.mrb[5].mxu0 }
 0x1f6   : > { %v3197_v24 = vadd.f32 %v3196_v55, %v3195_v14  ;;  %3160 = vst.msk [vmem:[%s5393_s22 + $0x30] sm:$0xff] %vm3145_vm1, %v3821_v34  ;;  %3150 = vst.msk [vmem:[%s5388_s19 + $0x20] sm:$0xff] %vm3145_vm1, %v2980_v33  ;;  %v3122_v38 = vpop.f32.mrb[5].mxu1  ;;  %v3168_v42 = vadd.f32 %v3167_v63, %v3166_v39  ;;  %v3812_v35 = vpop.f32.mrb[6].mxu0  ;;  %v3191_v36 = vmul.f32 %v3821_v34, %v3821_v34  ;;  %v3173_v46 = vsel %vm3145_vm1, %v3821_v34, 0.0 }
 0x1f7   : > { %3158 = vst.msk [vmem:[%s5393_s22 + $0x20] sm:$0xff] %vm3145_vm1, %v3122_v38  ;;  %v3169_v27 = vsel %vm3145_vm1, %v3122_v38, 0.0  ;;  %v3189_v28 = vmul.f32 %v3122_v38, %v3122_v38  ;;  %3153 = vst.msk [vmem:[%s5388_s19 + $0x38] sm:$0xff] %vm3145_vm1, %v3812_v35  ;;  %v3822_v15 = vpop.f32.mrb[6].mxu1  ;;  %v2983_v49 = vpop.f32.mrb[7].mxu0 }
 0x1f8   : > { %v3170_v29 = vadd.f32 %v3169_v27, %v3168_v42  ;;  %v3199_v53 = vadd.f32 %v3198_v57, %v3197_v24  ;;  %3161 = vst.msk [vmem:[%s5393_s22 + $0x38] sm:$0xff] %vm3145_vm1, %v3822_v15  ;;  %3151 = vst.msk [vmem:[%s5388_s19 + $0x28] sm:$0xff] %vm3145_vm1, %v2983_v49  ;;  %v3125_v45 = vpop.f32.mrb[7].mxu1  ;;  %v3192_v40 = vmul.f32 %v3822_v15, %v3822_v15  ;;  %v3204_v61 = vsel %vm3145_vm1, %v3191_v36, 0.0 }
 0x1f9   : > { %v3200_v11 = vsel %vm3145_vm1, %v3189_v28, 0.0  ;;  %3159 = vst.msk [vmem:[%s5393_s22 + $0x28] sm:$0xff] %vm3145_vm1, %v3125_v45  ;;  %v3171_v62 = vsel %vm3145_vm1, %v3125_v45, 0.0  ;;  %v3190_v50 = vmul.f32 %v3125_v45, %v3125_v45  ;;  %v3175_v51 = vsel %vm3145_vm1, %v3822_v15, 0.0 }
 0x1fa   : > { %v3201_v31 = vadd.f32 %v3200_v11, %v3199_v53  ;;  %v3172_v12 = vadd.f32 %v3171_v62, %v3170_v29  ;;  %v3206_v13 = vsel %vm3145_vm1, %v3192_v40, 0.0 }
 0x1fb   : > { %v3202_v19 = vsel %vm3145_vm1, %v3190_v50, 0.0 }
 0x1fc   : > { %v3174_v20 = vadd.f32 %v3173_v46, %v3172_v12  ;;  %v3203_v9 = vadd.f32 %v3202_v19, %v3201_v31 }
 0x1fe   : > { %v3176_v32 = vadd.f32 %v3175_v51, %v3174_v20  ;;  %v3205_v25 = vadd.f32 %v3204_v61, %v3203_v9 }
 0x200   : > { %v3177_v60 = vrot.slane %v3176_v32, 4  ;;  %v3207_v2 = vadd.f32 %v3206_v13, %v3205_v25 }
 0x202   : > { %v3178_v37 = vadd.f32 %v3177_v60, %v3176_v32  ;;  %v3208_v10 = vrot.slane %v3207_v2, 4 }
 0x204   : > { %v3179_v16 = vrot.slane %v3178_v37, 2  ;;  %v3209_v21 = vadd.f32 %v3208_v10, %v3207_v2 }
 0x206   : > { %v3180_v58 = vadd.f32 %v3179_v16, %v3178_v37  ;;  %v3210_v52 = vrot.slane %v3209_v21, 2 }
 0x208   : > { %v3181_v41 = vrot.slane %v3180_v58, 1  ;;  %v3211_v0 = vadd.f32 %v3210_v52, %v3209_v21 }
 0x20a   : > { %v3182_v22 = vadd.f32 %v3181_v41, %v3180_v58  ;;  %v3212_v54 = vrot.slane %v3211_v0, 1 }
 0x20c   : > { %3184 = vst.msk [vmem:[%s301_s28] sm:$0x1] %vm3183_vm9, %v3182_v22  ;;  %v3213_v26 = vadd.f32 %v3212_v54, %v3211_v0 }
 0x20e   : > { %3214 = vst.msk [vmem:[%s301_s28 + $0x1] sm:$0x1] %vm3183_vm9, %v3213_v26 }
 0x20f PF: > { %s18_s24 = sadd.s32 1, %s3991_s24  }
 0x210   : > { %p15_p4 = scmp.ge.s32.totalorder %s18_s24, 4  }
 0x212   :  { %17 = sbr.rel (!%p15_p4) target bundleno = 1 (0x1), region = 120 }

</bundles_post_ra>
